<compile_context>
chip_gen: v7x
topology: tpu7x:2x2x1
jax: 0.10.0
libtpu: 0.0.40
codegen_flags: <defaults>
</compile_context>

<pallas_src>
import numpy as np
import jax
import jax.numpy as jnp
from jax import lax
from jax.experimental import pallas as pl
from jax.experimental.pallas import tpu as pltpu

BETA = 1.0
THRESH = 1.0
NUM_STEPS = 25
K = 5      # conv kernel size
LANE = 128


# ---------------------------------------------------------------------------
# Pallas kernel: one pixel-block (lanes), all time steps
# ---------------------------------------------------------------------------
def snn_kernel(patches_ref, w_ref, b_ref, spk3_ref, mem3_ref):
    """patches_ref: [T, KKC, Pb] im2col patches, pixels in lanes (zero-padded cols OK)
       w_ref:       [C1, KKC]    conv1 weight slab, transposed (channel-major result)
       b_ref:       [C1, 1]      conv1 bias (broadcast over lanes)
       spk3_ref, mem3_ref: [T, C1, Pb] outputs (also used as in-kernel stash buffers)
    """
    t_steps, c1, pb = spk3_ref.shape

    # Hoist loads / broadcasts out of the unrolled loop (JAX does not CSE them).
    w = w_ref[...]                                          # [C1, KKC]
    bias = jnp.broadcast_to(b_ref[...], (c1, pb))           # [C1, Pb], lane-broadcast

    # TODO(synk): conv2/lif2/fc1 of the original forward are dead w.r.t. the returned
    # (spk3, mem3) and are elided here (see reference() below for proof of equivalence).

    # Sequential scan over time: only mem1 is carried. T is small and static, so a
    # fully unrolled Python loop gives static ref indices; the step-t matmul (MXU) has
    # no dependence on step t-1's LIF math (VPU) and co-issues with it.
    mem1 = jnp.zeros((c1, pb), jnp.float32)
    for t in range(t_steps):
        # conv1 for step t as one matmul; result is already [C1, Pb] (pixels in lanes).
        cur = jnp.dot(w, patches_ref[t], preferred_element_type=jnp.float32) + bias
        # lif1 (beta=1, threshold=1, reset-by-subtraction); constants folded.
        mem1 = mem1 + cur - (mem1 > THRESH).astype(jnp.float32)
        # Stash cur / mem1 for the vectorized lif3 epilogue (outputs double as scratch).
        spk3_ref[t] = cur
        mem3_ref[t] = mem1

    # lif3 is wired to (cur1, mem1) and never feeds the recurrence -> compute it for
    # all T at once as dense, full-vreg VPU work off the serial critical path.
    cur_all = spk3_ref[...]
    mem1_all = mem3_ref[...]
    mem3_all = mem1_all + cur_all - (mem1_all > THRESH).astype(jnp.float32)
    mem3_ref[...] = mem3_all
    spk3_ref[...] = (mem3_all > THRESH).astype(jnp.float32)


# ---------------------------------------------------------------------------
# Wrapper: layout plumbing (im2col pixels-last, weight slab) + single pallas_call
# ---------------------------------------------------------------------------
def _default_num_blocks():
    # 2 pixel blocks only where there are 2 TensorCores (v7x); 1 block on v5e/v6e.
    try:
        kind = jax.devices()[0].device_kind.lower()
    except Exception:
        return 1
    return 2 if "v7" in kind else 1


def snn_net(x_nchw, params, *, num_blocks=None):
    """x_nchw: [T, B, Cin, H, W] (PyTorch layout). Returns (spk3, mem3) in NCHW,
    each shaped [T, B, 12, H-4, W-4] like the PyTorch module."""
    if num_blocks is None:
        num_blocks = _default_num_blocks()
    w1, b1 = params[0], params[1]          # conv2 / fc1 params are dead w.r.t. outputs
    T, B, Cin, H, W = x_nchw.shape
    C1 = w1.shape[0]
    H1, W1 = H - K + 1, W - K + 1
    KKC = K * K * Cin
    P = B * H1 * W1
    # 128-lane-aligned pixel blocks, one per grid step.
    P_blk = ((P + num_blocks - 1) // num_blocks + LANE - 1) // LANE * LANE
    P_pad = P_blk * num_blocks

    # ---- wrapper-side data prep (layout plumbing only) ----
    # im2col with pixels LAST (lane-dense) and feature order (ki, kj, cin):
    cols = [x_nchw[:, :, :, ki:ki + H1, kj:kj + W1]        # each [T, B, Cin, H1, W1]
            for ki in range(K) for kj in range(K)]
    patches = jnp.concatenate(cols, axis=2)                 # [T, B, KKC, H1, W1]
    patches = jnp.transpose(patches, (0, 2, 1, 3, 4)).reshape(T, KKC, P)
    patches = jnp.pad(patches, ((0, 0), (0, 0), (0, P_pad - P)))   # pad pixel lanes

    # weight slab transposed to [C1, KKC] so the MXU result is channel-major
    w1_k = jnp.transpose(w1, (0, 2, 3, 1)).reshape(C1, KKC)        # (ki, kj, cin) order
    b1_k = b1.reshape(C1, 1)

    out_sds = jax.ShapeDtypeStruct((T, C1, P_pad), jnp.float32)
    out_spec = pl.BlockSpec((T, C1, P_blk), lambda i: (0, 0, i))

    spk3, mem3 = pl.pallas_call(
        snn_kernel,
        out_shape=(out_sds, out_sds),
        grid=(num_blocks,),
        in_specs=[
            pl.BlockSpec((T, KKC, P_blk), lambda i: (0, 0, i)),    # patches: split over P
            pl.BlockSpec((C1, KKC), lambda i: (0, 0)),             # weight slab (shared)
            pl.BlockSpec((C1, 1), lambda i: (0, 0)),               # bias (shared)
        ],
        out_specs=(out_spec, out_spec),
        compiler_params=pltpu.CompilerParams(
            dimension_semantics=("parallel",)),                    # both TCs on v7x
    )(patches, w1_k, b1_k)

    def to_nchw(y):
        y = y[:, :, :P].reshape(T, C1, B, H1, W1)
        return jnp.transpose(y, (0, 2, 1, 3, 4))

    return to_nchw(spk3), to_nchw(mem3)


# ---------------------------------------------------------------------------
# Deterministic parameter init (PyTorch-style uniform(-1/sqrt(fan_in), +))
# ---------------------------------------------------------------------------
def init_params(key):
    ks = jax.random.split(key, 6)

    def uni(k, shape, fan_in):
        bound = 1.0 / float(np.sqrt(fan_in))
        return jax.random.uniform(k, shape, jnp.float32, -bound, bound)

    w1 = uni(ks[0], (12, 2, K, K), 2 * K * K)
    b1 = uni(ks[1], (12,), 2 * K * K)
    w2 = uni(ks[2], (32, 12, K, K), 12 * K * K)
    b2 = uni(ks[3], (32,), 12 * K * K)
    wfc = uni(ks[4], (2, 32 * 5 * 5), 32 * 5 * 5)
    bfc = uni(ks[5], (2,), 32 * 5 * 5)
    return w1, b1, w2, b2, wfc, bfc


# ---------------------------------------------------------------------------
# Pure-JAX reference (mirrors the full PyTorch forward, incl. the dead path)
# ---------------------------------------------------------------------------
def reference(x_nchw, params):
    w1, b1, w2, b2, wfc, bfc = params
    T, B = x_nchw.shape[0], x_nchw.shape[1]
    dn = ('NCHW', 'OIHW', 'NCHW')
    mem1 = jnp.zeros((), jnp.float32)
    mem2 = jnp.zeros((), jnp.float32)
    spk3_rec, mem3_rec = [], []
    for step in range(T):
        cur1 = lax.conv_general_dilated(x_nchw[step], w1, (1, 1), 'VALID',
                                        dimension_numbers=dn) + b1[None, :, None, None]
        reset1 = (mem1 > THRESH).astype(jnp.float32)
        mem1 = BETA * mem1 + cur1 - reset1 * THRESH
        spk1 = (mem1 > THRESH).astype(jnp.float32)

        cur2 = lax.conv_general_dilated(spk1, w2, (1, 1), 'VALID',
                                        dimension_numbers=dn) + b2[None, :, None, None]
        reset2 = (mem2 > THRESH).astype(jnp.float32)
        mem2 = BETA * mem2 + cur2 - reset2 * THRESH
        spk2 = (mem2 > THRESH).astype(jnp.float32)

        _cur3 = spk2.reshape(B, -1) @ wfc.T + bfc   # computed, unused (as in original)

        reset3 = (mem1 > THRESH).astype(jnp.float32)
        mem3 = BETA * mem1 + cur1 - reset3 * THRESH
        spk3 = (mem3 > THRESH).astype(jnp.float32)
        spk3_rec.append(spk3)
        mem3_rec.append(mem3)
    return jnp.stack(spk3_rec, 0), jnp.stack(mem3_rec, 0)


if __name__ == "__main__":
    key = jax.random.PRNGKey(0)
    kx, kp = jax.random.split(key)

    # input spatial 13x13 -> conv1 9x9 -> conv2 5x5 (consistent with fc1: 32*5*5)
    T, B, Cin, H, W = NUM_STEPS, 2, 2, 13, 13
    x = jax.random.uniform(kx, (T, B, Cin, H, W), jnp.float32)
    params = init_params(kp)

    spk3, mem3 = snn_net(x, params)
    spk3, mem3 = jax.block_until_ready((spk3, mem3))

    assert spk3.shape == (T, B, 12, H - 4, W - 4)
    assert mem3.shape == (T, B, 12, H - 4, W - 4)

    # correctness check vs pure-JAX reference (which still runs the full forward)
    spk3_ref, mem3_ref = reference(x, params)
    mem3_np, mem3_ref_np = np.asarray(mem3), np.asarray(mem3_ref)
    np.testing.assert_allclose(mem3_np, mem3_ref_np, rtol=1e-3, atol=1e-3)
    # spikes are a hard threshold at 1.0 -> only compare where mem is safely away from it
    safe = np.abs(mem3_ref_np - THRESH) > 1e-2
    assert np.array_equal(np.asarray(spk3)[safe], np.asarray(spk3_ref)[safe])

    print("KERNEL_OK")
</pallas_src>

<mosaic_0001>
module attributes {stable_mosaic.version = 11 : i64} {
  func.func @snn_kernel(%arg0: i32, %arg1: memref<25x50x256xf32, #tpu.memory_space<vmem>>, %arg2: memref<12x50xf32, #tpu.memory_space<vmem>>, %arg3: memref<12x1xf32, #tpu.memory_space<vmem>>, %arg4: memref<25x12x256xf32, #tpu.memory_space<vmem>>, %arg5: memref<25x12x256xf32, #tpu.memory_space<vmem>>) attributes {dimension_semantics = [#tpu.dimension_semantics<parallel>], iteration_bounds = array<i64: 1>, scalar_prefetch = 0 : i64, scratch_operands = 0 : i64, tpu.core_type = #tpu.core_type<tc>, window_params = [{transform_indices = @transform_0, window_bounds = array<i64: 25, 50, 256>}, {pipeline_mode = #tpu.pipeline_mode<synchronous>, transform_indices = @transform_1, window_bounds = array<i64: 12, 50>}, {pipeline_mode = #tpu.pipeline_mode<synchronous>, transform_indices = @transform_2, window_bounds = array<i64: 12, 1>}, {transform_indices = @transform_3, window_bounds = array<i64: 25, 12, 256>}, {transform_indices = @transform_4, window_bounds = array<i64: 25, 12, 256>}]} {
    %c0 = arith.constant 0 : index
    %c0_0 = arith.constant 0 : index
    %0 = vector.load %arg2[%c0, %c0_0] : memref<12x50xf32, #tpu.memory_space<vmem>>, vector<12x50xf32>
    %c0_1 = arith.constant 0 : index
    %c0_2 = arith.constant 0 : index
    %1 = vector.load %arg3[%c0_1, %c0_2] : memref<12x1xf32, #tpu.memory_space<vmem>>, vector<12x1xf32>
    %2 = vector.shape_cast %1 : vector<12x1xf32> to vector<12x1xf32>
    %3 = vector.broadcast %2 : vector<12x1xf32> to vector<12x256xf32>
    %cst = arith.constant 0.000000e+00 : f32
    %4 = vector.broadcast %cst : f32 to vector<12x256xf32>
    %c0_3 = arith.constant 0 : index
    %c0_4 = arith.constant 0 : index
    %c0_5 = arith.constant 0 : index
    %5 = vector.load %arg1[%c0_3, %c0_4, %c0_5] : memref<25x50x256xf32, #tpu.memory_space<vmem>>, vector<1x50x256xf32>
    %6 = vector.shape_cast %5 : vector<1x50x256xf32> to vector<50x256xf32>
    %cst_6 = arith.constant dense<0.000000e+00> : vector<12x256xf32>
    %7 = tpu.matmul %0, %6, %cst_6 {dimension_numbers = #tpu.dot_dimension_numbers<[1], [0], [0], [1], [0, 0, 1, 1], [], []>} : vector<12x50xf32>, vector<50x256xf32>, vector<12x256xf32> -> vector<12x256xf32>
    %8 = arith.addf %7, %3 : vector<12x256xf32>
    %9 = arith.addf %4, %8 : vector<12x256xf32>
    %cst_7 = arith.constant 1.000000e+00 : f32
    %10 = vector.broadcast %cst_7 : f32 to vector<12x256xf32>
    %11 = arith.cmpf ogt, %4, %10 : vector<12x256xf32>
    %12 = arith.extui %11 : vector<12x256xi1> to vector<12x256xi32>
    %13 = arith.sitofp %12 : vector<12x256xi32> to vector<12x256xf32>
    %14 = arith.subf %9, %13 : vector<12x256xf32>
    %c0_8 = arith.constant 0 : index
    %c0_9 = arith.constant 0 : index
    %c0_10 = arith.constant 0 : index
    %15 = vector.load %arg4[%c0_8, %c0_9, %c0_10] : memref<25x12x256xf32, #tpu.memory_space<vmem>>, vector<1x12x256xf32>
    %16 = vector.shape_cast %15 : vector<1x12x256xf32> to vector<12x256xf32>
    %17 = vector.shape_cast %8 : vector<12x256xf32> to vector<1x12x256xf32>
    tpu.vector_store %arg4[%c0_8, %c0_9, %c0_10], %17 {strides = array<i32>} : memref<25x12x256xf32, #tpu.memory_space<vmem>>, vector<1x12x256xf32>,
    %c0_11 = arith.constant 0 : index
    %c0_12 = arith.constant 0 : index
    %c0_13 = arith.constant 0 : index
    %18 = vector.load %arg5[%c0_11, %c0_12, %c0_13] : memref<25x12x256xf32, #tpu.memory_space<vmem>>, vector<1x12x256xf32>
    %19 = vector.shape_cast %18 : vector<1x12x256xf32> to vector<12x256xf32>
    %20 = vector.shape_cast %14 : vector<12x256xf32> to vector<1x12x256xf32>
    tpu.vector_store %arg5[%c0_11, %c0_12, %c0_13], %20 {strides = array<i32>} : memref<25x12x256xf32, #tpu.memory_space<vmem>>, vector<1x12x256xf32>,
    %c1 = arith.constant 1 : index
    %c0_14 = arith.constant 0 : index
    %c0_15 = arith.constant 0 : index
    %21 = vector.load %arg1[%c1, %c0_14, %c0_15] : memref<25x50x256xf32, #tpu.memory_space<vmem>>, vector<1x50x256xf32>
    %22 = vector.shape_cast %21 : vector<1x50x256xf32> to vector<50x256xf32>
    %cst_16 = arith.constant dense<0.000000e+00> : vector<12x256xf32>
    %23 = tpu.matmul %0, %22, %cst_16 {dimension_numbers = #tpu.dot_dimension_numbers<[1], [0], [0], [1], [0, 0, 1, 1], [], []>} : vector<12x50xf32>, vector<50x256xf32>, vector<12x256xf32> -> vector<12x256xf32>
    %24 = arith.addf %23, %3 : vector<12x256xf32>
    %25 = arith.addf %14, %24 : vector<12x256xf32>
    %cst_17 = arith.constant 1.000000e+00 : f32
    %26 = vector.broadcast %cst_17 : f32 to vector<12x256xf32>
    %27 = arith.cmpf ogt, %14, %26 : vector<12x256xf32>
    %28 = arith.extui %27 : vector<12x256xi1> to vector<12x256xi32>
    %29 = arith.sitofp %28 : vector<12x256xi32> to vector<12x256xf32>
    %30 = arith.subf %25, %29 : vector<12x256xf32>
    %c1_18 = arith.constant 1 : index
    %c0_19 = arith.constant 0 : index
    %c0_20 = arith.constant 0 : index
    %31 = vector.load %arg4[%c1_18, %c0_19, %c0_20] : memref<25x12x256xf32, #tpu.memory_space<vmem>>, vector<1x12x256xf32>
    %32 = vector.shape_cast %31 : vector<1x12x256xf32> to vector<12x256xf32>
    %33 = vector.shape_cast %24 : vector<12x256xf32> to vector<1x12x256xf32>
    tpu.vector_store %arg4[%c1_18, %c0_19, %c0_20], %33 {strides = array<i32>} : memref<25x12x256xf32, #tpu.memory_space<vmem>>, vector<1x12x256xf32>,
    %c1_21 = arith.constant 1 : index
    %c0_22 = arith.constant 0 : index
    %c0_23 = arith.constant 0 : index
    %34 = vector.load %arg5[%c1_21, %c0_22, %c0_23] : memref<25x12x256xf32, #tpu.memory_space<vmem>>, vector<1x12x256xf32>
    %35 = vector.shape_cast %34 : vector<1x12x256xf32> to vector<12x256xf32>
    %36 = vector.shape_cast %30 : vector<12x256xf32> to vector<1x12x256xf32>
    tpu.vector_store %arg5[%c1_21, %c0_22, %c0_23], %36 {strides = array<i32>} : memref<25x12x256xf32, #tpu.memory_space<vmem>>, vector<1x12x256xf32>,
    %c2 = arith.constant 2 : index
    %c0_24 = arith.constant 0 : index
    %c0_25 = arith.constant 0 : index
    %37 = vector.load %arg1[%c2, %c0_24, %c0_25] : memref<25x50x256xf32, #tpu.memory_space<vmem>>, vector<1x50x256xf32>
    %38 = vector.shape_cast %37 : vector<1x50x256xf32> to vector<50x256xf32>
    %cst_26 = arith.constant dense<0.000000e+00> : vector<12x256xf32>
    %39 = tpu.matmul %0, %38, %cst_26 {dimension_numbers = #tpu.dot_dimension_numbers<[1], [0], [0], [1], [0, 0, 1, 1], [], []>} : vector<12x50xf32>, vector<50x256xf32>, vector<12x256xf32> -> vector<12x256xf32>
    %40 = arith.addf %39, %3 : vector<12x256xf32>
    %41 = arith.addf %30, %40 : vector<12x256xf32>
    %cst_27 = arith.constant 1.000000e+00 : f32
    %42 = vector.broadcast %cst_27 : f32 to vector<12x256xf32>
    %43 = arith.cmpf ogt, %30, %42 : vector<12x256xf32>
    %44 = arith.extui %43 : vector<12x256xi1> to vector<12x256xi32>
    %45 = arith.sitofp %44 : vector<12x256xi32> to vector<12x256xf32>
    %46 = arith.subf %41, %45 : vector<12x256xf32>
    %c2_28 = arith.constant 2 : index
    %c0_29 = arith.constant 0 : index
    %c0_30 = arith.constant 0 : index
    %47 = vector.load %arg4[%c2_28, %c0_29, %c0_30] : memref<25x12x256xf32, #tpu.memory_space<vmem>>, vector<1x12x256xf32>
    %48 = vector.shape_cast %47 : vector<1x12x256xf32> to vector<12x256xf32>
    %49 = vector.shape_cast %40 : vector<12x256xf32> to vector<1x12x256xf32>
    tpu.vector_store %arg4[%c2_28, %c0_29, %c0_30], %49 {strides = array<i32>} : memref<25x12x256xf32, #tpu.memory_space<vmem>>, vector<1x12x256xf32>,
    %c2_31 = arith.constant 2 : index
    %c0_32 = arith.constant 0 : index
    %c0_33 = arith.constant 0 : index
    %50 = vector.load %arg5[%c2_31, %c0_32, %c0_33] : memref<25x12x256xf32, #tpu.memory_space<vmem>>, vector<1x12x256xf32>
    %51 = vector.shape_cast %50 : vector<1x12x256xf32> to vector<12x256xf32>
    %52 = vector.shape_cast %46 : vector<12x256xf32> to vector<1x12x256xf32>
    tpu.vector_store %arg5[%c2_31, %c0_32, %c0_33], %52 {strides = array<i32>} : memref<25x12x256xf32, #tpu.memory_space<vmem>>, vector<1x12x256xf32>,
    %c3 = arith.constant 3 : index
    %c0_34 = arith.constant 0 : index
    %c0_35 = arith.constant 0 : index
    %53 = vector.load %arg1[%c3, %c0_34, %c0_35] : memref<25x50x256xf32, #tpu.memory_space<vmem>>, vector<1x50x256xf32>
    %54 = vector.shape_cast %53 : vector<1x50x256xf32> to vector<50x256xf32>
    %cst_36 = arith.constant dense<0.000000e+00> : vector<12x256xf32>
    %55 = tpu.matmul %0, %54, %cst_36 {dimension_numbers = #tpu.dot_dimension_numbers<[1], [0], [0], [1], [0, 0, 1, 1], [], []>} : vector<12x50xf32>, vector<50x256xf32>, vector<12x256xf32> -> vector<12x256xf32>
    %56 = arith.addf %55, %3 : vector<12x256xf32>
    %57 = arith.addf %46, %56 : vector<12x256xf32>
    %cst_37 = arith.constant 1.000000e+00 : f32
    %58 = vector.broadcast %cst_37 : f32 to vector<12x256xf32>
    %59 = arith.cmpf ogt, %46, %58 : vector<12x256xf32>
    %60 = arith.extui %59 : vector<12x256xi1> to vector<12x256xi32>
    %61 = arith.sitofp %60 : vector<12x256xi32> to vector<12x256xf32>
    %62 = arith.subf %57, %61 : vector<12x256xf32>
    %c3_38 = arith.constant 3 : index
    %c0_39 = arith.constant 0 : index
    %c0_40 = arith.constant 0 : index
    %63 = vector.load %arg4[%c3_38, %c0_39, %c0_40] : memref<25x12x256xf32, #tpu.memory_space<vmem>>, vector<1x12x256xf32>
    %64 = vector.shape_cast %63 : vector<1x12x256xf32> to vector<12x256xf32>
    %65 = vector.shape_cast %56 : vector<12x256xf32> to vector<1x12x256xf32>
    tpu.vector_store %arg4[%c3_38, %c0_39, %c0_40], %65 {strides = array<i32>} : memref<25x12x256xf32, #tpu.memory_space<vmem>>, vector<1x12x256xf32>,
    %c3_41 = arith.constant 3 : index
    %c0_42 = arith.constant 0 : index
    %c0_43 = arith.constant 0 : index
    %66 = vector.load %arg5[%c3_41, %c0_42, %c0_43] : memref<25x12x256xf32, #tpu.memory_space<vmem>>, vector<1x12x256xf32>
    %67 = vector.shape_cast %66 : vector<1x12x256xf32> to vector<12x256xf32>
    %68 = vector.shape_cast %62 : vector<12x256xf32> to vector<1x12x256xf32>
    tpu.vector_store %arg5[%c3_41, %c0_42, %c0_43], %68 {strides = array<i32>} : memref<25x12x256xf32, #tpu.memory_space<vmem>>, vector<1x12x256xf32>,
    %c4 = arith.constant 4 : index
    %c0_44 = arith.constant 0 : index
    %c0_45 = arith.constant 0 : index
    %69 = vector.load %arg1[%c4, %c0_44, %c0_45] : memref<25x50x256xf32, #tpu.memory_space<vmem>>, vector<1x50x256xf32>
    %70 = vector.shape_cast %69 : vector<1x50x256xf32> to vector<50x256xf32>
    %cst_46 = arith.constant dense<0.000000e+00> : vector<12x256xf32>
    %71 = tpu.matmul %0, %70, %cst_46 {dimension_numbers = #tpu.dot_dimension_numbers<[1], [0], [0], [1], [0, 0, 1, 1], [], []>} : vector<12x50xf32>, vector<50x256xf32>, vector<12x256xf32> -> vector<12x256xf32>
    %72 = arith.addf %71, %3 : vector<12x256xf32>
    %73 = arith.addf %62, %72 : vector<12x256xf32>
    %cst_47 = arith.constant 1.000000e+00 : f32
    %74 = vector.broadcast %cst_47 : f32 to vector<12x256xf32>
    %75 = arith.cmpf ogt, %62, %74 : vector<12x256xf32>
    %76 = arith.extui %75 : vector<12x256xi1> to vector<12x256xi32>
    %77 = arith.sitofp %76 : vector<12x256xi32> to vector<12x256xf32>
    %78 = arith.subf %73, %77 : vector<12x256xf32>
    %c4_48 = arith.constant 4 : index
    %c0_49 = arith.constant 0 : index
    %c0_50 = arith.constant 0 : index
    %79 = vector.load %arg4[%c4_48, %c0_49, %c0_50] : memref<25x12x256xf32, #tpu.memory_space<vmem>>, vector<1x12x256xf32>
    %80 = vector.shape_cast %79 : vector<1x12x256xf32> to vector<12x256xf32>
    %81 = vector.shape_cast %72 : vector<12x256xf32> to vector<1x12x256xf32>
    tpu.vector_store %arg4[%c4_48, %c0_49, %c0_50], %81 {strides = array<i32>} : memref<25x12x256xf32, #tpu.memory_space<vmem>>, vector<1x12x256xf32>,
    %c4_51 = arith.constant 4 : index
    %c0_52 = arith.constant 0 : index
    %c0_53 = arith.constant 0 : index
    %82 = vector.load %arg5[%c4_51, %c0_52, %c0_53] : memref<25x12x256xf32, #tpu.memory_space<vmem>>, vector<1x12x256xf32>
    %83 = vector.shape_cast %82 : vector<1x12x256xf32> to vector<12x256xf32>
    %84 = vector.shape_cast %78 : vector<12x256xf32> to vector<1x12x256xf32>
    tpu.vector_store %arg5[%c4_51, %c0_52, %c0_53], %84 {strides = array<i32>} : memref<25x12x256xf32, #tpu.memory_space<vmem>>, vector<1x12x256xf32>,
    %c5 = arith.constant 5 : index
    %c0_54 = arith.constant 0 : index
    %c0_55 = arith.constant 0 : index
    %85 = vector.load %arg1[%c5, %c0_54, %c0_55] : memref<25x50x256xf32, #tpu.memory_space<vmem>>, vector<1x50x256xf32>
    %86 = vector.shape_cast %85 : vector<1x50x256xf32> to vector<50x256xf32>
    %cst_56 = arith.constant dense<0.000000e+00> : vector<12x256xf32>
    %87 = tpu.matmul %0, %86, %cst_56 {dimension_numbers = #tpu.dot_dimension_numbers<[1], [0], [0], [1], [0, 0, 1, 1], [], []>} : vector<12x50xf32>, vector<50x256xf32>, vector<12x256xf32> -> vector<12x256xf32>
    %88 = arith.addf %87, %3 : vector<12x256xf32>
    %89 = arith.addf %78, %88 : vector<12x256xf32>
    %cst_57 = arith.constant 1.000000e+00 : f32
    %90 = vector.broadcast %cst_57 : f32 to vector<12x256xf32>
    %91 = arith.cmpf ogt, %78, %90 : vector<12x256xf32>
    %92 = arith.extui %91 : vector<12x256xi1> to vector<12x256xi32>
    %93 = arith.sitofp %92 : vector<12x256xi32> to vector<12x256xf32>
    %94 = arith.subf %89, %93 : vector<12x256xf32>
    %c5_58 = arith.constant 5 : index
    %c0_59 = arith.constant 0 : index
    %c0_60 = arith.constant 0 : index
    %95 = vector.load %arg4[%c5_58, %c0_59, %c0_60] : memref<25x12x256xf32, #tpu.memory_space<vmem>>, vector<1x12x256xf32>
    %96 = vector.shape_cast %95 : vector<1x12x256xf32> to vector<12x256xf32>
    %97 = vector.shape_cast %88 : vector<12x256xf32> to vector<1x12x256xf32>
    tpu.vector_store %arg4[%c5_58, %c0_59, %c0_60], %97 {strides = array<i32>} : memref<25x12x256xf32, #tpu.memory_space<vmem>>, vector<1x12x256xf32>,
    %c5_61 = arith.constant 5 : index
    %c0_62 = arith.constant 0 : index
    %c0_63 = arith.constant 0 : index
    %98 = vector.load %arg5[%c5_61, %c0_62, %c0_63] : memref<25x12x256xf32, #tpu.memory_space<vmem>>, vector<1x12x256xf32>
    %99 = vector.shape_cast %98 : vector<1x12x256xf32> to vector<12x256xf32>
    %100 = vector.shape_cast %94 : vector<12x256xf32> to vector<1x12x256xf32>
    tpu.vector_store %arg5[%c5_61, %c0_62, %c0_63], %100 {strides = array<i32>} : memref<25x12x256xf32, #tpu.memory_space<vmem>>, vector<1x12x256xf32>,
    %c6 = arith.constant 6 : index
    %c0_64 = arith.constant 0 : index
    %c0_65 = arith.constant 0 : index
    %101 = vector.load %arg1[%c6, %c0_64, %c0_65] : memref<25x50x256xf32, #tpu.memory_space<vmem>>, vector<1x50x256xf32>
    %102 = vector.shape_cast %101 : vector<1x50x256xf32> to vector<50x256xf32>
    %cst_66 = arith.constant dense<0.000000e+00> : vector<12x256xf32>
    %103 = tpu.matmul %0, %102, %cst_66 {dimension_numbers = #tpu.dot_dimension_numbers<[1], [0], [0], [1], [0, 0, 1, 1], [], []>} : vector<12x50xf32>, vector<50x256xf32>, vector<12x256xf32> -> vector<12x256xf32>
    %104 = arith.addf %103, %3 : vector<12x256xf32>
    %105 = arith.addf %94, %104 : vector<12x256xf32>
    %cst_67 = arith.constant 1.000000e+00 : f32
    %106 = vector.broadcast %cst_67 : f32 to vector<12x256xf32>
    %107 = arith.cmpf ogt, %94, %106 : vector<12x256xf32>
    %108 = arith.extui %107 : vector<12x256xi1> to vector<12x256xi32>
    %109 = arith.sitofp %108 : vector<12x256xi32> to vector<12x256xf32>
    %110 = arith.subf %105, %109 : vector<12x256xf32>
    %c6_68 = arith.constant 6 : index
    %c0_69 = arith.constant 0 : index
    %c0_70 = arith.constant 0 : index
    %111 = vector.load %arg4[%c6_68, %c0_69, %c0_70] : memref<25x12x256xf32, #tpu.memory_space<vmem>>, vector<1x12x256xf32>
    %112 = vector.shape_cast %111 : vector<1x12x256xf32> to vector<12x256xf32>
    %113 = vector.shape_cast %104 : vector<12x256xf32> to vector<1x12x256xf32>
    tpu.vector_store %arg4[%c6_68, %c0_69, %c0_70], %113 {strides = array<i32>} : memref<25x12x256xf32, #tpu.memory_space<vmem>>, vector<1x12x256xf32>,
    %c6_71 = arith.constant 6 : index
    %c0_72 = arith.constant 0 : index
    %c0_73 = arith.constant 0 : index
    %114 = vector.load %arg5[%c6_71, %c0_72, %c0_73] : memref<25x12x256xf32, #tpu.memory_space<vmem>>, vector<1x12x256xf32>
    %115 = vector.shape_cast %114 : vector<1x12x256xf32> to vector<12x256xf32>
    %116 = vector.shape_cast %110 : vector<12x256xf32> to vector<1x12x256xf32>
    tpu.vector_store %arg5[%c6_71, %c0_72, %c0_73], %116 {strides = array<i32>} : memref<25x12x256xf32, #tpu.memory_space<vmem>>, vector<1x12x256xf32>,
    %c7 = arith.constant 7 : index
    %c0_74 = arith.constant 0 : index
    %c0_75 = arith.constant 0 : index
    %117 = vector.load %arg1[%c7, %c0_74, %c0_75] : memref<25x50x256xf32, #tpu.memory_space<vmem>>, vector<1x50x256xf32>
    %118 = vector.shape_cast %117 : vector<1x50x256xf32> to vector<50x256xf32>
    %cst_76 = arith.constant dense<0.000000e+00> : vector<12x256xf32>
    %119 = tpu.matmul %0, %118, %cst_76 {dimension_numbers = #tpu.dot_dimension_numbers<[1], [0], [0], [1], [0, 0, 1, 1], [], []>} : vector<12x50xf32>, vector<50x256xf32>, vector<12x256xf32> -> vector<12x256xf32>
    %120 = arith.addf %119, %3 : vector<12x256xf32>
    %121 = arith.addf %110, %120 : vector<12x256xf32>
    %cst_77 = arith.constant 1.000000e+00 : f32
    %122 = vector.broadcast %cst_77 : f32 to vector<12x256xf32>
    %123 = arith.cmpf ogt, %110, %122 : vector<12x256xf32>
    %124 = arith.extui %123 : vector<12x256xi1> to vector<12x256xi32>
    %125 = arith.sitofp %124 : vector<12x256xi32> to vector<12x256xf32>
    %126 = arith.subf %121, %125 : vector<12x256xf32>
    %c7_78 = arith.constant 7 : index
    %c0_79 = arith.constant 0 : index
    %c0_80 = arith.constant 0 : index
    %127 = vector.load %arg4[%c7_78, %c0_79, %c0_80] : memref<25x12x256xf32, #tpu.memory_space<vmem>>, vector<1x12x256xf32>
    %128 = vector.shape_cast %127 : vector<1x12x256xf32> to vector<12x256xf32>
    %129 = vector.shape_cast %120 : vector<12x256xf32> to vector<1x12x256xf32>
    tpu.vector_store %arg4[%c7_78, %c0_79, %c0_80], %129 {strides = array<i32>} : memref<25x12x256xf32, #tpu.memory_space<vmem>>, vector<1x12x256xf32>,
    %c7_81 = arith.constant 7 : index
    %c0_82 = arith.constant 0 : index
    %c0_83 = arith.constant 0 : index
    %130 = vector.load %arg5[%c7_81, %c0_82, %c0_83] : memref<25x12x256xf32, #tpu.memory_space<vmem>>, vector<1x12x256xf32>
    %131 = vector.shape_cast %130 : vector<1x12x256xf32> to vector<12x256xf32>
    %132 = vector.shape_cast %126 : vector<12x256xf32> to vector<1x12x256xf32>
    tpu.vector_store %arg5[%c7_81, %c0_82, %c0_83], %132 {strides = array<i32>} : memref<25x12x256xf32, #tpu.memory_space<vmem>>, vector<1x12x256xf32>,
    %c8 = arith.constant 8 : index
    %c0_84 = arith.constant 0 : index
    %c0_85 = arith.constant 0 : index
    %133 = vector.load %arg1[%c8, %c0_84, %c0_85] : memref<25x50x256xf32, #tpu.memory_space<vmem>>, vector<1x50x256xf32>
    %134 = vector.shape_cast %133 : vector<1x50x256xf32> to vector<50x256xf32>
    %cst_86 = arith.constant dense<0.000000e+00> : vector<12x256xf32>
    %135 = tpu.matmul %0, %134, %cst_86 {dimension_numbers = #tpu.dot_dimension_numbers<[1], [0], [0], [1], [0, 0, 1, 1], [], []>} : vector<12x50xf32>, vector<50x256xf32>, vector<12x256xf32> -> vector<12x256xf32>
    %136 = arith.addf %135, %3 : vector<12x256xf32>
    %137 = arith.addf %126, %136 : vector<12x256xf32>
    %cst_87 = arith.constant 1.000000e+00 : f32
    %138 = vector.broadcast %cst_87 : f32 to vector<12x256xf32>
    %139 = arith.cmpf ogt, %126, %138 : vector<12x256xf32>
    %140 = arith.extui %139 : vector<12x256xi1> to vector<12x256xi32>
    %141 = arith.sitofp %140 : vector<12x256xi32> to vector<12x256xf32>
    %142 = arith.subf %137, %141 : vector<12x256xf32>
    %c8_88 = arith.constant 8 : index
    %c0_89 = arith.constant 0 : index
    %c0_90 = arith.constant 0 : index
    %143 = vector.load %arg4[%c8_88, %c0_89, %c0_90] : memref<25x12x256xf32, #tpu.memory_space<vmem>>, vector<1x12x256xf32>
    %144 = vector.shape_cast %143 : vector<1x12x256xf32> to vector<12x256xf32>
    %145 = vector.shape_cast %136 : vector<12x256xf32> to vector<1x12x256xf32>
    tpu.vector_store %arg4[%c8_88, %c0_89, %c0_90], %145 {strides = array<i32>} : memref<25x12x256xf32, #tpu.memory_space<vmem>>, vector<1x12x256xf32>,
    %c8_91 = arith.constant 8 : index
    %c0_92 = arith.constant 0 : index
    %c0_93 = arith.constant 0 : index
    %146 = vector.load %arg5[%c8_91, %c0_92, %c0_93] : memref<25x12x256xf32, #tpu.memory_space<vmem>>, vector<1x12x256xf32>
    %147 = vector.shape_cast %146 : vector<1x12x256xf32> to vector<12x256xf32>
    %148 = vector.shape_cast %142 : vector<12x256xf32> to vector<1x12x256xf32>
    tpu.vector_store %arg5[%c8_91, %c0_92, %c0_93], %148 {strides = array<i32>} : memref<25x12x256xf32, #tpu.memory_space<vmem>>, vector<1x12x256xf32>,
    %c9 = arith.constant 9 : index
    %c0_94 = arith.constant 0 : index
    %c0_95 = arith.constant 0 : index
    %149 = vector.load %arg1[%c9, %c0_94, %c0_95] : memref<25x50x256xf32, #tpu.memory_space<vmem>>, vector<1x50x256xf32>
    %150 = vector.shape_cast %149 : vector<1x50x256xf32> to vector<50x256xf32>
    %cst_96 = arith.constant dense<0.000000e+00> : vector<12x256xf32>
    %151 = tpu.matmul %0, %150, %cst_96 {dimension_numbers = #tpu.dot_dimension_numbers<[1], [0], [0], [1], [0, 0, 1, 1], [], []>} : vector<12x50xf32>, vector<50x256xf32>, vector<12x256xf32> -> vector<12x256xf32>
    %152 = arith.addf %151, %3 : vector<12x256xf32>
    %153 = arith.addf %142, %152 : vector<12x256xf32>
    %cst_97 = arith.constant 1.000000e+00 : f32
    %154 = vector.broadcast %cst_97 : f32 to vector<12x256xf32>
    %155 = arith.cmpf ogt, %142, %154 : vector<12x256xf32>
    %156 = arith.extui %155 : vector<12x256xi1> to vector<12x256xi32>
    %157 = arith.sitofp %156 : vector<12x256xi32> to vector<12x256xf32>
    %158 = arith.subf %153, %157 : vector<12x256xf32>
    %c9_98 = arith.constant 9 : index
    %c0_99 = arith.constant 0 : index
    %c0_100 = arith.constant 0 : index
    %159 = vector.load %arg4[%c9_98, %c0_99, %c0_100] : memref<25x12x256xf32, #tpu.memory_space<vmem>>, vector<1x12x256xf32>
    %160 = vector.shape_cast %159 : vector<1x12x256xf32> to vector<12x256xf32>
    %161 = vector.shape_cast %152 : vector<12x256xf32> to vector<1x12x256xf32>
    tpu.vector_store %arg4[%c9_98, %c0_99, %c0_100], %161 {strides = array<i32>} : memref<25x12x256xf32, #tpu.memory_space<vmem>>, vector<1x12x256xf32>,
    %c9_101 = arith.constant 9 : index
    %c0_102 = arith.constant 0 : index
    %c0_103 = arith.constant 0 : index
    %162 = vector.load %arg5[%c9_101, %c0_102, %c0_103] : memref<25x12x256xf32, #tpu.memory_space<vmem>>, vector<1x12x256xf32>
    %163 = vector.shape_cast %162 : vector<1x12x256xf32> to vector<12x256xf32>
    %164 = vector.shape_cast %158 : vector<12x256xf32> to vector<1x12x256xf32>
    tpu.vector_store %arg5[%c9_101, %c0_102, %c0_103], %164 {strides = array<i32>} : memref<25x12x256xf32, #tpu.memory_space<vmem>>, vector<1x12x256xf32>,
    %c10 = arith.constant 10 : index
    %c0_104 = arith.constant 0 : index
    %c0_105 = arith.constant 0 : index
    %165 = vector.load %arg1[%c10, %c0_104, %c0_105] : memref<25x50x256xf32, #tpu.memory_space<vmem>>, vector<1x50x256xf32>
    %166 = vector.shape_cast %165 : vector<1x50x256xf32> to vector<50x256xf32>
    %cst_106 = arith.constant dense<0.000000e+00> : vector<12x256xf32>
    %167 = tpu.matmul %0, %166, %cst_106 {dimension_numbers = #tpu.dot_dimension_numbers<[1], [0], [0], [1], [0, 0, 1, 1], [], []>} : vector<12x50xf32>, vector<50x256xf32>, vector<12x256xf32> -> vector<12x256xf32>
    %168 = arith.addf %167, %3 : vector<12x256xf32>
    %169 = arith.addf %158, %168 : vector<12x256xf32>
    %cst_107 = arith.constant 1.000000e+00 : f32
    %170 = vector.broadcast %cst_107 : f32 to vector<12x256xf32>
    %171 = arith.cmpf ogt, %158, %170 : vector<12x256xf32>
    %172 = arith.extui %171 : vector<12x256xi1> to vector<12x256xi32>
    %173 = arith.sitofp %172 : vector<12x256xi32> to vector<12x256xf32>
    %174 = arith.subf %169, %173 : vector<12x256xf32>
    %c10_108 = arith.constant 10 : index
    %c0_109 = arith.constant 0 : index
    %c0_110 = arith.constant 0 : index
    %175 = vector.load %arg4[%c10_108, %c0_109, %c0_110] : memref<25x12x256xf32, #tpu.memory_space<vmem>>, vector<1x12x256xf32>
    %176 = vector.shape_cast %175 : vector<1x12x256xf32> to vector<12x256xf32>
    %177 = vector.shape_cast %168 : vector<12x256xf32> to vector<1x12x256xf32>
    tpu.vector_store %arg4[%c10_108, %c0_109, %c0_110], %177 {strides = array<i32>} : memref<25x12x256xf32, #tpu.memory_space<vmem>>, vector<1x12x256xf32>,
    %c10_111 = arith.constant 10 : index
    %c0_112 = arith.constant 0 : index
    %c0_113 = arith.constant 0 : index
    %178 = vector.load %arg5[%c10_111, %c0_112, %c0_113] : memref<25x12x256xf32, #tpu.memory_space<vmem>>, vector<1x12x256xf32>
    %179 = vector.shape_cast %178 : vector<1x12x256xf32> to vector<12x256xf32>
    %180 = vector.shape_cast %174 : vector<12x256xf32> to vector<1x12x256xf32>
    tpu.vector_store %arg5[%c10_111, %c0_112, %c0_113], %180 {strides = array<i32>} : memref<25x12x256xf32, #tpu.memory_space<vmem>>, vector<1x12x256xf32>,
    %c11 = arith.constant 11 : index
    %c0_114 = arith.constant 0 : index
    %c0_115 = arith.constant 0 : index
    %181 = vector.load %arg1[%c11, %c0_114, %c0_115] : memref<25x50x256xf32, #tpu.memory_space<vmem>>, vector<1x50x256xf32>
    %182 = vector.shape_cast %181 : vector<1x50x256xf32> to vector<50x256xf32>
    %cst_116 = arith.constant dense<0.000000e+00> : vector<12x256xf32>
    %183 = tpu.matmul %0, %182, %cst_116 {dimension_numbers = #tpu.dot_dimension_numbers<[1], [0], [0], [1], [0, 0, 1, 1], [], []>} : vector<12x50xf32>, vector<50x256xf32>, vector<12x256xf32> -> vector<12x256xf32>
    %184 = arith.addf %183, %3 : vector<12x256xf32>
    %185 = arith.addf %174, %184 : vector<12x256xf32>
    %cst_117 = arith.constant 1.000000e+00 : f32
    %186 = vector.broadcast %cst_117 : f32 to vector<12x256xf32>
    %187 = arith.cmpf ogt, %174, %186 : vector<12x256xf32>
    %188 = arith.extui %187 : vector<12x256xi1> to vector<12x256xi32>
    %189 = arith.sitofp %188 : vector<12x256xi32> to vector<12x256xf32>
    %190 = arith.subf %185, %189 : vector<12x256xf32>
    %c11_118 = arith.constant 11 : index
    %c0_119 = arith.constant 0 : index
    %c0_120 = arith.constant 0 : index
    %191 = vector.load %arg4[%c11_118, %c0_119, %c0_120] : memref<25x12x256xf32, #tpu.memory_space<vmem>>, vector<1x12x256xf32>
    %192 = vector.shape_cast %191 : vector<1x12x256xf32> to vector<12x256xf32>
    %193 = vector.shape_cast %184 : vector<12x256xf32> to vector<1x12x256xf32>
    tpu.vector_store %arg4[%c11_118, %c0_119, %c0_120], %193 {strides = array<i32>} : memref<25x12x256xf32, #tpu.memory_space<vmem>>, vector<1x12x256xf32>,
    %c11_121 = arith.constant 11 : index
    %c0_122 = arith.constant 0 : index
    %c0_123 = arith.constant 0 : index
    %194 = vector.load %arg5[%c11_121, %c0_122, %c0_123] : memref<25x12x256xf32, #tpu.memory_space<vmem>>, vector<1x12x256xf32>
    %195 = vector.shape_cast %194 : vector<1x12x256xf32> to vector<12x256xf32>
    %196 = vector.shape_cast %190 : vector<12x256xf32> to vector<1x12x256xf32>
    tpu.vector_store %arg5[%c11_121, %c0_122, %c0_123], %196 {strides = array<i32>} : memref<25x12x256xf32, #tpu.memory_space<vmem>>, vector<1x12x256xf32>,
    %c12 = arith.constant 12 : index
    %c0_124 = arith.constant 0 : index
    %c0_125 = arith.constant 0 : index
    %197 = vector.load %arg1[%c12, %c0_124, %c0_125] : memref<25x50x256xf32, #tpu.memory_space<vmem>>, vector<1x50x256xf32>
    %198 = vector.shape_cast %197 : vector<1x50x256xf32> to vector<50x256xf32>
    %cst_126 = arith.constant dense<0.000000e+00> : vector<12x256xf32>
    %199 = tpu.matmul %0, %198, %cst_126 {dimension_numbers = #tpu.dot_dimension_numbers<[1], [0], [0], [1], [0, 0, 1, 1], [], []>} : vector<12x50xf32>, vector<50x256xf32>, vector<12x256xf32> -> vector<12x256xf32>
    %200 = arith.addf %199, %3 : vector<12x256xf32>
    %201 = arith.addf %190, %200 : vector<12x256xf32>
    %cst_127 = arith.constant 1.000000e+00 : f32
    %202 = vector.broadcast %cst_127 : f32 to vector<12x256xf32>
    %203 = arith.cmpf ogt, %190, %202 : vector<12x256xf32>
    %204 = arith.extui %203 : vector<12x256xi1> to vector<12x256xi32>
    %205 = arith.sitofp %204 : vector<12x256xi32> to vector<12x256xf32>
    %206 = arith.subf %201, %205 : vector<12x256xf32>
    %c12_128 = arith.constant 12 : index
    %c0_129 = arith.constant 0 : index
    %c0_130 = arith.constant 0 : index
    %207 = vector.load %arg4[%c12_128, %c0_129, %c0_130] : memref<25x12x256xf32, #tpu.memory_space<vmem>>, vector<1x12x256xf32>
    %208 = vector.shape_cast %207 : vector<1x12x256xf32> to vector<12x256xf32>
    %209 = vector.shape_cast %200 : vector<12x256xf32> to vector<1x12x256xf32>
    tpu.vector_store %arg4[%c12_128, %c0_129, %c0_130], %209 {strides = array<i32>} : memref<25x12x256xf32, #tpu.memory_space<vmem>>, vector<1x12x256xf32>,
    %c12_131 = arith.constant 12 : index
    %c0_132 = arith.constant 0 : index
    %c0_133 = arith.constant 0 : index
    %210 = vector.load %arg5[%c12_131, %c0_132, %c0_133] : memref<25x12x256xf32, #tpu.memory_space<vmem>>, vector<1x12x256xf32>
    %211 = vector.shape_cast %210 : vector<1x12x256xf32> to vector<12x256xf32>
    %212 = vector.shape_cast %206 : vector<12x256xf32> to vector<1x12x256xf32>
    tpu.vector_store %arg5[%c12_131, %c0_132, %c0_133], %212 {strides = array<i32>} : memref<25x12x256xf32, #tpu.memory_space<vmem>>, vector<1x12x256xf32>,
    %c13 = arith.constant 13 : index
    %c0_134 = arith.constant 0 : index
    %c0_135 = arith.constant 0 : index
    %213 = vector.load %arg1[%c13, %c0_134, %c0_135] : memref<25x50x256xf32, #tpu.memory_space<vmem>>, vector<1x50x256xf32>
    %214 = vector.shape_cast %213 : vector<1x50x256xf32> to vector<50x256xf32>
    %cst_136 = arith.constant dense<0.000000e+00> : vector<12x256xf32>
    %215 = tpu.matmul %0, %214, %cst_136 {dimension_numbers = #tpu.dot_dimension_numbers<[1], [0], [0], [1], [0, 0, 1, 1], [], []>} : vector<12x50xf32>, vector<50x256xf32>, vector<12x256xf32> -> vector<12x256xf32>
    %216 = arith.addf %215, %3 : vector<12x256xf32>
    %217 = arith.addf %206, %216 : vector<12x256xf32>
    %cst_137 = arith.constant 1.000000e+00 : f32
    %218 = vector.broadcast %cst_137 : f32 to vector<12x256xf32>
    %219 = arith.cmpf ogt, %206, %218 : vector<12x256xf32>
    %220 = arith.extui %219 : vector<12x256xi1> to vector<12x256xi32>
    %221 = arith.sitofp %220 : vector<12x256xi32> to vector<12x256xf32>
    %222 = arith.subf %217, %221 : vector<12x256xf32>
    %c13_138 = arith.constant 13 : index
    %c0_139 = arith.constant 0 : index
    %c0_140 = arith.constant 0 : index
    %223 = vector.load %arg4[%c13_138, %c0_139, %c0_140] : memref<25x12x256xf32, #tpu.memory_space<vmem>>, vector<1x12x256xf32>
    %224 = vector.shape_cast %223 : vector<1x12x256xf32> to vector<12x256xf32>
    %225 = vector.shape_cast %216 : vector<12x256xf32> to vector<1x12x256xf32>
    tpu.vector_store %arg4[%c13_138, %c0_139, %c0_140], %225 {strides = array<i32>} : memref<25x12x256xf32, #tpu.memory_space<vmem>>, vector<1x12x256xf32>,
    %c13_141 = arith.constant 13 : index
    %c0_142 = arith.constant 0 : index
    %c0_143 = arith.constant 0 : index
    %226 = vector.load %arg5[%c13_141, %c0_142, %c0_143] : memref<25x12x256xf32, #tpu.memory_space<vmem>>, vector<1x12x256xf32>
    %227 = vector.shape_cast %226 : vector<1x12x256xf32> to vector<12x256xf32>
    %228 = vector.shape_cast %222 : vector<12x256xf32> to vector<1x12x256xf32>
    tpu.vector_store %arg5[%c13_141, %c0_142, %c0_143], %228 {strides = array<i32>} : memref<25x12x256xf32, #tpu.memory_space<vmem>>, vector<1x12x256xf32>,
    %c14 = arith.constant 14 : index
    %c0_144 = arith.constant 0 : index
    %c0_145 = arith.constant 0 : index
    %229 = vector.load %arg1[%c14, %c0_144, %c0_145] : memref<25x50x256xf32, #tpu.memory_space<vmem>>, vector<1x50x256xf32>
    %230 = vector.shape_cast %229 : vector<1x50x256xf32> to vector<50x256xf32>
    %cst_146 = arith.constant dense<0.000000e+00> : vector<12x256xf32>
    %231 = tpu.matmul %0, %230, %cst_146 {dimension_numbers = #tpu.dot_dimension_numbers<[1], [0], [0], [1], [0, 0, 1, 1], [], []>} : vector<12x50xf32>, vector<50x256xf32>, vector<12x256xf32> -> vector<12x256xf32>
    %232 = arith.addf %231, %3 : vector<12x256xf32>
    %233 = arith.addf %222, %232 : vector<12x256xf32>
    %cst_147 = arith.constant 1.000000e+00 : f32
    %234 = vector.broadcast %cst_147 : f32 to vector<12x256xf32>
    %235 = arith.cmpf ogt, %222, %234 : vector<12x256xf32>
    %236 = arith.extui %235 : vector<12x256xi1> to vector<12x256xi32>
    %237 = arith.sitofp %236 : vector<12x256xi32> to vector<12x256xf32>
    %238 = arith.subf %233, %237 : vector<12x256xf32>
    %c14_148 = arith.constant 14 : index
    %c0_149 = arith.constant 0 : index
    %c0_150 = arith.constant 0 : index
    %239 = vector.load %arg4[%c14_148, %c0_149, %c0_150] : memref<25x12x256xf32, #tpu.memory_space<vmem>>, vector<1x12x256xf32>
    %240 = vector.shape_cast %239 : vector<1x12x256xf32> to vector<12x256xf32>
    %241 = vector.shape_cast %232 : vector<12x256xf32> to vector<1x12x256xf32>
    tpu.vector_store %arg4[%c14_148, %c0_149, %c0_150], %241 {strides = array<i32>} : memref<25x12x256xf32, #tpu.memory_space<vmem>>, vector<1x12x256xf32>,
    %c14_151 = arith.constant 14 : index
    %c0_152 = arith.constant 0 : index
    %c0_153 = arith.constant 0 : index
    %242 = vector.load %arg5[%c14_151, %c0_152, %c0_153] : memref<25x12x256xf32, #tpu.memory_space<vmem>>, vector<1x12x256xf32>
    %243 = vector.shape_cast %242 : vector<1x12x256xf32> to vector<12x256xf32>
    %244 = vector.shape_cast %238 : vector<12x256xf32> to vector<1x12x256xf32>
    tpu.vector_store %arg5[%c14_151, %c0_152, %c0_153], %244 {strides = array<i32>} : memref<25x12x256xf32, #tpu.memory_space<vmem>>, vector<1x12x256xf32>,
    %c15 = arith.constant 15 : index
    %c0_154 = arith.constant 0 : index
    %c0_155 = arith.constant 0 : index
    %245 = vector.load %arg1[%c15, %c0_154, %c0_155] : memref<25x50x256xf32, #tpu.memory_space<vmem>>, vector<1x50x256xf32>
    %246 = vector.shape_cast %245 : vector<1x50x256xf32> to vector<50x256xf32>
    %cst_156 = arith.constant dense<0.000000e+00> : vector<12x256xf32>
    %247 = tpu.matmul %0, %246, %cst_156 {dimension_numbers = #tpu.dot_dimension_numbers<[1], [0], [0], [1], [0, 0, 1, 1], [], []>} : vector<12x50xf32>, vector<50x256xf32>, vector<12x256xf32> -> vector<12x256xf32>
    %248 = arith.addf %247, %3 : vector<12x256xf32>
    %249 = arith.addf %238, %248 : vector<12x256xf32>
    %cst_157 = arith.constant 1.000000e+00 : f32
    %250 = vector.broadcast %cst_157 : f32 to vector<12x256xf32>
    %251 = arith.cmpf ogt, %238, %250 : vector<12x256xf32>
    %252 = arith.extui %251 : vector<12x256xi1> to vector<12x256xi32>
    %253 = arith.sitofp %252 : vector<12x256xi32> to vector<12x256xf32>
    %254 = arith.subf %249, %253 : vector<12x256xf32>
    %c15_158 = arith.constant 15 : index
    %c0_159 = arith.constant 0 : index
    %c0_160 = arith.constant 0 : index
    %255 = vector.load %arg4[%c15_158, %c0_159, %c0_160] : memref<25x12x256xf32, #tpu.memory_space<vmem>>, vector<1x12x256xf32>
    %256 = vector.shape_cast %255 : vector<1x12x256xf32> to vector<12x256xf32>
    %257 = vector.shape_cast %248 : vector<12x256xf32> to vector<1x12x256xf32>
    tpu.vector_store %arg4[%c15_158, %c0_159, %c0_160], %257 {strides = array<i32>} : memref<25x12x256xf32, #tpu.memory_space<vmem>>, vector<1x12x256xf32>,
    %c15_161 = arith.constant 15 : index
    %c0_162 = arith.constant 0 : index
    %c0_163 = arith.constant 0 : index
    %258 = vector.load %arg5[%c15_161, %c0_162, %c0_163] : memref<25x12x256xf32, #tpu.memory_space<vmem>>, vector<1x12x256xf32>
    %259 = vector.shape_cast %258 : vector<1x12x256xf32> to vector<12x256xf32>
    %260 = vector.shape_cast %254 : vector<12x256xf32> to vector<1x12x256xf32>
    tpu.vector_store %arg5[%c15_161, %c0_162, %c0_163], %260 {strides = array<i32>} : memref<25x12x256xf32, #tpu.memory_space<vmem>>, vector<1x12x256xf32>,
    %c16 = arith.constant 16 : index
    %c0_164 = arith.constant 0 : index
    %c0_165 = arith.constant 0 : index
    %261 = vector.load %arg1[%c16, %c0_164, %c0_165] : memref<25x50x256xf32, #tpu.memory_space<vmem>>, vector<1x50x256xf32>
    %262 = vector.shape_cast %261 : vector<1x50x256xf32> to vector<50x256xf32>
    %cst_166 = arith.constant dense<0.000000e+00> : vector<12x256xf32>
    %263 = tpu.matmul %0, %262, %cst_166 {dimension_numbers = #tpu.dot_dimension_numbers<[1], [0], [0], [1], [0, 0, 1, 1], [], []>} : vector<12x50xf32>, vector<50x256xf32>, vector<12x256xf32> -> vector<12x256xf32>
    %264 = arith.addf %263, %3 : vector<12x256xf32>
    %265 = arith.addf %254, %264 : vector<12x256xf32>
    %cst_167 = arith.constant 1.000000e+00 : f32
    %266 = vector.broadcast %cst_167 : f32 to vector<12x256xf32>
    %267 = arith.cmpf ogt, %254, %266 : vector<12x256xf32>
    %268 = arith.extui %267 : vector<12x256xi1> to vector<12x256xi32>
    %269 = arith.sitofp %268 : vector<12x256xi32> to vector<12x256xf32>
    %270 = arith.subf %265, %269 : vector<12x256xf32>
    %c16_168 = arith.constant 16 : index
    %c0_169 = arith.constant 0 : index
    %c0_170 = arith.constant 0 : index
    %271 = vector.load %arg4[%c16_168, %c0_169, %c0_170] : memref<25x12x256xf32, #tpu.memory_space<vmem>>, vector<1x12x256xf32>
    %272 = vector.shape_cast %271 : vector<1x12x256xf32> to vector<12x256xf32>
    %273 = vector.shape_cast %264 : vector<12x256xf32> to vector<1x12x256xf32>
    tpu.vector_store %arg4[%c16_168, %c0_169, %c0_170], %273 {strides = array<i32>} : memref<25x12x256xf32, #tpu.memory_space<vmem>>, vector<1x12x256xf32>,
    %c16_171 = arith.constant 16 : index
    %c0_172 = arith.constant 0 : index
    %c0_173 = arith.constant 0 : index
    %274 = vector.load %arg5[%c16_171, %c0_172, %c0_173] : memref<25x12x256xf32, #tpu.memory_space<vmem>>, vector<1x12x256xf32>
    %275 = vector.shape_cast %274 : vector<1x12x256xf32> to vector<12x256xf32>
    %276 = vector.shape_cast %270 : vector<12x256xf32> to vector<1x12x256xf32>
    tpu.vector_store %arg5[%c16_171, %c0_172, %c0_173], %276 {strides = array<i32>} : memref<25x12x256xf32, #tpu.memory_space<vmem>>, vector<1x12x256xf32>,
    %c17 = arith.constant 17 : index
    %c0_174 = arith.constant 0 : index
    %c0_175 = arith.constant 0 : index
    %277 = vector.load %arg1[%c17, %c0_174, %c0_175] : memref<25x50x256xf32, #tpu.memory_space<vmem>>, vector<1x50x256xf32>
    %278 = vector.shape_cast %277 : vector<1x50x256xf32> to vector<50x256xf32>
    %cst_176 = arith.constant dense<0.000000e+00> : vector<12x256xf32>
    %279 = tpu.matmul %0, %278, %cst_176 {dimension_numbers = #tpu.dot_dimension_numbers<[1], [0], [0], [1], [0, 0, 1, 1], [], []>} : vector<12x50xf32>, vector<50x256xf32>, vector<12x256xf32> -> vector<12x256xf32>
    %280 = arith.addf %279, %3 : vector<12x256xf32>
    %281 = arith.addf %270, %280 : vector<12x256xf32>
    %cst_177 = arith.constant 1.000000e+00 : f32
    %282 = vector.broadcast %cst_177 : f32 to vector<12x256xf32>
    %283 = arith.cmpf ogt, %270, %282 : vector<12x256xf32>
    %284 = arith.extui %283 : vector<12x256xi1> to vector<12x256xi32>
    %285 = arith.sitofp %284 : vector<12x256xi32> to vector<12x256xf32>
    %286 = arith.subf %281, %285 : vector<12x256xf32>
    %c17_178 = arith.constant 17 : index
    %c0_179 = arith.constant 0 : index
    %c0_180 = arith.constant 0 : index
    %287 = vector.load %arg4[%c17_178, %c0_179, %c0_180] : memref<25x12x256xf32, #tpu.memory_space<vmem>>, vector<1x12x256xf32>
    %288 = vector.shape_cast %287 : vector<1x12x256xf32> to vector<12x256xf32>
    %289 = vector.shape_cast %280 : vector<12x256xf32> to vector<1x12x256xf32>
    tpu.vector_store %arg4[%c17_178, %c0_179, %c0_180], %289 {strides = array<i32>} : memref<25x12x256xf32, #tpu.memory_space<vmem>>, vector<1x12x256xf32>,
    %c17_181 = arith.constant 17 : index
    %c0_182 = arith.constant 0 : index
    %c0_183 = arith.constant 0 : index
    %290 = vector.load %arg5[%c17_181, %c0_182, %c0_183] : memref<25x12x256xf32, #tpu.memory_space<vmem>>, vector<1x12x256xf32>
    %291 = vector.shape_cast %290 : vector<1x12x256xf32> to vector<12x256xf32>
    %292 = vector.shape_cast %286 : vector<12x256xf32> to vector<1x12x256xf32>
    tpu.vector_store %arg5[%c17_181, %c0_182, %c0_183], %292 {strides = array<i32>} : memref<25x12x256xf32, #tpu.memory_space<vmem>>, vector<1x12x256xf32>,
    %c18 = arith.constant 18 : index
    %c0_184 = arith.constant 0 : index
    %c0_185 = arith.constant 0 : index
    %293 = vector.load %arg1[%c18, %c0_184, %c0_185] : memref<25x50x256xf32, #tpu.memory_space<vmem>>, vector<1x50x256xf32>
    %294 = vector.shape_cast %293 : vector<1x50x256xf32> to vector<50x256xf32>
    %cst_186 = arith.constant dense<0.000000e+00> : vector<12x256xf32>
    %295 = tpu.matmul %0, %294, %cst_186 {dimension_numbers = #tpu.dot_dimension_numbers<[1], [0], [0], [1], [0, 0, 1, 1], [], []>} : vector<12x50xf32>, vector<50x256xf32>, vector<12x256xf32> -> vector<12x256xf32>
    %296 = arith.addf %295, %3 : vector<12x256xf32>
    %297 = arith.addf %286, %296 : vector<12x256xf32>
    %cst_187 = arith.constant 1.000000e+00 : f32
    %298 = vector.broadcast %cst_187 : f32 to vector<12x256xf32>
    %299 = arith.cmpf ogt, %286, %298 : vector<12x256xf32>
    %300 = arith.extui %299 : vector<12x256xi1> to vector<12x256xi32>
    %301 = arith.sitofp %300 : vector<12x256xi32> to vector<12x256xf32>
    %302 = arith.subf %297, %301 : vector<12x256xf32>
    %c18_188 = arith.constant 18 : index
    %c0_189 = arith.constant 0 : index
    %c0_190 = arith.constant 0 : index
    %303 = vector.load %arg4[%c18_188, %c0_189, %c0_190] : memref<25x12x256xf32, #tpu.memory_space<vmem>>, vector<1x12x256xf32>
    %304 = vector.shape_cast %303 : vector<1x12x256xf32> to vector<12x256xf32>
    %305 = vector.shape_cast %296 : vector<12x256xf32> to vector<1x12x256xf32>
    tpu.vector_store %arg4[%c18_188, %c0_189, %c0_190], %305 {strides = array<i32>} : memref<25x12x256xf32, #tpu.memory_space<vmem>>, vector<1x12x256xf32>,
    %c18_191 = arith.constant 18 : index
    %c0_192 = arith.constant 0 : index
    %c0_193 = arith.constant 0 : index
    %306 = vector.load %arg5[%c18_191, %c0_192, %c0_193] : memref<25x12x256xf32, #tpu.memory_space<vmem>>, vector<1x12x256xf32>
    %307 = vector.shape_cast %306 : vector<1x12x256xf32> to vector<12x256xf32>
    %308 = vector.shape_cast %302 : vector<12x256xf32> to vector<1x12x256xf32>
    tpu.vector_store %arg5[%c18_191, %c0_192, %c0_193], %308 {strides = array<i32>} : memref<25x12x256xf32, #tpu.memory_space<vmem>>, vector<1x12x256xf32>,
    %c19 = arith.constant 19 : index
    %c0_194 = arith.constant 0 : index
    %c0_195 = arith.constant 0 : index
    %309 = vector.load %arg1[%c19, %c0_194, %c0_195] : memref<25x50x256xf32, #tpu.memory_space<vmem>>, vector<1x50x256xf32>
    %310 = vector.shape_cast %309 : vector<1x50x256xf32> to vector<50x256xf32>
    %cst_196 = arith.constant dense<0.000000e+00> : vector<12x256xf32>
    %311 = tpu.matmul %0, %310, %cst_196 {dimension_numbers = #tpu.dot_dimension_numbers<[1], [0], [0], [1], [0, 0, 1, 1], [], []>} : vector<12x50xf32>, vector<50x256xf32>, vector<12x256xf32> -> vector<12x256xf32>
    %312 = arith.addf %311, %3 : vector<12x256xf32>
    %313 = arith.addf %302, %312 : vector<12x256xf32>
    %cst_197 = arith.constant 1.000000e+00 : f32
    %314 = vector.broadcast %cst_197 : f32 to vector<12x256xf32>
    %315 = arith.cmpf ogt, %302, %314 : vector<12x256xf32>
    %316 = arith.extui %315 : vector<12x256xi1> to vector<12x256xi32>
    %317 = arith.sitofp %316 : vector<12x256xi32> to vector<12x256xf32>
    %318 = arith.subf %313, %317 : vector<12x256xf32>
    %c19_198 = arith.constant 19 : index
    %c0_199 = arith.constant 0 : index
    %c0_200 = arith.constant 0 : index
    %319 = vector.load %arg4[%c19_198, %c0_199, %c0_200] : memref<25x12x256xf32, #tpu.memory_space<vmem>>, vector<1x12x256xf32>
    %320 = vector.shape_cast %319 : vector<1x12x256xf32> to vector<12x256xf32>
    %321 = vector.shape_cast %312 : vector<12x256xf32> to vector<1x12x256xf32>
    tpu.vector_store %arg4[%c19_198, %c0_199, %c0_200], %321 {strides = array<i32>} : memref<25x12x256xf32, #tpu.memory_space<vmem>>, vector<1x12x256xf32>,
    %c19_201 = arith.constant 19 : index
    %c0_202 = arith.constant 0 : index
    %c0_203 = arith.constant 0 : index
    %322 = vector.load %arg5[%c19_201, %c0_202, %c0_203] : memref<25x12x256xf32, #tpu.memory_space<vmem>>, vector<1x12x256xf32>
    %323 = vector.shape_cast %322 : vector<1x12x256xf32> to vector<12x256xf32>
    %324 = vector.shape_cast %318 : vector<12x256xf32> to vector<1x12x256xf32>
    tpu.vector_store %arg5[%c19_201, %c0_202, %c0_203], %324 {strides = array<i32>} : memref<25x12x256xf32, #tpu.memory_space<vmem>>, vector<1x12x256xf32>,
    %c20 = arith.constant 20 : index
    %c0_204 = arith.constant 0 : index
    %c0_205 = arith.constant 0 : index
    %325 = vector.load %arg1[%c20, %c0_204, %c0_205] : memref<25x50x256xf32, #tpu.memory_space<vmem>>, vector<1x50x256xf32>
    %326 = vector.shape_cast %325 : vector<1x50x256xf32> to vector<50x256xf32>
    %cst_206 = arith.constant dense<0.000000e+00> : vector<12x256xf32>
    %327 = tpu.matmul %0, %326, %cst_206 {dimension_numbers = #tpu.dot_dimension_numbers<[1], [0], [0], [1], [0, 0, 1, 1], [], []>} : vector<12x50xf32>, vector<50x256xf32>, vector<12x256xf32> -> vector<12x256xf32>
    %328 = arith.addf %327, %3 : vector<12x256xf32>
    %329 = arith.addf %318, %328 : vector<12x256xf32>
    %cst_207 = arith.constant 1.000000e+00 : f32
    %330 = vector.broadcast %cst_207 : f32 to vector<12x256xf32>
    %331 = arith.cmpf ogt, %318, %330 : vector<12x256xf32>
    %332 = arith.extui %331 : vector<12x256xi1> to vector<12x256xi32>
    %333 = arith.sitofp %332 : vector<12x256xi32> to vector<12x256xf32>
    %334 = arith.subf %329, %333 : vector<12x256xf32>
    %c20_208 = arith.constant 20 : index
    %c0_209 = arith.constant 0 : index
    %c0_210 = arith.constant 0 : index
    %335 = vector.load %arg4[%c20_208, %c0_209, %c0_210] : memref<25x12x256xf32, #tpu.memory_space<vmem>>, vector<1x12x256xf32>
    %336 = vector.shape_cast %335 : vector<1x12x256xf32> to vector<12x256xf32>
    %337 = vector.shape_cast %328 : vector<12x256xf32> to vector<1x12x256xf32>
    tpu.vector_store %arg4[%c20_208, %c0_209, %c0_210], %337 {strides = array<i32>} : memref<25x12x256xf32, #tpu.memory_space<vmem>>, vector<1x12x256xf32>,
    %c20_211 = arith.constant 20 : index
    %c0_212 = arith.constant 0 : index
    %c0_213 = arith.constant 0 : index
    %338 = vector.load %arg5[%c20_211, %c0_212, %c0_213] : memref<25x12x256xf32, #tpu.memory_space<vmem>>, vector<1x12x256xf32>
    %339 = vector.shape_cast %338 : vector<1x12x256xf32> to vector<12x256xf32>
    %340 = vector.shape_cast %334 : vector<12x256xf32> to vector<1x12x256xf32>
    tpu.vector_store %arg5[%c20_211, %c0_212, %c0_213], %340 {strides = array<i32>} : memref<25x12x256xf32, #tpu.memory_space<vmem>>, vector<1x12x256xf32>,
    %c21 = arith.constant 21 : index
    %c0_214 = arith.constant 0 : index
    %c0_215 = arith.constant 0 : index
    %341 = vector.load %arg1[%c21, %c0_214, %c0_215] : memref<25x50x256xf32, #tpu.memory_space<vmem>>, vector<1x50x256xf32>
    %342 = vector.shape_cast %341 : vector<1x50x256xf32> to vector<50x256xf32>
    %cst_216 = arith.constant dense<0.000000e+00> : vector<12x256xf32>
    %343 = tpu.matmul %0, %342, %cst_216 {dimension_numbers = #tpu.dot_dimension_numbers<[1], [0], [0], [1], [0, 0, 1, 1], [], []>} : vector<12x50xf32>, vector<50x256xf32>, vector<12x256xf32> -> vector<12x256xf32>
    %344 = arith.addf %343, %3 : vector<12x256xf32>
    %345 = arith.addf %334, %344 : vector<12x256xf32>
    %cst_217 = arith.constant 1.000000e+00 : f32
    %346 = vector.broadcast %cst_217 : f32 to vector<12x256xf32>
    %347 = arith.cmpf ogt, %334, %346 : vector<12x256xf32>
    %348 = arith.extui %347 : vector<12x256xi1> to vector<12x256xi32>
    %349 = arith.sitofp %348 : vector<12x256xi32> to vector<12x256xf32>
    %350 = arith.subf %345, %349 : vector<12x256xf32>
    %c21_218 = arith.constant 21 : index
    %c0_219 = arith.constant 0 : index
    %c0_220 = arith.constant 0 : index
    %351 = vector.load %arg4[%c21_218, %c0_219, %c0_220] : memref<25x12x256xf32, #tpu.memory_space<vmem>>, vector<1x12x256xf32>
    %352 = vector.shape_cast %351 : vector<1x12x256xf32> to vector<12x256xf32>
    %353 = vector.shape_cast %344 : vector<12x256xf32> to vector<1x12x256xf32>
    tpu.vector_store %arg4[%c21_218, %c0_219, %c0_220], %353 {strides = array<i32>} : memref<25x12x256xf32, #tpu.memory_space<vmem>>, vector<1x12x256xf32>,
    %c21_221 = arith.constant 21 : index
    %c0_222 = arith.constant 0 : index
    %c0_223 = arith.constant 0 : index
    %354 = vector.load %arg5[%c21_221, %c0_222, %c0_223] : memref<25x12x256xf32, #tpu.memory_space<vmem>>, vector<1x12x256xf32>
    %355 = vector.shape_cast %354 : vector<1x12x256xf32> to vector<12x256xf32>
    %356 = vector.shape_cast %350 : vector<12x256xf32> to vector<1x12x256xf32>
    tpu.vector_store %arg5[%c21_221, %c0_222, %c0_223], %356 {strides = array<i32>} : memref<25x12x256xf32, #tpu.memory_space<vmem>>, vector<1x12x256xf32>,
    %c22 = arith.constant 22 : index
    %c0_224 = arith.constant 0 : index
    %c0_225 = arith.constant 0 : index
    %357 = vector.load %arg1[%c22, %c0_224, %c0_225] : memref<25x50x256xf32, #tpu.memory_space<vmem>>, vector<1x50x256xf32>
    %358 = vector.shape_cast %357 : vector<1x50x256xf32> to vector<50x256xf32>
    %cst_226 = arith.constant dense<0.000000e+00> : vector<12x256xf32>
    %359 = tpu.matmul %0, %358, %cst_226 {dimension_numbers = #tpu.dot_dimension_numbers<[1], [0], [0], [1], [0, 0, 1, 1], [], []>} : vector<12x50xf32>, vector<50x256xf32>, vector<12x256xf32> -> vector<12x256xf32>
    %360 = arith.addf %359, %3 : vector<12x256xf32>
    %361 = arith.addf %350, %360 : vector<12x256xf32>
    %cst_227 = arith.constant 1.000000e+00 : f32
    %362 = vector.broadcast %cst_227 : f32 to vector<12x256xf32>
    %363 = arith.cmpf ogt, %350, %362 : vector<12x256xf32>
    %364 = arith.extui %363 : vector<12x256xi1> to vector<12x256xi32>
    %365 = arith.sitofp %364 : vector<12x256xi32> to vector<12x256xf32>
    %366 = arith.subf %361, %365 : vector<12x256xf32>
    %c22_228 = arith.constant 22 : index
    %c0_229 = arith.constant 0 : index
    %c0_230 = arith.constant 0 : index
    %367 = vector.load %arg4[%c22_228, %c0_229, %c0_230] : memref<25x12x256xf32, #tpu.memory_space<vmem>>, vector<1x12x256xf32>
    %368 = vector.shape_cast %367 : vector<1x12x256xf32> to vector<12x256xf32>
    %369 = vector.shape_cast %360 : vector<12x256xf32> to vector<1x12x256xf32>
    tpu.vector_store %arg4[%c22_228, %c0_229, %c0_230], %369 {strides = array<i32>} : memref<25x12x256xf32, #tpu.memory_space<vmem>>, vector<1x12x256xf32>,
    %c22_231 = arith.constant 22 : index
    %c0_232 = arith.constant 0 : index
    %c0_233 = arith.constant 0 : index
    %370 = vector.load %arg5[%c22_231, %c0_232, %c0_233] : memref<25x12x256xf32, #tpu.memory_space<vmem>>, vector<1x12x256xf32>
    %371 = vector.shape_cast %370 : vector<1x12x256xf32> to vector<12x256xf32>
    %372 = vector.shape_cast %366 : vector<12x256xf32> to vector<1x12x256xf32>
    tpu.vector_store %arg5[%c22_231, %c0_232, %c0_233], %372 {strides = array<i32>} : memref<25x12x256xf32, #tpu.memory_space<vmem>>, vector<1x12x256xf32>,
    %c23 = arith.constant 23 : index
    %c0_234 = arith.constant 0 : index
    %c0_235 = arith.constant 0 : index
    %373 = vector.load %arg1[%c23, %c0_234, %c0_235] : memref<25x50x256xf32, #tpu.memory_space<vmem>>, vector<1x50x256xf32>
    %374 = vector.shape_cast %373 : vector<1x50x256xf32> to vector<50x256xf32>
    %cst_236 = arith.constant dense<0.000000e+00> : vector<12x256xf32>
    %375 = tpu.matmul %0, %374, %cst_236 {dimension_numbers = #tpu.dot_dimension_numbers<[1], [0], [0], [1], [0, 0, 1, 1], [], []>} : vector<12x50xf32>, vector<50x256xf32>, vector<12x256xf32> -> vector<12x256xf32>
    %376 = arith.addf %375, %3 : vector<12x256xf32>
    %377 = arith.addf %366, %376 : vector<12x256xf32>
    %cst_237 = arith.constant 1.000000e+00 : f32
    %378 = vector.broadcast %cst_237 : f32 to vector<12x256xf32>
    %379 = arith.cmpf ogt, %366, %378 : vector<12x256xf32>
    %380 = arith.extui %379 : vector<12x256xi1> to vector<12x256xi32>
    %381 = arith.sitofp %380 : vector<12x256xi32> to vector<12x256xf32>
    %382 = arith.subf %377, %381 : vector<12x256xf32>
    %c23_238 = arith.constant 23 : index
    %c0_239 = arith.constant 0 : index
    %c0_240 = arith.constant 0 : index
    %383 = vector.load %arg4[%c23_238, %c0_239, %c0_240] : memref<25x12x256xf32, #tpu.memory_space<vmem>>, vector<1x12x256xf32>
    %384 = vector.shape_cast %383 : vector<1x12x256xf32> to vector<12x256xf32>
    %385 = vector.shape_cast %376 : vector<12x256xf32> to vector<1x12x256xf32>
    tpu.vector_store %arg4[%c23_238, %c0_239, %c0_240], %385 {strides = array<i32>} : memref<25x12x256xf32, #tpu.memory_space<vmem>>, vector<1x12x256xf32>,
    %c23_241 = arith.constant 23 : index
    %c0_242 = arith.constant 0 : index
    %c0_243 = arith.constant 0 : index
    %386 = vector.load %arg5[%c23_241, %c0_242, %c0_243] : memref<25x12x256xf32, #tpu.memory_space<vmem>>, vector<1x12x256xf32>
    %387 = vector.shape_cast %386 : vector<1x12x256xf32> to vector<12x256xf32>
    %388 = vector.shape_cast %382 : vector<12x256xf32> to vector<1x12x256xf32>
    tpu.vector_store %arg5[%c23_241, %c0_242, %c0_243], %388 {strides = array<i32>} : memref<25x12x256xf32, #tpu.memory_space<vmem>>, vector<1x12x256xf32>,
    %c24 = arith.constant 24 : index
    %c0_244 = arith.constant 0 : index
    %c0_245 = arith.constant 0 : index
    %389 = vector.load %arg1[%c24, %c0_244, %c0_245] : memref<25x50x256xf32, #tpu.memory_space<vmem>>, vector<1x50x256xf32>
    %390 = vector.shape_cast %389 : vector<1x50x256xf32> to vector<50x256xf32>
    %cst_246 = arith.constant dense<0.000000e+00> : vector<12x256xf32>
    %391 = tpu.matmul %0, %390, %cst_246 {dimension_numbers = #tpu.dot_dimension_numbers<[1], [0], [0], [1], [0, 0, 1, 1], [], []>} : vector<12x50xf32>, vector<50x256xf32>, vector<12x256xf32> -> vector<12x256xf32>
    %392 = arith.addf %391, %3 : vector<12x256xf32>
    %393 = arith.addf %382, %392 : vector<12x256xf32>
    %cst_247 = arith.constant 1.000000e+00 : f32
    %394 = vector.broadcast %cst_247 : f32 to vector<12x256xf32>
    %395 = arith.cmpf ogt, %382, %394 : vector<12x256xf32>
    %396 = arith.extui %395 : vector<12x256xi1> to vector<12x256xi32>
    %397 = arith.sitofp %396 : vector<12x256xi32> to vector<12x256xf32>
    %398 = arith.subf %393, %397 : vector<12x256xf32>
    %c24_248 = arith.constant 24 : index
    %c0_249 = arith.constant 0 : index
    %c0_250 = arith.constant 0 : index
    %399 = vector.load %arg4[%c24_248, %c0_249, %c0_250] : memref<25x12x256xf32, #tpu.memory_space<vmem>>, vector<1x12x256xf32>
    %400 = vector.shape_cast %399 : vector<1x12x256xf32> to vector<12x256xf32>
    %401 = vector.shape_cast %392 : vector<12x256xf32> to vector<1x12x256xf32>
    tpu.vector_store %arg4[%c24_248, %c0_249, %c0_250], %401 {strides = array<i32>} : memref<25x12x256xf32, #tpu.memory_space<vmem>>, vector<1x12x256xf32>,
    %c24_251 = arith.constant 24 : index
    %c0_252 = arith.constant 0 : index
    %c0_253 = arith.constant 0 : index
    %402 = vector.load %arg5[%c24_251, %c0_252, %c0_253] : memref<25x12x256xf32, #tpu.memory_space<vmem>>, vector<1x12x256xf32>
    %403 = vector.shape_cast %402 : vector<1x12x256xf32> to vector<12x256xf32>
    %404 = vector.shape_cast %398 : vector<12x256xf32> to vector<1x12x256xf32>
    tpu.vector_store %arg5[%c24_251, %c0_252, %c0_253], %404 {strides = array<i32>} : memref<25x12x256xf32, #tpu.memory_space<vmem>>, vector<1x12x256xf32>,
    %c0_254 = arith.constant 0 : index
    %c0_255 = arith.constant 0 : index
    %c0_256 = arith.constant 0 : index
    %405 = vector.load %arg4[%c0_254, %c0_255, %c0_256] : memref<25x12x256xf32, #tpu.memory_space<vmem>>, vector<25x12x256xf32>
    %c0_257 = arith.constant 0 : index
    %c0_258 = arith.constant 0 : index
    %c0_259 = arith.constant 0 : index
    %406 = vector.load %arg5[%c0_257, %c0_258, %c0_259] : memref<25x12x256xf32, #tpu.memory_space<vmem>>, vector<25x12x256xf32>
    %407 = arith.addf %406, %405 : vector<25x12x256xf32>
    %cst_260 = arith.constant 1.000000e+00 : f32
    %408 = vector.broadcast %cst_260 : f32 to vector<25x12x256xf32>
    %409 = arith.cmpf ogt, %406, %408 : vector<25x12x256xf32>
    %410 = arith.extui %409 : vector<25x12x256xi1> to vector<25x12x256xi32>
    %411 = arith.sitofp %410 : vector<25x12x256xi32> to vector<25x12x256xf32>
    %412 = arith.subf %407, %411 : vector<25x12x256xf32>
    %c0_261 = arith.constant 0 : index
    %c0_262 = arith.constant 0 : index
    %c0_263 = arith.constant 0 : index
    %413 = vector.load %arg5[%c0_261, %c0_262, %c0_263] : memref<25x12x256xf32, #tpu.memory_space<vmem>>, vector<25x12x256xf32>
    tpu.vector_store %arg5[%c0_261, %c0_262, %c0_263], %412 {strides = array<i32>} : memref<25x12x256xf32, #tpu.memory_space<vmem>>, vector<25x12x256xf32>,
    %cst_264 = arith.constant 1.000000e+00 : f32
    %414 = vector.broadcast %cst_264 : f32 to vector<25x12x256xf32>
    %415 = arith.cmpf ogt, %412, %414 : vector<25x12x256xf32>
    %416 = arith.extui %415 : vector<25x12x256xi1> to vector<25x12x256xi32>
    %417 = arith.sitofp %416 : vector<25x12x256xi32> to vector<25x12x256xf32>
    %c0_265 = arith.constant 0 : index
    %c0_266 = arith.constant 0 : index
    %c0_267 = arith.constant 0 : index
    %418 = vector.load %arg4[%c0_265, %c0_266, %c0_267] : memref<25x12x256xf32, #tpu.memory_space<vmem>>, vector<25x12x256xf32>
    tpu.vector_store %arg4[%c0_265, %c0_266, %c0_267], %417 {strides = array<i32>} : memref<25x12x256xf32, #tpu.memory_space<vmem>>, vector<25x12x256xf32>,
    return
  }
  func.func @transform_0(%arg0: i32) -> (i32, i32, i32) {
    %c0_i32 = arith.constant 0 : i32
    %c0_i32_0 = arith.constant 0 : i32
    %c0_i32_1 = arith.constant 0 : i32
    return %c0_i32, %c0_i32_0, %arg0 : i32, i32, i32
  }
  func.func @transform_1(%arg0: i32) -> (i32, i32) {
    %c0_i32 = arith.constant 0 : i32
    %c0_i32_0 = arith.constant 0 : i32
    %c0_i32_1 = arith.constant 0 : i32
    return %c0_i32, %c0_i32_0 : i32, i32
  }
  func.func @transform_2(%arg0: i32) -> (i32, i32) {
    %c0_i32 = arith.constant 0 : i32
    %c0_i32_0 = arith.constant 0 : i32
    %c0_i32_1 = arith.constant 0 : i32
    return %c0_i32, %c0_i32_0 : i32, i32
  }
  func.func @transform_3(%arg0: i32) -> (i32, i32, i32) {
    %c0_i32 = arith.constant 0 : i32
    %c0_i32_0 = arith.constant 0 : i32
    %c0_i32_1 = arith.constant 0 : i32
    return %c0_i32, %c0_i32_0, %arg0 : i32, i32, i32
  }
  func.func @transform_4(%arg0: i32) -> (i32, i32, i32) {
    %c0_i32 = arith.constant 0 : i32
    %c0_i32_0 = arith.constant 0 : i32
    %c0_i32_1 = arith.constant 0 : i32
    return %c0_i32, %c0_i32_0, %arg0 : i32, i32, i32
  }
}

</mosaic_0001>

<bundles_post_ra>
// kernel: tpu_custom_call.1
= control target key start
LH: loop header
LB: loop body
LE: loop exit
PB: predicated region body
PF: predicated region fallthrough
CT: control target
= control target key end

     0   :  { %10 = vsyncpa [#allocation3], 0  ;;  %s7791_s0 = inlined_call_operand.hbm [shape: f32[25,50,256], index: 0, kind: input, shape index: {}]   ;;  %s7792_s1 = inlined_call_operand.hbm [shape: f32[12,50], index: 1, kind: input, shape index: {}]   ;;  %s7793_s2 = inlined_call_operand.vmem [shape: f32[12,1], index: 2, kind: input, shape index: {}]   ;;  %s7794_s3 = inlined_call_operand.vmem [shape: f32[25,12,256], index: 3, kind: output, shape index: {0}]   ;;  %s7795_s4 = inlined_call_operand.vmem [shape: f32[25,12,256], index: 4, kind: output, shape index: {1}]  }
   0x1   :  { %11 = vsyncpa [#allocation5], 0  ;;  %s5419_s15 = smov [#allocation2]   ;;  %s5371_s19 = scalar_lea.hbm %s7791_s0, 44800 }
   0x2   :  { %s17_s16 = sshll.u32 %s5419_s15, 4  ;;  %p5372_p0 = scmp.ne.s32.totalorder %s7791_s0, %s5371_s19  ;;  %s18_s16 = int_to_ptr.vmem [resolvable:$true] %s17_s16 }
   0x3   :  { %p5375_p1 = scmp.lt.u32.totalorder %s5371_s19, %s7791_s0 }
   0x5   :  { %p5377_p2 = pnand %p5375_p1, %p5372_p0 }
   0x7   :  { %5380 = shalt.err (!%p5377_p2)
}
   0x8   :  { %s5381_s24 = scalar_lea.vmem %s18_s16, 44800  ;;  %p5386_p4 = scmp.lt.s32.totalorder %s18_s16, %s18_s16 }
   0x9   :  { %p5382_p3 = scmp.ne.s32.totalorder %s18_s16, %s5381_s24  ;;  %p5387_p5 = scmp.lt.s32.totalorder %s5381_s24, %s5381_s24 }
   0xb   :  { %p5388_p6 = por %p5387_p5, %p5386_p4 }
   0xd   :  { %p5389_p7 = pnand %p5388_p6, %p5382_p3 }
   0xf   :  { %5392 = shalt.err (!%p5389_p7)
}
  0x10   :  { %s5420_s25 = smov 256   ;;  %s5421_s26 = smov 16  }
  0x11   :  { %23 = dma.hbm_to_vmem [thread:$0]  %s7791_s0, 44800, %s18_s16, [#allocation3], %s5420_s25, %s5420_s25, %s5421_s26  }
  0x12   :  { %s5422_s29 = smov [#allocation4]   ;;  %s5393_s7 = scalar_lea.hbm %s7792_s1, 256 }
  0x13   :  { %s29_s30 = sshll.u32 %s5422_s29, 4  ;;  %p5394_p8 = scmp.ne.s32.totalorder %s7792_s1, %s5393_s7  ;;  %s30_s30 = int_to_ptr.vmem [resolvable:$true] %s29_s30 }
  0x14   :  { %p5397_p9 = scmp.lt.u32.totalorder %s5393_s7, %s7792_s1 }
  0x16   :  { %p5399_p10 = pnand %p5397_p9, %p5394_p8 }
  0x18   :  { %5402 = shalt.err (!%p5399_p10)
}
  0x19   :  { %s5403_s12 = scalar_lea.vmem %s30_s30, 256  ;;  %p5408_p12 = scmp.lt.s32.totalorder %s30_s30, %s30_s30 }
  0x1a   :  { %p5404_p11 = scmp.ne.s32.totalorder %s30_s30, %s5403_s12  ;;  %p5409_p13 = scmp.lt.s32.totalorder %s5403_s12, %s5403_s12 }
  0x1c   :  { %p5410_p0 = por %p5409_p13, %p5408_p12 }
  0x1e   :  { %p5411_p1 = pnand %p5410_p0, %p5404_p11 }
  0x20   :  { %5414 = shalt.err (!%p5411_p1)
}
  0x21   :  { %s5423_s0 = smov 128   ;;  %s5424_s13 = smov 8  }
  0x22   :  { %35 = dma.hbm_to_vmem [thread:$0]  %s7792_s1, 256, %s30_s30, [#allocation5], %s5423_s0, %s5423_s0, %s5424_s13  }
  0x23   :  { %5415 = dma.done.wait [#allocation3], 44800  }
  0x24   :  { %5416 = vsyncadd [#allocation3], 4294922496 }
  0x25   :  { %5417 = dma.done.wait [#allocation5], 256  }
  0x26   :  { %5418 = vsyncadd [#allocation5], 4294967040  ;;  %v5425_v0 = vmov 0.0   ;;  %v5426_v1 = vmov 0   ;;  %v59_v2 = vld [vmem:[#allocation2 + $0x8] sm:$0xff]  ;;  %v61_v3 = vld [vmem:[#allocation2 + $0x18] sm:$0xff] }
  0x27   :  { %150 = vmatprep.mubr.f32.mxu0 %v5425_v0  ;;  %267 = vmatprep.mubr.f32.mxu1 %v5425_v0  ;;  %v184_v4 = vld [vmem:[#allocation2 + $0x78] sm:$0xff]  ;;  %v5052_v5 = vpack.c.bf16 %v61_v3, %v59_v2  ;;  %v186_v6 = vld [vmem:[#allocation2 + $0x88] sm:$0xff]  ;;  %v58_v7 = vld [vmem:[#allocation2] sm:$0xff]  ;;  %vm79_vm0 = vcmask 1041408   ;;  %vm72_vm1 = vcmask 408576  }
  0x28   :  { %5368 = vset.pattern.permute.xlu0 %v5426_v1  ;;  %v60_v8 = vld [vmem:[#allocation2 + $0x10] sm:$0xff]  ;;  %v5064_v9 = vpack.c.bf16 %v186_v6, %v184_v4  ;;  %v185_v12 = vld [vmem:[#allocation2 + $0x80] sm:$0xff]  ;;  %v63_v13 = vld [vmem:[#allocation2 + $0x28] sm:$0xff] }
  0x29   :  { %v5054_v10 = vpack.c.bf16 %v60_v8, %v58_v7  ;;  %v183_v11 = vld [vmem:[#allocation2 + $0x70] sm:$0xff]  ;;  %5053 = vmatprep.subr.bf16.mxu0 %v5052_v5  ;;  %v65_v15 = vld [vmem:[#allocation2 + $0x38] sm:$0xff]  ;;  %v190_v17 = vld [vmem:[#allocation2 + $0xa8] sm:$0xff] }
  0x2a   :  { %v5066_v14 = vpack.c.bf16 %v185_v12, %v183_v11  ;;  %v188_v16 = vld [vmem:[#allocation2 + $0x98] sm:$0xff]  ;;  %5065 = vmatprep.subr.bf16.mxu1 %v5064_v9  ;;  %v5056_v18 = vpack.c.bf16 %v65_v15, %v63_v13  ;;  %v62_v20 = vld [vmem:[#allocation2 + $0x20] sm:$0xff]  ;;  %v64_v21 = vld [vmem:[#allocation2 + $0x30] sm:$0xff] }
  0x2b   :  { %5055 = vmatpush1.bf16.msra.mxu0 %v5054_v10  ;;  %v5068_v19 = vpack.c.bf16 %v190_v17, %v188_v16  ;;  %v187_v22 = vld [vmem:[#allocation2 + $0x90] sm:$0xff]  ;;  %v5058_v23 = vpack.c.bf16 %v64_v21, %v62_v20  ;;  %v189_v24 = vld [vmem:[#allocation2 + $0xa0] sm:$0xff]  ;;  %v67_v25 = vld [vmem:[#allocation2 + $0x48] sm:$0xff] }
  0x2c   :  { %5067 = vmatpush1.bf16.msra.mxu1 %v5066_v14  ;;  %v69_v26 = vld [vmem:[#allocation2 + $0x58] sm:$0xff]  ;;  %5057 = vmatprep.subr.bf16.mxu0 %v5056_v18  ;;  %v5070_v27 = vpack.c.bf16 %v189_v24, %v187_v22  ;;  %v194_v30 = vld [vmem:[#allocation2 + $0xc8] sm:$0xff]  ;;  %v66_v31 = vld [vmem:[#allocation2 + $0x40] sm:$0xff] }
  0x2d   :  { %5069 = vmatprep.subr.bf16.mxu1 %v5068_v19  ;;  %v5060_v28 = vpack.c.bf16 %v69_v26, %v67_v25  ;;  %v192_v29 = vld [vmem:[#allocation2 + $0xb8] sm:$0xff]  ;;  %v68_v33 = vld [vmem:[#allocation2 + $0x50] sm:$0xff]  ;;  %v193_v35 = vld [vmem:[#allocation2 + $0xc0] sm:$0xff] }
  0x2e   :  { %v5072_v32 = vpack.c.bf16 %v194_v30, %v192_v29  ;;  %v191_v34 = vld [vmem:[#allocation2 + $0xb0] sm:$0xff]  ;;  %v5062_v36 = vpack.c.bf16 %v68_v33, %v66_v31  ;;  %v71_v38 = vld [vmem:[#allocation2 + $0x68] sm:$0x3]  ;;  %v196_v39 = vld [vmem:[#allocation2 + $0xd8] sm:$0x3] }
  0x2f   :  { %5059 = vmatpush1.bf16.msra.mxu0 %v5058_v23  ;;  %v5074_v37 = vpack.c.bf16 %v193_v35, %v191_v34  ;;  %v312_v40 = vld [vmem:[#allocation2 + $0xe8] sm:$0xff]  ;;  %v70_v41 = vld [vmem:[#allocation2 + $0x60] sm:$0x3]  ;;  %v314_v42 = vld [vmem:[#allocation2 + $0xf8] sm:$0xff] }
  0x30   :  { %5071 = vmatpush1.bf16.msra.mxu1 %v5070_v27  ;;  %5061 = vmatprep.subr.bf16.mxu0 %v5060_v28  ;;  %v440_v43 = vld [vmem:[#allocation2 + $0x158] sm:$0xff]  ;;  %v442_v44 = vld [vmem:[#allocation2 + $0x168] sm:$0xff]  ;;  %v195_v45 = vld [vmem:[#allocation2 + $0xd0] sm:$0x3]  ;;  %v5076_v53 = vpack.c.bf16 %v314_v42, %v312_v40 }
  0x31   :  { %5073 = vmatprep.subr.bf16.mxu1 %v5072_v32  ;;  %v311_v46 = vld [vmem:[#allocation2 + $0xe0] sm:$0xff]  ;;  %v313_v47 = vld [vmem:[#allocation2 + $0xf0] sm:$0xff]  ;;  %v316_v50 = vld [vmem:[#allocation2 + $0x108] sm:$0xff]  ;;  %v5088_v56 = vpack.c.bf16 %v442_v44, %v440_v43 }
  0x32   :  { %v439_v48 = vld [vmem:[#allocation2 + $0x150] sm:$0xff]  ;;  %v441_v49 = vld [vmem:[#allocation2 + $0x160] sm:$0xff]  ;;  %v318_v51 = vld [vmem:[#allocation2 + $0x118] sm:$0xff]  ;;  %v5078_v57 = vpack.c.bf16 %v313_v47, %v311_v46 }
  0x33   :  { %5063 = vmatpush1.bf16.msra.mxu0 %v5062_v36  ;;  %v5480_v52 = vld [vmem:[#allocation4] sm:$0xff]  ;;  %v444_v54 = vld [vmem:[#allocation2 + $0x178] sm:$0xff]  ;;  %v446_v55 = vld [vmem:[#allocation2 + $0x188] sm:$0xff]  ;;  %v5090_v58 = vpack.c.bf16 %v441_v49, %v439_v48  ;;  %v5080_v59 = vpack.c.bf16 %v318_v51, %v316_v50 }
  0x34   :  { %5075 = vmatpush1.bf16.msra.mxu1 %v5074_v37  ;;  %4464 = vmatprep.subr.msk.mxu0 %vm79_vm0, %v71_v38  ;;  %v315_v60 = vld [vmem:[#allocation2 + $0x100] sm:$0xff]  ;;  %v317_v61 = vld [vmem:[#allocation2 + $0x110] sm:$0xff]  ;;  %v5092_v63 = vpack.c.bf16 %v446_v55, %v444_v54  ;;  %v320_v2 = vld [vmem:[#allocation2 + $0x128] sm:$0xff] }
  0x35   :  { %4468 = vmatprep.subr.msk.mxu1 %vm79_vm0, %v196_v39  ;;  %v443_v62 = vld [vmem:[#allocation2 + $0x170] sm:$0xff]  ;;  %v445_v1 = vld [vmem:[#allocation2 + $0x180] sm:$0xff]  ;;  %v322_v3 = vld [vmem:[#allocation2 + $0x138] sm:$0xff]  ;;  %v5082_v6 = vpack.c.bf16 %v317_v61, %v315_v60 }
  0x36   :  { %v448_v4 = vld [vmem:[#allocation2 + $0x198] sm:$0xff]  ;;  %v450_v5 = vld [vmem:[#allocation2 + $0x1a8] sm:$0xff]  ;;  %v5094_v8 = vpack.c.bf16 %v445_v1, %v443_v62  ;;  %v5084_v9 = vpack.c.bf16 %v322_v3, %v320_v2  ;;  %v319_v10 = vld [vmem:[#allocation2 + $0x120] sm:$0xff] }
  0x37   :  { %4465 = vmatpush1.msk.msra.mxu0 %vm79_vm0, %v70_v41  ;;  %v5488_v7 = vld [vmem:[#allocation4 + $0x8] sm:$0xf]  ;;  %v321_v11 = vld [vmem:[#allocation2 + $0x130] sm:$0xff]  ;;  %v5096_v12 = vpack.c.bf16 %v450_v5, %v448_v4  ;;  %v449_v14 = vld [vmem:[#allocation2 + $0x1a0] sm:$0xff] }
  0x38   :  { %4469 = vmatpush1.msk.msra.mxu1 %vm79_vm0, %v195_v45  ;;  %4466 = vmatmul.mubr.msk.f32.vlgmr.msra.gmra.mrb[0].mxu0 %vm72_vm1, %v5480_v52  ;;  %v447_v13 = vld [vmem:[#allocation2 + $0x190] sm:$0xff]  ;;  %v5086_v15 = vpack.c.bf16 %v321_v11, %v319_v10  ;;  %v324_v17 = vld [vmem:[#allocation2 + $0x148] sm:$0x3]  ;;  %v452_v18 = vld [vmem:[#allocation2 + $0x1b8] sm:$0x3] }
  0x39   :  { %4470 = vmatmul.mubr.msk.f32.vlgmr.msra.gmra.mrb[0].mxu1 %vm72_vm1, %v5480_v52  ;;  %5077 = vmatprep.subr.bf16.mxu0 %v5076_v53  ;;  %v5098_v16 = vpack.c.bf16 %v449_v14, %v447_v13  ;;  %v568_v19 = vld [vmem:[#allocation2 + $0x1c8] sm:$0xff]  ;;  %v570_v20 = vld [vmem:[#allocation2 + $0x1d8] sm:$0xff]  ;;  %v567_v23 = vld [vmem:[#allocation2 + $0x1c0] sm:$0xff] }
  0x3a   :  { %5089 = vmatprep.subr.bf16.mxu1 %v5088_v56  ;;  %5079 = vmatpush1.bf16.msra.mxu0 %v5078_v57  ;;  %v696_v21 = vld [vmem:[#allocation2 + $0x238] sm:$0xff]  ;;  %v698_v22 = vld [vmem:[#allocation2 + $0x248] sm:$0xff]  ;;  %v569_v24 = vld [vmem:[#allocation2 + $0x1d0] sm:$0xff]  ;;  %v5100_v29 = vpack.c.bf16 %v570_v20, %v568_v19 }
  0x3b   :  { %5091 = vmatpush1.bf16.msra.mxu1 %v5090_v58  ;;  %5081 = vmatprep.subr.bf16.mxu0 %v5080_v59  ;;  %v323_v25 = vld [vmem:[#allocation2 + $0x140] sm:$0x3]  ;;  %v695_v26 = vld [vmem:[#allocation2 + $0x230] sm:$0xff]  ;;  %v572_v30 = vld [vmem:[#allocation2 + $0x1e8] sm:$0xff]  ;;  %v5112_v32 = vpack.c.bf16 %v698_v22, %v696_v21  ;;  %v5102_v33 = vpack.c.bf16 %v569_v24, %v567_v23 }
  0x3c   :  { %5093 = vmatprep.subr.bf16.mxu1 %v5092_v63  ;;  %156 = vmatprep.mubr.f32.mxu0 %v5425_v0  ;;  %v697_v27 = vld [vmem:[#allocation2 + $0x240] sm:$0xff]  ;;  %v451_v28 = vld [vmem:[#allocation2 + $0x1b0] sm:$0x3]  ;;  %v574_v31 = vld [vmem:[#allocation2 + $0x1f8] sm:$0xff] }
  0x3d   :  { %273 = vmatprep.mubr.f32.mxu1 %v5425_v0  ;;  %4467 = vmatmul.mubr.msk.f32.gmra.mrb[2].mxu0 %vm72_vm1, %v5488_v7  ;;  %v700_v34 = vld [vmem:[#allocation2 + $0x258] sm:$0xff]  ;;  %v702_v35 = vld [vmem:[#allocation2 + $0x268] sm:$0xff]  ;;  %v5114_v36 = vpack.c.bf16 %v697_v27, %v695_v26  ;;  %v571_v37 = vld [vmem:[#allocation2 + $0x1e0] sm:$0xff]  ;;  %v5104_v40 = vpack.c.bf16 %v574_v31, %v572_v30 }
  0x3e   :  { %5083 = vmatpush1.bf16.msra.mxu0 %v5082_v6  ;;  %4471 = vmatmul.mubr.msk.f32.gmra.mrb[2].mxu1 %vm72_vm1, %v5488_v7  ;;  %v573_v38 = vld [vmem:[#allocation2 + $0x1f0] sm:$0xff]  ;;  %v701_v41 = vld [vmem:[#allocation2 + $0x260] sm:$0xff]  ;;  %v576_v42 = vld [vmem:[#allocation2 + $0x208] sm:$0xff]  ;;  %v5116_v44 = vpack.c.bf16 %v702_v35, %v700_v34 }
  0x3f   :  { %5095 = vmatpush1.bf16.msra.mxu1 %v5094_v8  ;;  %5085 = vmatprep.subr.bf16.mxu0 %v5084_v9  ;;  %v699_v39 = vld [vmem:[#allocation2 + $0x250] sm:$0xff]  ;;  %v578_v43 = vld [vmem:[#allocation2 + $0x218] sm:$0xff]  ;;  %v706_v46 = vld [vmem:[#allocation2 + $0x288] sm:$0xff]  ;;  %v5106_v47 = vpack.c.bf16 %v573_v38, %v571_v37 }
  0x40   :  { %5097 = vmatprep.subr.bf16.mxu1 %v5096_v12  ;;  %395 = vmatprep.mubr.f32.mxu0 %v5425_v0  ;;  %v704_v45 = vld [vmem:[#allocation2 + $0x278] sm:$0xff]  ;;  %v5118_v48 = vpack.c.bf16 %v701_v41, %v699_v39  ;;  %v5108_v49 = vpack.c.bf16 %v578_v43, %v576_v42  ;;  %v575_v50 = vld [vmem:[#allocation2 + $0x200] sm:$0xff]  ;;  %v577_v51 = vld [vmem:[#allocation2 + $0x210] sm:$0xff] }
  0x41   :  { %523 = vmatprep.mubr.f32.mxu1 %v5425_v0  ;;  %v5120_v53 = vpack.c.bf16 %v706_v46, %v704_v45  ;;  %v703_v54 = vld [vmem:[#allocation2 + $0x270] sm:$0xff]  ;;  %v705_v55 = vld [vmem:[#allocation2 + $0x280] sm:$0xff]  ;;  %v5110_v56 = vpack.c.bf16 %v577_v51, %v575_v50  ;;  %v580_v58 = vld [vmem:[#allocation2 + $0x228] sm:$0x3] }
  0x42   :  { %5087 = vmatpush1.bf16.msra.mxu0 %v5086_v15  ;;  %v5122_v57 = vpack.c.bf16 %v705_v55, %v703_v54  ;;  %v708_v59 = vld [vmem:[#allocation2 + $0x298] sm:$0x3]  ;;  %v824_v60 = vld [vmem:[#allocation2 + $0x2a8] sm:$0xff]  ;;  %v823_v1 = vld [vmem:[#allocation2 + $0x2a0] sm:$0xff] }
  0x43   :  { %5099 = vmatpush1.bf16.msra.mxu1 %v5098_v16  ;;  %4484 = vmatprep.subr.msk.mxu0 %vm79_vm0, %v324_v17  ;;  %v826_v61 = vld [vmem:[#allocation2 + $0x2b8] sm:$0xff]  ;;  %v954_v63 = vld [vmem:[#allocation2 + $0x328] sm:$0xff]  ;;  %v825_v2 = vld [vmem:[#allocation2 + $0x2b0] sm:$0xff] }
  0x44   :  { %4500 = vmatprep.subr.msk.mxu1 %vm79_vm0, %v452_v18  ;;  %v952_v62 = vld [vmem:[#allocation2 + $0x318] sm:$0xff]  ;;  %v579_v3 = vld [vmem:[#allocation2 + $0x220] sm:$0x3]  ;;  %v951_v4 = vld [vmem:[#allocation2 + $0x310] sm:$0xff]  ;;  %v5124_v8 = vpack.c.bf16 %v826_v61, %v824_v60  ;;  %v5126_v12 = vpack.c.bf16 %v825_v2, %v823_v1 }
  0x45   :  { %v953_v5 = vld [vmem:[#allocation2 + $0x320] sm:$0xff]  ;;  %v707_v6 = vld [vmem:[#allocation2 + $0x290] sm:$0x3]  ;;  %v828_v9 = vld [vmem:[#allocation2 + $0x2c8] sm:$0xff]  ;;  %v5136_v11 = vpack.c.bf16 %v954_v63, %v952_v62 }
  0x46   :  { %4485 = vmatpush1.msk.msra.mxu0 %vm79_vm0, %v323_v25  ;;  %v830_v10 = vld [vmem:[#allocation2 + $0x2d8] sm:$0xff]  ;;  %v958_v14 = vld [vmem:[#allocation2 + $0x348] sm:$0xff]  ;;  %v5138_v15 = vpack.c.bf16 %v953_v5, %v951_v4  ;;  %v827_v16 = vld [vmem:[#allocation2 + $0x2c0] sm:$0xff] }
  0x47   :  { %4501 = vmatpush1.msk.msra.mxu1 %vm79_vm0, %v451_v28  ;;  %4486 = vmatmul.mubr.msk.f32.vlgmr.msra.gmra.mrb[4].mxu0 %vm72_vm1, %v5480_v52  ;;  %v956_v13 = vld [vmem:[#allocation2 + $0x338] sm:$0xff]  ;;  %v829_v17 = vld [vmem:[#allocation2 + $0x2d0] sm:$0xff]  ;;  %v5128_v19 = vpack.c.bf16 %v830_v10, %v828_v9  ;;  %v957_v20 = vld [vmem:[#allocation2 + $0x340] sm:$0xff] }
  0x48   :  { %4502 = vmatmul.mubr.msk.f32.vlgmr.msra.gmra.mrb[4].mxu1 %vm72_vm1, %v5480_v52  ;;  %5101 = vmatprep.subr.bf16.mxu0 %v5100_v29  ;;  %v955_v18 = vld [vmem:[#allocation2 + $0x330] sm:$0xff]  ;;  %v832_v21 = vld [vmem:[#allocation2 + $0x2e8] sm:$0xff]  ;;  %v834_v22 = vld [vmem:[#allocation2 + $0x2f8] sm:$0xff]  ;;  %v5140_v23 = vpack.c.bf16 %v958_v14, %v956_v13  ;;  %v5130_v26 = vpack.c.bf16 %v829_v17, %v827_v16 }
  0x49   :  { %5113 = vmatprep.subr.bf16.mxu1 %v5112_v32  ;;  %5103 = vmatpush1.bf16.msra.mxu0 %v5102_v33  ;;  %v960_v24 = vld [vmem:[#allocation2 + $0x358] sm:$0xff]  ;;  %v962_v25 = vld [vmem:[#allocation2 + $0x368] sm:$0xff]  ;;  %v5142_v27 = vpack.c.bf16 %v957_v20, %v955_v18  ;;  %v5132_v28 = vpack.c.bf16 %v834_v22, %v832_v21  ;;  %v831_v29 = vld [vmem:[#allocation2 + $0x2e0] sm:$0xff] }
  0x4a   :  { %5115 = vmatpush1.bf16.msra.mxu1 %v5114_v36  ;;  %401 = vmatprep.mubr.f32.mxu0 %v5425_v0  ;;  %v833_v30 = vld [vmem:[#allocation2 + $0x2f0] sm:$0xff]  ;;  %v5144_v31 = vpack.c.bf16 %v962_v25, %v960_v24  ;;  %v961_v33 = vld [vmem:[#allocation2 + $0x360] sm:$0xff]  ;;  %v836_v36 = vld [vmem:[#allocation2 + $0x308] sm:$0x3] }
  0x4b   :  { %4487 = vmatmul.mubr.msk.f32.gmra.mrb[6].mxu0 %vm72_vm1, %v5488_v7  ;;  %5105 = vmatprep.subr.bf16.mxu0 %v5104_v40  ;;  %v959_v32 = vld [vmem:[#allocation2 + $0x350] sm:$0xff]  ;;  %v5134_v34 = vpack.c.bf16 %v833_v30, %v831_v29  ;;  %v964_v37 = vld [vmem:[#allocation2 + $0x378] sm:$0x3]  ;;  %v1080_v38 = vld [vmem:[#allocation2 + $0x388] sm:$0xff] }
  0x4c   :  { %5117 = vmatprep.subr.bf16.mxu1 %v5116_v44  ;;  %529 = vmatprep.mubr.f32.mxu1 %v5425_v0  ;;  %v5146_v35 = vpack.c.bf16 %v961_v33, %v959_v32  ;;  %v1082_v39 = vld [vmem:[#allocation2 + $0x398] sm:$0xff]  ;;  %v1210_v41 = vld [vmem:[#allocation2 + $0x408] sm:$0xff]  ;;  %v1079_v42 = vld [vmem:[#allocation2 + $0x380] sm:$0xff] }
  0x4d   :  { %5107 = vmatpush1.bf16.msra.mxu0 %v5106_v47  ;;  %4503 = vmatmul.mubr.msk.f32.gmra.mrb[6].mxu1 %vm72_vm1, %v5488_v7  ;;  %v1208_v40 = vld [vmem:[#allocation2 + $0x3f8] sm:$0xff]  ;;  %v1081_v43 = vld [vmem:[#allocation2 + $0x390] sm:$0xff]  ;;  %v835_v44 = vld [vmem:[#allocation2 + $0x300] sm:$0x3] }
  0x4e   :  { %5119 = vmatpush1.bf16.msra.mxu1 %v5118_v48  ;;  %5109 = vmatprep.subr.bf16.mxu0 %v5108_v49  ;;  %v1207_v45 = vld [vmem:[#allocation2 + $0x3f0] sm:$0xff]  ;;  %v1209_v46 = vld [vmem:[#allocation2 + $0x400] sm:$0xff]  ;;  %v5148_v48 = vpack.c.bf16 %v1082_v39, %v1080_v38  ;;  %v1084_v49 = vld [vmem:[#allocation2 + $0x3a8] sm:$0xff]  ;;  %v5160_v51 = vpack.c.bf16 %v1210_v41, %v1208_v40 }
  0x4f   :  { %5121 = vmatprep.subr.bf16.mxu1 %v5120_v53  ;;  %651 = vmatprep.mubr.f32.mxu0 %v5425_v0  ;;  %v963_v47 = vld [vmem:[#allocation2 + $0x370] sm:$0x3]  ;;  %v1086_v50 = vld [vmem:[#allocation2 + $0x3b8] sm:$0xff]  ;;  %v5150_v53 = vpack.c.bf16 %v1081_v43, %v1079_v42  ;;  %v1214_v55 = vld [vmem:[#allocation2 + $0x428] sm:$0xff] }
  0x50   :  { %779 = vmatprep.mubr.f32.mxu1 %v5425_v0  ;;  %v1212_v54 = vld [vmem:[#allocation2 + $0x418] sm:$0xff]  ;;  %v5152_v60 = vpack.c.bf16 %v1086_v50, %v1084_v49  ;;  %v1213_v61 = vld [vmem:[#allocation2 + $0x420] sm:$0xff]  ;;  %v1088_v62 = vld [vmem:[#allocation2 + $0x3c8] sm:$0xff] }
  0x51   :  { %5111 = vmatpush1.bf16.msra.mxu0 %v5110_v56  ;;  %v5162_v56 = vpack.c.bf16 %v1209_v46, %v1207_v45  ;;  %v1090_v63 = vld [vmem:[#allocation2 + $0x3d8] sm:$0xff]  ;;  %v5164_v1 = vpack.c.bf16 %v1214_v55, %v1212_v54  ;;  %v1089_v9 = vld [vmem:[#allocation2 + $0x3d0] sm:$0xff]  ;;  %v46_v14 = vld [vmem:[%s7793_s2] sm:$0xff] }
  0x52   :  { %5123 = vmatpush1.bf16.msra.mxu1 %v5122_v57  ;;  %4516 = vmatprep.subr.msk.mxu0 %vm79_vm0, %v580_v58  ;;  %v1083_v57 = vld [vmem:[#allocation2 + $0x3a0] sm:$0xff]  ;;  %v1085_v58 = vld [vmem:[#allocation2 + $0x3b0] sm:$0xff]  ;;  %v1216_v2 = vld [vmem:[#allocation2 + $0x438] sm:$0xff] }
  0x53   :  { %4532 = vmatprep.subr.msk.mxu1 %vm79_vm0, %v708_v59  ;;  %v1211_v59 = vld [vmem:[#allocation2 + $0x410] sm:$0xff]  ;;  %v5154_v4 = vpack.c.bf16 %v1085_v58, %v1083_v57  ;;  %v1092_v16 = vld [vmem:[#allocation2 + $0x3e8] sm:$0x3]  ;;  %v1220_v17 = vld [vmem:[#allocation2 + $0x458] sm:$0x3]  ;;  %50 = vperm.xlu0 %5368, %v46_v14  }
  0x54   :  { %v5166_v5 = vpack.c.bf16 %v1213_v61, %v1211_v59  ;;  %v1336_v18 = vld [vmem:[#allocation2 + $0x468] sm:$0xff]  ;;  %v1464_v20 = vld [vmem:[#allocation2 + $0x4d8] sm:$0xff]  ;;  %v1335_v22 = vld [vmem:[#allocation2 + $0x460] sm:$0xff] }
  0x55   :  { %4517 = vmatpush1.msk.msra.mxu0 %vm79_vm0, %v579_v3  ;;  %v1218_v3 = vld [vmem:[#allocation2 + $0x448] sm:$0xff]  ;;  %v1091_v25 = vld [vmem:[#allocation2 + $0x3e0] sm:$0x3]  ;;  %v1341_v38 = vld [vmem:[#allocation2 + $0x490] sm:$0xff] }
  0x56   :  { %4533 = vmatpush1.msk.msra.mxu1 %vm79_vm0, %v707_v6  ;;  %4518 = vmatmul.mubr.msk.f32.vlgmr.msra.gmra.mrb[8].mxu0 %vm72_vm1, %v5480_v52  ;;  %v5156_v6 = vpack.c.bf16 %v1090_v63, %v1088_v62  ;;  %v5168_v10 = vpack.c.bf16 %v1218_v3, %v1216_v2  ;;  %v1466_v21 = vld [vmem:[#allocation2 + $0x4e8] sm:$0xff]  ;;  %v1467_v39 = vld [vmem:[#allocation2 + $0x4f0] sm:$0xff]  ;;  %v1469_v41 = vld [vmem:[#allocation2 + $0x500] sm:$0xff] }
  0x57   :  { %4534 = vmatmul.mubr.msk.f32.vlgmr.msra.gmra.mrb[8].mxu1 %vm72_vm1, %v5480_v52  ;;  %5125 = vmatprep.subr.bf16.mxu0 %v5124_v8  ;;  %v1087_v8 = vld [vmem:[#allocation2 + $0x3c0] sm:$0xff]  ;;  %v47_v24 = vld [vmem:[%s7793_s2 + $0x8] sm:$0xf]  ;;  %v5184_v32 = vpack.c.bf16 %v1466_v21, %v1464_v20  ;;  %v1346_v43 = vld [vmem:[#allocation2 + $0x4b8] sm:$0xff] }
  0x58   :  { %5137 = vmatprep.subr.bf16.mxu1 %v5136_v11  ;;  %5127 = vmatpush1.bf16.msra.mxu0 %v5126_v12  ;;  %v1215_v11 = vld [vmem:[#allocation2 + $0x430] sm:$0xff]  ;;  %v1217_v12 = vld [vmem:[#allocation2 + $0x440] sm:$0xff]  ;;  %v5158_v13 = vpack.c.bf16 %v1089_v9, %v1087_v8  ;;  %v1340_v30 = vld [vmem:[#allocation2 + $0x488] sm:$0xff] }
  0x59   :  { %5139 = vmatpush1.bf16.msra.mxu1 %v5138_v15  ;;  %657 = vmatprep.mubr.f32.mxu0 %v5425_v0  ;;  %v5170_v15 = vpack.c.bf16 %v1217_v12, %v1215_v11  ;;  %v1344_v42 = vld [vmem:[#allocation2 + $0x4a8] sm:$0xff]  ;;  %v1472_v45 = vld [vmem:[#allocation2 + $0x518] sm:$0xff]  ;;  %v1343_v50 = vld [vmem:[#allocation2 + $0x4a0] sm:$0xff] }
  0x5a   :  { %4519 = vmatmul.mubr.msk.f32.gmra.mrb[10].mxu0 %vm72_vm1, %v5488_v7  ;;  %5129 = vmatprep.subr.bf16.mxu0 %v5128_v19  ;;  %v1338_v19 = vld [vmem:[#allocation2 + $0x478] sm:$0xff]  ;;  %v1474_v46 = vld [vmem:[#allocation2 + $0x528] sm:$0xff]  ;;  %v5180_v49 = vpack.c.bf16 %v1346_v43, %v1344_v42  ;;  %v1471_v54 = vld [vmem:[#allocation2 + $0x510] sm:$0xff] }
  0x5b   :  { %5141 = vmatprep.subr.bf16.mxu1 %v5140_v23  ;;  %785 = vmatprep.mubr.f32.mxu1 %v5425_v0  ;;  %v1337_v23 = vld [vmem:[#allocation2 + $0x470] sm:$0xff]  ;;  %v5172_v29 = vpack.c.bf16 %v1338_v19, %v1336_v18  ;;  %v1473_v55 = vld [vmem:[#allocation2 + $0x520] sm:$0xff]  ;;  %v1348_v58 = vld [vmem:[#allocation2 + $0x4c8] sm:$0x3] }
  0x5c   :  { %5131 = vmatpush1.bf16.msra.mxu0 %v5130_v26  ;;  %4535 = vmatmul.mubr.msk.f32.gmra.mrb[10].mxu1 %vm72_vm1, %v5488_v7  ;;  %v1463_v26 = vld [vmem:[#allocation2 + $0x4d0] sm:$0xff]  ;;  %v5174_v33 = vpack.c.bf16 %v1337_v23, %v1335_v22  ;;  %v5194_v57 = vpack.c.bf16 %v1473_v55, %v1471_v54  ;;  %v1476_v59 = vld [vmem:[#allocation2 + $0x538] sm:$0x3]  ;;  %v1722_v63 = vld [vmem:[#allocation2 + $0x5c8] sm:$0xff] }
  0x5d   :  { %5143 = vmatpush1.bf16.msra.mxu1 %v5142_v27  ;;  %5133 = vmatprep.subr.bf16.mxu0 %v5132_v28  ;;  %v1465_v27 = vld [vmem:[#allocation2 + $0x4e0] sm:$0xff]  ;;  %v1219_v28 = vld [vmem:[#allocation2 + $0x450] sm:$0x3]  ;;  %v1594_v61 = vld [vmem:[#allocation2 + $0x558] sm:$0xff] }
  0x5e   :  { %5145 = vmatprep.subr.bf16.mxu1 %v5144_v31  ;;  %907 = vmatprep.mubr.f32.mxu0 %v5425_v0  ;;  %v1342_v31 = vld [vmem:[#allocation2 + $0x498] sm:$0xff]  ;;  %v1593_v2 = vld [vmem:[#allocation2 + $0x550] sm:$0xff]  ;;  %v1347_v3 = vld [vmem:[#allocation2 + $0x4c0] sm:$0x3] }
  0x5f   :  { %1035 = vmatprep.mubr.f32.mxu1 %v5425_v0  ;;  %55 = vperm.xlu0 %5368, %v47_v24   ;;  %v5176_v40 = vpack.c.bf16 %v1342_v31, %v1340_v30  ;;  %v1720_v62 = vld [vmem:[#allocation2 + $0x5b8] sm:$0xff]  ;;  %v1596_v9 = vld [vmem:[#allocation2 + $0x568] sm:$0xff]  ;;  %v1723_v18 = vld [vmem:[#allocation2 + $0x5d0] sm:$0xff] }
  0x60   :  { %5135 = vmatpush1.bf16.msra.mxu0 %v5134_v34  ;;  %v1468_v34 = vld [vmem:[#allocation2 + $0x4f8] sm:$0xff]  ;;  %v1726_v14 = vld [vmem:[#allocation2 + $0x5e8] sm:$0xff]  ;;  %v1725_v19 = vld [vmem:[#allocation2 + $0x5e0] sm:$0xff] }
  0x61   :  { %5147 = vmatpush1.bf16.msra.mxu1 %v5146_v35  ;;  %4548 = vmatprep.subr.msk.mxu0 %vm79_vm0, %v836_v36  ;;  %v1470_v35 = vld [vmem:[#allocation2 + $0x508] sm:$0xff]  ;;  %v5186_v36 = vpack.c.bf16 %v1465_v27, %v1463_v26  ;;  %v1598_v12 = vld [vmem:[#allocation2 + $0x578] sm:$0xff]  ;;  %v5214_v27 = vpack.c.bf16 %v1725_v19, %v1723_v18  ;;  %v1601_v30 = vld [vmem:[#allocation2 + $0x590] sm:$0xff] }
  0x62   :  { %4564 = vmatprep.subr.msk.mxu1 %vm79_vm0, %v964_v37  ;;  %v1339_v37 = vld [vmem:[#allocation2 + $0x480] sm:$0xff]  ;;  %v1600_v20 = vld [vmem:[#allocation2 + $0x588] sm:$0xff]  ;;  %v1602_v21 = vld [vmem:[#allocation2 + $0x598] sm:$0xff]  ;;  %v5200_v22 = vpack.c.bf16 %v1598_v12, %v1596_v9 }
  0x63   :  { %v1728_v23 = vld [vmem:[#allocation2 + $0x5f8] sm:$0xff]  ;;  %v1730_v24 = vld [vmem:[#allocation2 + $0x608] sm:$0xff]  ;;  %v1847_v42 = vld [vmem:[#allocation2 + $0x620] sm:$0xff] }
  0x64   :  { %4549 = vmatpush1.msk.msra.mxu0 %vm79_vm0, %v835_v44  ;;  %v5188_v44 = vpack.c.bf16 %v1470_v35, %v1468_v34  ;;  %v5216_v31 = vpack.c.bf16 %v1730_v24, %v1728_v23  ;;  %v1849_v43 = vld [vmem:[#allocation2 + $0x630] sm:$0xff]  ;;  %v1980_v54 = vld [vmem:[#allocation2 + $0x6b8] sm:$0xff]  ;;  %v1982_v55 = vld [vmem:[#allocation2 + $0x6c8] sm:$0xff] }
  0x65   :  { %4565 = vmatpush1.msk.msra.mxu1 %vm79_vm0, %v963_v47  ;;  %4550 = vmatmul.mubr.msk.f32.vlgmr.msra.gmra.mrb[12].mxu0 %vm72_vm1, %v5480_v52  ;;  %v5178_v47 = vpack.c.bf16 %v1341_v38, %v1339_v37  ;;  %v1732_v37 = vld [vmem:[#allocation2 + $0x618] sm:$0x3]  ;;  %v1848_v38 = vld [vmem:[#allocation2 + $0x628] sm:$0xff]  ;;  %v1857_v9 = vld [vmem:[#allocation2 + $0x670] sm:$0xff] }
  0x66   :  { %4566 = vmatmul.mubr.msk.f32.vlgmr.msra.gmra.mrb[12].mxu1 %vm72_vm1, %v5480_v52  ;;  %5149 = vmatprep.subr.bf16.mxu0 %v5148_v48  ;;  %v5190_v48 = vpack.c.bf16 %v1469_v41, %v1467_v39  ;;  %v1850_v39 = vld [vmem:[#allocation2 + $0x638] sm:$0xff]  ;;  %v1978_v41 = vld [vmem:[#allocation2 + $0x6a8] sm:$0xff]  ;;  %v1985_v12 = vld [vmem:[#allocation2 + $0x6e0] sm:$0xff] }
  0x67   :  { %5161 = vmatprep.subr.bf16.mxu1 %v5160_v51  ;;  %5151 = vmatpush1.bf16.msra.mxu0 %v5150_v53  ;;  %v1345_v51 = vld [vmem:[#allocation2 + $0x4b0] sm:$0xff]  ;;  %v5192_v53 = vpack.c.bf16 %v1474_v46, %v1472_v45  ;;  %v1977_v46 = vld [vmem:[#allocation2 + $0x6a0] sm:$0xff]  ;;  %v2106_v18 = vld [vmem:[#allocation2 + $0x718] sm:$0xff] }
  0x68   :  { %5163 = vmatpush1.bf16.msra.mxu1 %v5162_v56  ;;  %913 = vmatprep.mubr.f32.mxu0 %v5425_v0  ;;  %v5182_v56 = vpack.c.bf16 %v1345_v51, %v1343_v50  ;;  %v1975_v45 = vld [vmem:[#allocation2 + $0x690] sm:$0xff]  ;;  %v5222_v51 = vpack.c.bf16 %v1849_v43, %v1847_v42  ;;  %v2232_v19 = vld [vmem:[#allocation2 + $0x778] sm:$0xff]  ;;  %v1859_v23 = vld [vmem:[#allocation2 + $0x680] sm:$0x3] }
  0x69   :  { %4551 = vmatmul.mubr.msk.f32.gmra.mrb[14].mxu0 %vm72_vm1, %v5488_v7  ;;  %5153 = vmatprep.subr.bf16.mxu0 %v5152_v60  ;;  %v1592_v60 = vld [vmem:[#allocation2 + $0x548] sm:$0xff]  ;;  %v2231_v24 = vld [vmem:[#allocation2 + $0x770] sm:$0xff]  ;;  %v2240_v42 = vld [vmem:[#allocation2 + $0x7b8] sm:$0xff] }
  0x6a   :  { %5165 = vmatprep.subr.bf16.mxu1 %v5164_v1  ;;  %1041 = vmatprep.mubr.f32.mxu1 %v5425_v0  ;;  %v1591_v1 = vld [vmem:[#allocation2 + $0x540] sm:$0xff]  ;;  %v5196_v8 = vpack.c.bf16 %v1594_v61, %v1592_v60  ;;  %v1856_v61 = vld [vmem:[#allocation2 + $0x668] sm:$0xff] }
  0x6b   :  { %5155 = vmatpush1.bf16.msra.mxu0 %v5154_v4  ;;  %4567 = vmatmul.mubr.msk.f32.gmra.mrb[14].mxu1 %vm72_vm1, %v5488_v7  ;;  %v1719_v4 = vld [vmem:[#allocation2 + $0x5b0] sm:$0xff]  ;;  %v5198_v11 = vpack.c.bf16 %v1593_v2, %v1591_v1  ;;  %v1981_v60 = vld [vmem:[#allocation2 + $0x6c0] sm:$0xff]  ;;  %v1984_v1 = vld [vmem:[#allocation2 + $0x6d8] sm:$0xff] }
  0x6c   :  { %5167 = vmatpush1.bf16.msra.mxu1 %v5166_v5  ;;  %5157 = vmatprep.subr.bf16.mxu0 %v5156_v6  ;;  %v1721_v5 = vld [vmem:[#allocation2 + $0x5c0] sm:$0xff]  ;;  %v1475_v6 = vld [vmem:[#allocation2 + $0x530] sm:$0x3]  ;;  %v1986_v2 = vld [vmem:[#allocation2 + $0x6e8] sm:$0xff] }
  0x6d   :  { %5169 = vmatprep.subr.bf16.mxu1 %v5168_v10  ;;  %1163 = vmatprep.mubr.f32.mxu0 %v5425_v0  ;;  %v5208_v10 = vpack.c.bf16 %v1722_v63, %v1720_v62  ;;  %v1858_v62 = vld [vmem:[#allocation2 + $0x678] sm:$0xff]  ;;  %v2242_v43 = vld [vmem:[#allocation2 + $0x7c8] sm:$0xff] }
  0x6e   :  { %1291 = vmatprep.mubr.f32.mxu1 %v5425_v0 }
  0x6f   :  { %5159 = vmatpush1.bf16.msra.mxu0 %v5158_v13  ;;  %v1724_v13 = vld [vmem:[#allocation2 + $0x5d8] sm:$0xff] }
  0x70   :  { %5171 = vmatpush1.bf16.msra.mxu1 %v5170_v15  ;;  %4580 = vmatprep.subr.msk.mxu0 %vm79_vm0, %v1092_v16  ;;  %v5210_v15 = vpack.c.bf16 %v1721_v5, %v1719_v4  ;;  %v1595_v16 = vld [vmem:[#allocation2 + $0x560] sm:$0xff] }
  0x71   :  { %4596 = vmatprep.subr.msk.mxu1 %vm79_vm0, %v1220_v17  ;;  %v1597_v17 = vld [vmem:[#allocation2 + $0x570] sm:$0xff] }
  0x72   :  { %v5202_v26 = vpack.c.bf16 %v1597_v17, %v1595_v16  ;;  %v1988_v16 = vld [vmem:[#allocation2 + $0x6f8] sm:$0x3]  ;;  %v2104_v17 = vld [vmem:[#allocation2 + $0x708] sm:$0xff] }
  0x73   :  { %4581 = vmatpush1.msk.msra.mxu0 %vm79_vm0, %v1091_v25  ;;  %v5212_v25 = vpack.c.bf16 %v1726_v14, %v1724_v13 }
  0x74   :  { %4597 = vmatpush1.msk.msra.mxu1 %vm79_vm0, %v1219_v28  ;;  %4582 = vmatmul.mubr.msk.f32.vlgmr.msra.gmra.mrb[16].mxu0 %vm72_vm1, %v5480_v52  ;;  %v5204_v28 = vpack.c.bf16 %v1602_v21, %v1600_v20  ;;  %v2234_v20 = vld [vmem:[#allocation2 + $0x788] sm:$0xff]  ;;  %v2103_v21 = vld [vmem:[#allocation2 + $0x700] sm:$0xff] }
  0x75   :  { %4598 = vmatmul.mubr.msk.f32.vlgmr.msra.gmra.mrb[16].mxu1 %vm72_vm1, %v5480_v52  ;;  %5173 = vmatprep.subr.bf16.mxu0 %v5172_v29  ;;  %v1599_v29 = vld [vmem:[#allocation2 + $0x580] sm:$0xff] }
  0x76   :  { %5185 = vmatprep.subr.bf16.mxu1 %v5184_v32  ;;  %5175 = vmatpush1.bf16.msra.mxu0 %v5174_v33  ;;  %v1727_v32 = vld [vmem:[#allocation2 + $0x5f0] sm:$0xff]  ;;  %v1729_v33 = vld [vmem:[#allocation2 + $0x600] sm:$0xff]  ;;  %v5206_v34 = vpack.c.bf16 %v1601_v30, %v1599_v29  ;;  %v5256_v29 = vpack.c.bf16 %v2234_v20, %v2232_v19  ;;  %v2496_v20 = vld [vmem:[#allocation2 + $0x898] sm:$0xff] }
  0x77   :  { %5187 = vmatpush1.bf16.msra.mxu1 %v5186_v36  ;;  %1169 = vmatprep.mubr.f32.mxu0 %v5425_v0  ;;  %v5218_v35 = vpack.c.bf16 %v1729_v33, %v1727_v32  ;;  %v1604_v36 = vld [vmem:[#allocation2 + $0x5a8] sm:$0x3]  ;;  %v2236_v32 = vld [vmem:[#allocation2 + $0x798] sm:$0xff] }
  0x78   :  { %4583 = vmatmul.mubr.msk.f32.gmra.mrb[18].mxu0 %vm72_vm1, %v5488_v7  ;;  %5177 = vmatprep.subr.bf16.mxu0 %v5176_v40  ;;  %v1976_v40 = vld [vmem:[#allocation2 + $0x698] sm:$0xff]  ;;  %v2238_v33 = vld [vmem:[#allocation2 + $0x7a8] sm:$0xff] }
  0x79   :  { %5189 = vmatprep.subr.bf16.mxu1 %v5188_v44  ;;  %1297 = vmatprep.mubr.f32.mxu1 %v5425_v0  ;;  %v1603_v44 = vld [vmem:[#allocation2 + $0x5a0] sm:$0x3]  ;;  %v5232_v50 = vpack.c.bf16 %v1978_v41, %v1976_v40  ;;  %v2114_v40 = vld [vmem:[#allocation2 + $0x758] sm:$0xff] }
  0x7a   :  { %5179 = vmatpush1.bf16.msra.mxu0 %v5178_v47  ;;  %4599 = vmatmul.mubr.msk.f32.gmra.mrb[18].mxu1 %vm72_vm1, %v5488_v7  ;;  %v1731_v47 = vld [vmem:[#allocation2 + $0x610] sm:$0x3] }
  0x7b   :  { %5191 = vmatpush1.bf16.msra.mxu1 %v5190_v48  ;;  %5181 = vmatprep.subr.bf16.mxu0 %v5180_v49  ;;  %v5220_v48 = vpack.c.bf16 %v1850_v39, %v1848_v38  ;;  %v1852_v49 = vld [vmem:[#allocation2 + $0x648] sm:$0xff]  ;;  %v2237_v38 = vld [vmem:[#allocation2 + $0x7a0] sm:$0xff] }
  0x7c   :  { %5193 = vmatprep.subr.bf16.mxu1 %v5192_v53  ;;  %1419 = vmatprep.mubr.f32.mxu0 %v5425_v0  ;;  %v1854_v53 = vld [vmem:[#allocation2 + $0x658] sm:$0xff]  ;;  %v2112_v39 = vld [vmem:[#allocation2 + $0x748] sm:$0xff] }
  0x7d   :  { %1547 = vmatprep.mubr.f32.mxu1 %v5425_v0  ;;  %v5224_v63 = vpack.c.bf16 %v1854_v53, %v1852_v49  ;;  %v2113_v49 = vld [vmem:[#allocation2 + $0x750] sm:$0xff] }
  0x7e   :  { %5183 = vmatpush1.bf16.msra.mxu0 %v5182_v56  ;;  %v5234_v56 = vpack.c.bf16 %v1977_v46, %v1975_v45 }
  0x7f   :  { %5195 = vmatpush1.bf16.msra.mxu1 %v5194_v57  ;;  %4612 = vmatprep.subr.msk.mxu0 %vm79_vm0, %v1348_v58  ;;  %v1851_v57 = vld [vmem:[#allocation2 + $0x640] sm:$0xff]  ;;  %v1853_v58 = vld [vmem:[#allocation2 + $0x650] sm:$0xff] }
  0x80   :  { %4628 = vmatprep.subr.msk.mxu1 %vm79_vm0, %v1476_v59  ;;  %v1979_v59 = vld [vmem:[#allocation2 + $0x6b0] sm:$0xff]  ;;  %v5226_v4 = vpack.c.bf16 %v1853_v58, %v1851_v57  ;;  %v2360_v57 = vld [vmem:[#allocation2 + $0x7e8] sm:$0xff]  ;;  %v2362_v58 = vld [vmem:[#allocation2 + $0x7f8] sm:$0xff] }
  0x81   :  { %v5238_v5 = vpack.c.bf16 %v1981_v60, %v1979_v59  ;;  %v2488_v59 = vld [vmem:[#allocation2 + $0x858] sm:$0xff]  ;;  %v2490_v60 = vld [vmem:[#allocation2 + $0x868] sm:$0xff] }
  0x82   :  { %4613 = vmatpush1.msk.msra.mxu0 %vm79_vm0, %v1347_v3  ;;  %v5236_v3 = vpack.c.bf16 %v1982_v55, %v1980_v54  ;;  %v2116_v55 = vld [vmem:[#allocation2 + $0x768] sm:$0x3] }
  0x83   :  { %4629 = vmatpush1.msk.msra.mxu1 %vm79_vm0, %v1475_v6  ;;  %4614 = vmatmul.mubr.msk.f32.vlgmr.msra.gmra.mrb[20].mxu0 %vm72_vm1, %v5480_v52  ;;  %v5228_v6 = vpack.c.bf16 %v1858_v62, %v1856_v61  ;;  %v2361_v61 = vld [vmem:[#allocation2 + $0x7f0] sm:$0xff]  ;;  %v2115_v62 = vld [vmem:[#allocation2 + $0x760] sm:$0x3] }
  0x84   :  { %4630 = vmatmul.mubr.msk.f32.vlgmr.msra.gmra.mrb[20].mxu1 %vm72_vm1, %v5480_v52  ;;  %5197 = vmatprep.subr.bf16.mxu0 %v5196_v8  ;;  %v1855_v8 = vld [vmem:[#allocation2 + $0x660] sm:$0xff] }
  0x85   :  { %5209 = vmatprep.subr.bf16.mxu1 %v5208_v10  ;;  %5199 = vmatpush1.bf16.msra.mxu0 %v5198_v11  ;;  %v5240_v10 = vpack.c.bf16 %v1986_v2, %v1984_v1  ;;  %v1983_v11 = vld [vmem:[#allocation2 + $0x6d0] sm:$0xff]  ;;  %v5230_v13 = vpack.c.bf16 %v1857_v9, %v1855_v8  ;;  %v2489_v1 = vld [vmem:[#allocation2 + $0x860] sm:$0xff]  ;;  %v2366_v8 = vld [vmem:[#allocation2 + $0x818] sm:$0xff] }
  0x86   :  { %5211 = vmatpush1.bf16.msra.mxu1 %v5210_v15  ;;  %1425 = vmatprep.mubr.f32.mxu0 %v5425_v0  ;;  %v5242_v14 = vpack.c.bf16 %v1985_v12, %v1983_v11  ;;  %v1860_v15 = vld [vmem:[#allocation2 + $0x688] sm:$0x3]  ;;  %v2243_v2 = vld [vmem:[#allocation2 + $0x7d0] sm:$0x3]  ;;  %v2492_v9 = vld [vmem:[#allocation2 + $0x878] sm:$0xff] }
  0x87   :  { %1553 = vmatprep.mubr.f32.mxu1 %v5425_v0  ;;  %4615 = vmatmul.mubr.msk.f32.gmra.mrb[22].mxu0 %vm72_vm1, %v5488_v7  ;;  %v2363_v12 = vld [vmem:[#allocation2 + $0x800] sm:$0xff] }
  0x88   :  { %4631 = vmatmul.mubr.msk.f32.gmra.mrb[22].mxu1 %vm72_vm1, %v5488_v7  ;;  %5201 = vmatprep.subr.bf16.mxu0 %v5200_v22  ;;  %v2105_v22 = vld [vmem:[#allocation2 + $0x710] sm:$0xff] }
  0x89   :  { %5213 = vmatprep.subr.bf16.mxu1 %v5212_v25  ;;  %5203 = vmatpush1.bf16.msra.mxu0 %v5202_v26  ;;  %v2233_v25 = vld [vmem:[#allocation2 + $0x780] sm:$0xff]  ;;  %v1987_v26 = vld [vmem:[#allocation2 + $0x6f0] sm:$0x3]  ;;  %v5246_v30 = vpack.c.bf16 %v2105_v22, %v2103_v21  ;;  %v2498_v21 = vld [vmem:[#allocation2 + $0x8a8] sm:$0xff] }
  0x8a   :  { %5215 = vmatpush1.bf16.msra.mxu1 %v5214_v27  ;;  %5205 = vmatprep.subr.bf16.mxu0 %v5204_v28  ;;  %v5244_v27 = vpack.c.bf16 %v2106_v18, %v2104_v17  ;;  %v2108_v28 = vld [vmem:[#allocation2 + $0x728] sm:$0xff]  ;;  %v2370_v18 = vld [vmem:[#allocation2 + $0x838] sm:$0xff] }
  0x8b   :  { %5217 = vmatprep.subr.bf16.mxu1 %v5216_v31  ;;  %1675 = vmatprep.mubr.f32.mxu0 %v5425_v0  ;;  %v2110_v31 = vld [vmem:[#allocation2 + $0x738] sm:$0xff]  ;;  %v2368_v17 = vld [vmem:[#allocation2 + $0x828] sm:$0xff] }
  0x8c   :  { %1803 = vmatprep.mubr.f32.mxu1 %v5425_v0  ;;  %v5248_v41 = vpack.c.bf16 %v2110_v31, %v2108_v28  ;;  %v5628_v28 = vld [vmem:[#allocation4 + $0x8] sm:$0xf]  ;;  %v2497_v31 = vld [vmem:[#allocation2 + $0x8a0] sm:$0xff] }
  0x8d   :  { %5207 = vmatpush1.bf16.msra.mxu0 %v5206_v34  ;;  %v5258_v34 = vpack.c.bf16 %v2233_v25, %v2231_v24  ;;  %v5276_v25 = vpack.c.bf16 %v2370_v18, %v2368_v17  ;;  %v3002_v17 = vld [vmem:[#allocation2 + $0xa28] sm:$0xff]  ;;  %v2871_v18 = vld [vmem:[#allocation2 + $0x9a0] sm:$0xff] }
  0x8e   :  { %5219 = vmatpush1.bf16.msra.mxu1 %v5218_v35  ;;  %4644 = vmatprep.subr.msk.mxu0 %vm79_vm0, %v1604_v36  ;;  %v2107_v35 = vld [vmem:[#allocation2 + $0x720] sm:$0xff]  ;;  %v2109_v36 = vld [vmem:[#allocation2 + $0x730] sm:$0xff] }
  0x8f   :  { %4660 = vmatprep.subr.msk.mxu1 %vm79_vm0, %v1732_v37  ;;  %v2235_v37 = vld [vmem:[#allocation2 + $0x790] sm:$0xff]  ;;  %v5250_v45 = vpack.c.bf16 %v2109_v36, %v2107_v35  ;;  %v2500_v35 = vld [vmem:[#allocation2 + $0x8b8] sm:$0x3]  ;;  %v2616_v36 = vld [vmem:[#allocation2 + $0x8c8] sm:$0xff] }
  0x90   :  { %v5262_v46 = vpack.c.bf16 %v2237_v38, %v2235_v37  ;;  %v2618_v37 = vld [vmem:[#allocation2 + $0x8d8] sm:$0xff] }
  0x91   :  { %4645 = vmatpush1.msk.msra.mxu0 %vm79_vm0, %v1603_v44  ;;  %v5260_v44 = vpack.c.bf16 %v2238_v33, %v2236_v32  ;;  %v2744_v38 = vld [vmem:[#allocation2 + $0x938] sm:$0xff] }
  0x92   :  { %4661 = vmatpush1.msk.msra.mxu1 %vm79_vm0, %v1731_v47  ;;  %4646 = vmatmul.mubr.msk.f32.vlgmr.msra.gmra.mrb[24].mxu0 %vm72_vm1, %v5480_v52  ;;  %v5252_v47 = vpack.c.bf16 %v2114_v40, %v2112_v39  ;;  %v2746_v39 = vld [vmem:[#allocation2 + $0x948] sm:$0xff]  ;;  %v2615_v40 = vld [vmem:[#allocation2 + $0x8c0] sm:$0xff] }
  0x93   :  { %4662 = vmatmul.mubr.msk.f32.vlgmr.msra.gmra.mrb[24].mxu1 %vm72_vm1, %v5480_v52  ;;  %5221 = vmatprep.subr.bf16.mxu0 %v5220_v48  ;;  %v2111_v48 = vld [vmem:[#allocation2 + $0x740] sm:$0xff] }
  0x94   :  { %5233 = vmatprep.subr.bf16.mxu1 %v5232_v50  ;;  %5223 = vmatpush1.bf16.msra.mxu0 %v5222_v51  ;;  %v2239_v50 = vld [vmem:[#allocation2 + $0x7b0] sm:$0xff]  ;;  %v2241_v51 = vld [vmem:[#allocation2 + $0x7c0] sm:$0xff]  ;;  %v5254_v53 = vpack.c.bf16 %v2113_v49, %v2111_v48  ;;  %v5304_v48 = vpack.c.bf16 %v2746_v39, %v2744_v38  ;;  %v2882_v38 = vld [vmem:[#allocation2 + $0x9f8] sm:$0xff] }
  0x95   :  { %5235 = vmatpush1.bf16.msra.mxu1 %v5234_v56  ;;  %1681 = vmatprep.mubr.f32.mxu0 %v5425_v0  ;;  %v5266_v54 = vpack.c.bf16 %v2241_v51, %v2239_v50  ;;  %v2244_v56 = vld [vmem:[#allocation2 + $0x7d8] sm:$0x3]  ;;  %v2750_v51 = vld [vmem:[#allocation2 + $0x968] sm:$0xff] }
  0x96   :  { %1809 = vmatprep.mubr.f32.mxu1 %v5425_v0  ;;  %4647 = vmatmul.mubr.msk.f32.gmra.mrb[26].mxu0 %vm72_vm1, %v5488_v7  ;;  %v2748_v50 = vld [vmem:[#allocation2 + $0x958] sm:$0xff] }
  0x97   :  { %4663 = vmatmul.mubr.msk.f32.gmra.mrb[26].mxu1 %vm72_vm1, %v5488_v7  ;;  %5225 = vmatprep.subr.bf16.mxu0 %v5224_v63  ;;  %v2487_v63 = vld [vmem:[#allocation2 + $0x850] sm:$0xff] }
  0x98   :  { %5237 = vmatprep.subr.bf16.mxu1 %v5236_v3  ;;  %5227 = vmatpush1.bf16.msra.mxu0 %v5226_v4  ;;  %v5268_v3 = vpack.c.bf16 %v2362_v58, %v2360_v57  ;;  %v2364_v4 = vld [vmem:[#allocation2 + $0x808] sm:$0xff]  ;;  %v5282_v11 = vpack.c.bf16 %v2489_v1, %v2487_v63  ;;  %v2749_v57 = vld [vmem:[#allocation2 + $0x960] sm:$0xff] }
  0x99   :  { %5239 = vmatpush1.bf16.msra.mxu1 %v5238_v5  ;;  %5229 = vmatprep.subr.bf16.mxu0 %v5228_v6  ;;  %v5280_v5 = vpack.c.bf16 %v2490_v60, %v2488_v59  ;;  %v5272_v19 = vpack.c.bf16 %v2366_v8, %v2364_v4  ;;  %v2624_v58 = vld [vmem:[#allocation2 + $0x908] sm:$0xff]  ;;  %v2626_v59 = vld [vmem:[#allocation2 + $0x918] sm:$0xff]  ;;  %v2625_v4 = vld [vmem:[#allocation2 + $0x910] sm:$0xff] }
  0x9a   :  { %5241 = vmatprep.subr.bf16.mxu1 %v5240_v10  ;;  %1931 = vmatprep.mubr.f32.mxu0 %v5425_v0  ;;  %v2494_v10 = vld [vmem:[#allocation2 + $0x888] sm:$0xff]  ;;  %v2753_v8 = vld [vmem:[#allocation2 + $0x980] sm:$0xff] }
  0x9b   :  { %2059 = vmatprep.mubr.f32.mxu1 %v5425_v0  ;;  %v5284_v22 = vpack.c.bf16 %v2494_v10, %v2492_v9 }
  0x9c   :  { %5231 = vmatpush1.bf16.msra.mxu0 %v5230_v13  ;;  %v2365_v13 = vld [vmem:[#allocation2 + $0x810] sm:$0xff] }
  0x9d   :  { %5243 = vmatpush1.bf16.msra.mxu1 %v5242_v14  ;;  %4676 = vmatprep.subr.msk.mxu0 %vm79_vm0, %v1860_v15  ;;  %v2491_v14 = vld [vmem:[#allocation2 + $0x870] sm:$0xff] }
  0x9e   :  { %4692 = vmatprep.subr.msk.mxu1 %vm79_vm0, %v1988_v16  ;;  %v5620_v15 = vld [vmem:[#allocation4] sm:$0xff]  ;;  %v2493_v16 = vld [vmem:[#allocation2 + $0x880] sm:$0xff] }
  0x9f   :  { %v5286_v24 = vpack.c.bf16 %v2493_v16, %v2491_v14  ;;  %v2874_v14 = vld [vmem:[#allocation2 + $0x9b8] sm:$0xff] }
  0xa0   :  { %4677 = vmatpush1.msk.msra.mxu0 %vm79_vm0, %v1859_v23  ;;  %v5274_v23 = vpack.c.bf16 %v2365_v13, %v2363_v12  ;;  %v2756_v12 = vld [vmem:[#allocation2 + $0x998] sm:$0x3]  ;;  %v2872_v13 = vld [vmem:[#allocation2 + $0x9a8] sm:$0xff] }
  0xa1   :  { %4693 = vmatpush1.msk.msra.mxu1 %vm79_vm0, %v1987_v26  ;;  %4678 = vmatmul.mubr.msk.f32.vlgmr.msra.gmra.mrb[28].mxu0 %vm72_vm1, %v5480_v52  ;;  %v2367_v26 = vld [vmem:[#allocation2 + $0x820] sm:$0xff]  ;;  %v3000_v16 = vld [vmem:[#allocation2 + $0xa18] sm:$0xff] }
  0xa2   :  { %4694 = vmatmul.mubr.msk.f32.vlgmr.msra.gmra.mrb[28].mxu1 %vm72_vm1, %v5480_v52  ;;  %5245 = vmatprep.subr.bf16.mxu0 %v5244_v27  ;;  %v5264_v52 = vpack.c.bf16 %v2242_v43, %v2240_v42  ;;  %v2369_v27 = vld [vmem:[#allocation2 + $0x830] sm:$0xff]  ;;  %v2371_v42 = vld [vmem:[#allocation2 + $0x840] sm:$0x3] }
  0xa3   :  { %5257 = vmatprep.subr.bf16.mxu1 %v5256_v29  ;;  %5247 = vmatpush1.bf16.msra.mxu0 %v5246_v30  ;;  %v5288_v29 = vpack.c.bf16 %v2498_v21, %v2496_v20  ;;  %v2495_v30 = vld [vmem:[#allocation2 + $0x890] sm:$0xff]  ;;  %v5278_v32 = vpack.c.bf16 %v2369_v27, %v2367_v26  ;;  %v2627_v20 = vld [vmem:[#allocation2 + $0x920] sm:$0x3]  ;;  %v5328_v26 = vpack.c.bf16 %v3002_v17, %v3000_v16 }
  0xa4   :  { %5259 = vmatpush1.bf16.msra.mxu1 %v5258_v34  ;;  %1937 = vmatprep.mubr.f32.mxu0 %v5425_v0  ;;  %v5290_v33 = vpack.c.bf16 %v2497_v31, %v2495_v30  ;;  %v2372_v34 = vld [vmem:[#allocation2 + $0x848] sm:$0x3]  ;;  %v2743_v43 = vld [vmem:[#allocation2 + $0x930] sm:$0xff]  ;;  %v3004_v30 = vld [vmem:[#allocation2 + $0xa38] sm:$0xff] }
  0xa5   :  { %2065 = vmatprep.mubr.f32.mxu1 %v5425_v0  ;;  %4679 = vmatmul.mubr.msk.f32.gmra.mrb[30].mxu0 %vm72_vm1, %v5488_v7  ;;  %v2999_v21 = vld [vmem:[#allocation2 + $0xa10] sm:$0xff]  ;;  %v3006_v31 = vld [vmem:[#allocation2 + $0xa48] sm:$0xff] }
  0xa6   :  { %4695 = vmatmul.mubr.msk.f32.gmra.mrb[30].mxu1 %vm72_vm1, %v5488_v7  ;;  %5249 = vmatprep.subr.bf16.mxu0 %v5248_v41  ;;  %v2359_v7 = vld [vmem:[#allocation2 + $0x7e0] sm:$0xff]  ;;  %v2617_v41 = vld [vmem:[#allocation2 + $0x8d0] sm:$0xff] }
  0xa7   :  { %5261 = vmatprep.subr.bf16.mxu1 %v5260_v44  ;;  %5251 = vmatpush1.bf16.msra.mxu0 %v5250_v45  ;;  %v5270_v6 = vpack.c.bf16 %v2361_v61, %v2359_v7  ;;  %v2745_v44 = vld [vmem:[#allocation2 + $0x940] sm:$0xff]  ;;  %v2499_v45 = vld [vmem:[#allocation2 + $0x8b0] sm:$0x3]  ;;  %v5294_v49 = vpack.c.bf16 %v2617_v41, %v2615_v40  ;;  %v2752_v7 = vld [vmem:[#allocation2 + $0x978] sm:$0xff] }
  0xa8   :  { %5263 = vmatpush1.bf16.msra.mxu1 %v5262_v46  ;;  %5253 = vmatprep.subr.bf16.mxu0 %v5252_v47  ;;  %v5292_v46 = vpack.c.bf16 %v2618_v37, %v2616_v36  ;;  %v2620_v47 = vld [vmem:[#allocation2 + $0x8e8] sm:$0xff]  ;;  %v3005_v36 = vld [vmem:[#allocation2 + $0xa40] sm:$0xff]  ;;  %v3008_v40 = vld [vmem:[#allocation2 + $0xa58] sm:$0xff] }
  0xa9   :  { %5265 = vmatprep.subr.bf16.mxu1 %v5264_v52  ;;  %2187 = vmatprep.mubr.f32.mxu0 %v5425_v0  ;;  %v2622_v52 = vld [vmem:[#allocation2 + $0x8f8] sm:$0xff]  ;;  %v2754_v61 = vld [vmem:[#allocation2 + $0x988] sm:$0xff] }
  0xaa   :  { %2315 = vmatprep.mubr.f32.mxu1 %v5425_v0  ;;  %v5296_v60 = vpack.c.bf16 %v2622_v52, %v2620_v47  ;;  %v2880_v37 = vld [vmem:[#allocation2 + $0x9e8] sm:$0xff]  ;;  %v2881_v47 = vld [vmem:[#allocation2 + $0x9f0] sm:$0xff]  ;;  %v3009_v52 = vld [vmem:[#allocation2 + $0xa60] sm:$0xff] }
  0xab   :  { %5255 = vmatpush1.bf16.msra.mxu0 %v5254_v53  ;;  %v5306_v53 = vpack.c.bf16 %v2745_v44, %v2743_v43  ;;  %v3010_v41 = vld [vmem:[#allocation2 + $0xa68] sm:$0xff] }
  0xac   :  { %5267 = vmatpush1.bf16.msra.mxu1 %v5266_v54  ;;  %4708 = vmatprep.subr.msk.mxu0 %vm79_vm0, %v2116_v55  ;;  %v2619_v54 = vld [vmem:[#allocation2 + $0x8e0] sm:$0xff]  ;;  %v2621_v55 = vld [vmem:[#allocation2 + $0x8f0] sm:$0xff] }
  0xad   :  { %4724 = vmatprep.subr.msk.mxu1 %vm79_vm0, %v2244_v56  ;;  %v2747_v56 = vld [vmem:[#allocation2 + $0x950] sm:$0xff]  ;;  %v5298_v63 = vpack.c.bf16 %v2621_v55, %v2619_v54  ;;  %v3012_v54 = vld [vmem:[#allocation2 + $0xa78] sm:$0x3]  ;;  %v3128_v55 = vld [vmem:[#allocation2 + $0xa88] sm:$0xff] }
  0xae   :  { %v5310_v1 = vpack.c.bf16 %v2749_v57, %v2747_v56  ;;  %v3130_v56 = vld [vmem:[#allocation2 + $0xa98] sm:$0xff]  ;;  %v3127_v57 = vld [vmem:[#allocation2 + $0xa80] sm:$0xff] }
  0xaf   :  { %4709 = vmatpush1.msk.msra.mxu0 %vm79_vm0, %v2115_v62  ;;  %v5308_v62 = vpack.c.bf16 %v2750_v51, %v2748_v50 }
  0xb0   :  { %4725 = vmatpush1.msk.msra.mxu1 %vm79_vm0, %v2243_v2  ;;  %4710 = vmatmul.mubr.msk.f32.vlgmr.msra.gmra.mrb[32].mxu0 %vm72_vm1, %v5620_v15  ;;  %v5300_v2 = vpack.c.bf16 %v2626_v59, %v2624_v58  ;;  %v3129_v58 = vld [vmem:[#allocation2 + $0xa90] sm:$0xff]  ;;  %v2883_v59 = vld [vmem:[#allocation2 + $0xa00] sm:$0x3] }
  0xb1   :  { %4726 = vmatmul.mubr.msk.f32.vlgmr.msra.gmra.mrb[32].mxu1 %vm72_vm1, %v5620_v15  ;;  %5269 = vmatprep.subr.bf16.mxu0 %v5268_v3  ;;  %v2623_v3 = vld [vmem:[#allocation2 + $0x900] sm:$0xff] }
  0xb2   :  { %5281 = vmatprep.subr.bf16.mxu1 %v5280_v5  ;;  %5271 = vmatpush1.bf16.msra.mxu0 %v5270_v6  ;;  %v5312_v5 = vpack.c.bf16 %v2754_v61, %v2752_v7  ;;  %v2751_v6 = vld [vmem:[#allocation2 + $0x970] sm:$0xff]  ;;  %v5302_v9 = vpack.c.bf16 %v2625_v4, %v2623_v3  ;;  %v5340_v7 = vpack.c.bf16 %v3130_v56, %v3128_v55  ;;  %v3136_v3 = vld [vmem:[#allocation2 + $0xac8] sm:$0xff]  ;;  %v3138_v4 = vld [vmem:[#allocation2 + $0xad8] sm:$0xff] }
  0xb3   :  { %5283 = vmatpush1.bf16.msra.mxu1 %v5282_v11  ;;  %2193 = vmatprep.mubr.f32.mxu0 %v5425_v0  ;;  %v5314_v10 = vpack.c.bf16 %v2753_v8, %v2751_v6  ;;  %v2628_v11 = vld [vmem:[#allocation2 + $0x928] sm:$0x3]  ;;  %v5342_v61 = vpack.c.bf16 %v3129_v58, %v3127_v57  ;;  %v5348_v8 = vpack.c.bf16 %v3138_v4, %v3136_v3 }
  0xb4   :  { %2321 = vmatprep.mubr.f32.mxu1 %v5425_v0  ;;  %4711 = vmatmul.mubr.msk.f32.gmra.mrb[34].mxu0 %vm72_vm1, %v5628_v28 }
  0xb5   :  { %4727 = vmatmul.mubr.msk.f32.gmra.mrb[34].mxu1 %vm72_vm1, %v5628_v28  ;;  %5273 = vmatprep.subr.bf16.mxu0 %v5272_v19  ;;  %v2873_v19 = vld [vmem:[#allocation2 + $0x9b0] sm:$0xff] }
  0xb6   :  { %5285 = vmatprep.subr.bf16.mxu1 %v5284_v22  ;;  %5275 = vmatpush1.bf16.msra.mxu0 %v5274_v23  ;;  %v3001_v22 = vld [vmem:[#allocation2 + $0xa20] sm:$0xff]  ;;  %v2755_v23 = vld [vmem:[#allocation2 + $0x990] sm:$0x3]  ;;  %v5318_v27 = vpack.c.bf16 %v2873_v19, %v2871_v18 }
  0xb7   :  { %5287 = vmatpush1.bf16.msra.mxu1 %v5286_v24  ;;  %5277 = vmatprep.subr.bf16.mxu0 %v5276_v25  ;;  %v5316_v24 = vpack.c.bf16 %v2874_v14, %v2872_v13  ;;  %v2876_v25 = vld [vmem:[#allocation2 + $0x9c8] sm:$0xff]  ;;  %v3139_v13 = vld [vmem:[#allocation2 + $0xae0] sm:$0x3] }
  0xb8   :  { %5289 = vmatprep.subr.bf16.mxu1 %v5288_v29  ;;  %2443 = vmatprep.mubr.f32.mxu0 %v5425_v0  ;;  %v2878_v29 = vld [vmem:[#allocation2 + $0x9d8] sm:$0xff] }
  0xb9   :  { %2571 = vmatprep.mubr.f32.mxu1 %v5425_v0  ;;  %v5320_v39 = vpack.c.bf16 %v2878_v29, %v2876_v25 }
  0xba   :  { %5279 = vmatpush1.bf16.msra.mxu0 %v5278_v32  ;;  %v5330_v32 = vpack.c.bf16 %v3001_v22, %v2999_v21 }
  0xbb   :  { %5291 = vmatpush1.bf16.msra.mxu1 %v5290_v33  ;;  %4740 = vmatprep.subr.msk.mxu0 %vm79_vm0, %v2372_v34  ;;  %v2875_v33 = vld [vmem:[#allocation2 + $0x9c0] sm:$0xff]  ;;  %v2877_v34 = vld [vmem:[#allocation2 + $0x9d0] sm:$0xff] }
  0xbc   :  { %4756 = vmatprep.subr.msk.mxu1 %vm79_vm0, %v2500_v35  ;;  %v3003_v35 = vld [vmem:[#allocation2 + $0xa30] sm:$0xff]  ;;  %v5322_v43 = vpack.c.bf16 %v2877_v34, %v2875_v33 }
  0xbd   :  { %v5334_v44 = vpack.c.bf16 %v3005_v36, %v3003_v35 }
  0xbe   :  { %4741 = vmatpush1.msk.msra.mxu0 %vm79_vm0, %v2371_v42  ;;  %v5332_v42 = vpack.c.bf16 %v3006_v31, %v3004_v30 }
  0xbf   :  { %4757 = vmatpush1.msk.msra.mxu1 %vm79_vm0, %v2499_v45  ;;  %4742 = vmatmul.mubr.msk.f32.vlgmr.msra.gmra.mrb[36].mxu0 %vm72_vm1, %v5620_v15  ;;  %v5324_v45 = vpack.c.bf16 %v2882_v38, %v2880_v37 }
  0xc0   :  { %4758 = vmatmul.mubr.msk.f32.vlgmr.msra.gmra.mrb[36].mxu1 %vm72_vm1, %v5620_v15  ;;  %5293 = vmatprep.subr.bf16.mxu0 %v5292_v46  ;;  %v2879_v46 = vld [vmem:[#allocation2 + $0x9e0] sm:$0xff] }
  0xc1   :  { %5305 = vmatprep.subr.bf16.mxu1 %v5304_v48  ;;  %5295 = vmatpush1.bf16.msra.mxu0 %v5294_v49  ;;  %v5336_v48 = vpack.c.bf16 %v3010_v41, %v3008_v40  ;;  %v3007_v49 = vld [vmem:[#allocation2 + $0xa50] sm:$0xff]  ;;  %v5326_v50 = vpack.c.bf16 %v2881_v47, %v2879_v46 }
  0xc2   :  { %5307 = vmatpush1.bf16.msra.mxu1 %v5306_v53  ;;  %2449 = vmatprep.mubr.f32.mxu0 %v5425_v0  ;;  %v5338_v51 = vpack.c.bf16 %v3009_v52, %v3007_v49  ;;  %v2884_v53 = vld [vmem:[#allocation2 + $0xa08] sm:$0x3] }
  0xc3   :  { %2577 = vmatprep.mubr.f32.mxu1 %v5425_v0  ;;  %4743 = vmatmul.mubr.msk.f32.gmra.mrb[38].mxu0 %vm72_vm1, %v5628_v28 }
  0xc4   :  { %4759 = vmatmul.mubr.msk.f32.gmra.mrb[38].mxu1 %vm72_vm1, %v5628_v28  ;;  %5297 = vmatprep.subr.bf16.mxu0 %v5296_v60  ;;  %v3011_v60 = vld [vmem:[#allocation2 + $0xa70] sm:$0x3] }
  0xc5   :  { %5309 = vmatprep.subr.bf16.mxu1 %v5308_v62  ;;  %5299 = vmatpush1.bf16.msra.mxu0 %v5298_v63  ;;  %v3132_v62 = vld [vmem:[#allocation2 + $0xaa8] sm:$0xff]  ;;  %v3134_v63 = vld [vmem:[#allocation2 + $0xab8] sm:$0xff] }
  0xc6   :  { %5311 = vmatpush1.bf16.msra.mxu1 %v5310_v1  ;;  %5301 = vmatprep.subr.bf16.mxu0 %v5300_v2  ;;  %v3131_v1 = vld [vmem:[#allocation2 + $0xaa0] sm:$0xff]  ;;  %v3133_v2 = vld [vmem:[#allocation2 + $0xab0] sm:$0xff] }
  0xc7   :  { %5313 = vmatprep.subr.bf16.mxu1 %v5312_v5  ;;  %2699 = vmatprep.mubr.f32.mxu0 %v5425_v0  ;;  %v5344_v5 = vpack.c.bf16 %v3134_v63, %v3132_v62  ;;  %v5346_v6 = vpack.c.bf16 %v3133_v2, %v3131_v1 }
  0xc8   :  { %2827 = vmatprep.mubr.f32.mxu1 %v5425_v0 }
  0xc9   :  { %5303 = vmatpush1.bf16.msra.mxu0 %v5302_v9  ;;  %v3135_v9 = vld [vmem:[#allocation2 + $0xac0] sm:$0xff] }
  0xca   :  { %5315 = vmatpush1.bf16.msra.mxu1 %v5314_v10  ;;  %4772 = vmatprep.subr.msk.mxu0 %vm79_vm0, %v2628_v11  ;;  %v3137_v10 = vld [vmem:[#allocation2 + $0xad0] sm:$0xff] }
  0xcb   :  { %4788 = vmatprep.subr.msk.mxu1 %vm79_vm0, %v2756_v12  ;;  %v5350_v11 = vpack.c.bf16 %v3137_v10, %v3135_v9  ;;  %v3140_v12 = vld [vmem:[#allocation2 + $0xae8] sm:$0x3] }
  0xcd   :  { %4773 = vmatpush1.msk.msra.mxu0 %vm79_vm0, %v2627_v20 }
  0xce   :  { %4789 = vmatpush1.msk.msra.mxu1 %vm79_vm0, %v2755_v23  ;;  %4774 = vmatmul.mubr.msk.f32.vlgmr.msra.gmra.mrb[40].mxu0 %vm72_vm1, %v5620_v15 }
  0xcf   :  { %4790 = vmatmul.mubr.msk.f32.vlgmr.msra.gmra.mrb[40].mxu1 %vm72_vm1, %v5620_v15  ;;  %5317 = vmatprep.subr.bf16.mxu0 %v5316_v24 }
  0xd0   :  { %5329 = vmatprep.subr.bf16.mxu1 %v5328_v26  ;;  %5319 = vmatpush1.bf16.msra.mxu0 %v5318_v27 }
  0xd1   :  { %5331 = vmatpush1.bf16.msra.mxu1 %v5330_v32  ;;  %2705 = vmatprep.mubr.f32.mxu0 %v5425_v0 }
  0xd2   :  { %2833 = vmatprep.mubr.f32.mxu1 %v5425_v0  ;;  %4775 = vmatmul.mubr.msk.f32.gmra.mrb[42].mxu0 %vm72_vm1, %v5628_v28  ;;  %v5692_v14 = vpop.permute.xlu0 %50 }
  0xd3   :  { %4791 = vmatmul.mubr.msk.f32.gmra.mrb[42].mxu1 %vm72_vm1, %v5628_v28  ;;  %5321 = vmatprep.subr.bf16.mxu0 %v5320_v39 }
  0xd4   :  { %5333 = vmatprep.subr.bf16.mxu1 %v5332_v42  ;;  %5323 = vmatpush1.bf16.msra.mxu0 %v5322_v43 }
  0xd5   :  { %5335 = vmatpush1.bf16.msra.mxu1 %v5334_v44  ;;  %5325 = vmatprep.subr.bf16.mxu0 %v5324_v45 }
  0xd6   :  { %5337 = vmatprep.subr.bf16.mxu1 %v5336_v48  ;;  %2955 = vmatprep.mubr.f32.mxu0 %v5425_v0 }
  0xd7   :  { %3083 = vmatprep.mubr.f32.mxu1 %v5425_v0 }
  0xd8   :  { %5327 = vmatpush1.bf16.msra.mxu0 %v5326_v50 }
  0xd9   :  { %5339 = vmatpush1.bf16.msra.mxu1 %v5338_v51  ;;  %4804 = vmatprep.subr.msk.mxu0 %vm79_vm0, %v2884_v53 }
  0xda   :  { %4820 = vmatprep.subr.msk.mxu1 %vm79_vm0, %v3012_v54 }
  0xdc   :  { %4805 = vmatpush1.msk.msra.mxu0 %vm79_vm0, %v2883_v59 }
  0xdd   :  { %4821 = vmatpush1.msk.msra.mxu1 %vm79_vm0, %v3011_v60  ;;  %4806 = vmatmul.mubr.msk.f32.vlgmr.msra.gmra.mrb[44].mxu0 %vm72_vm1, %v5620_v15 }
  0xde   :  { %4822 = vmatmul.mubr.msk.f32.vlgmr.msra.gmra.mrb[44].mxu1 %vm72_vm1, %v5620_v15  ;;  %5341 = vmatprep.subr.bf16.mxu0 %v5340_v7 }
  0xdf   :  { %5352 = vmatprep.subr.bf16.mxu1 %v5340_v7  ;;  %5343 = vmatpush1.bf16.msra.mxu0 %v5342_v61 }
  0xe0   :  { %5356 = vmatpush1.bf16.msra.mxu1 %v5342_v61  ;;  %2961 = vmatprep.mubr.f32.mxu0 %v5425_v0 }
  0xe1   :  { %3089 = vmatprep.mubr.f32.mxu1 %v5425_v0  ;;  %4807 = vmatmul.mubr.msk.f32.gmra.mrb[46].mxu0 %vm72_vm1, %v5628_v28 }
  0xe2   :  { %4823 = vmatmul.mubr.msk.f32.gmra.mrb[46].mxu1 %vm72_vm1, %v5628_v28  ;;  %5345 = vmatprep.subr.bf16.mxu0 %v5344_v5 }
  0xe3   :  { %5353 = vmatprep.subr.bf16.mxu1 %v5344_v5  ;;  %5347 = vmatpush1.bf16.msra.mxu0 %v5346_v6 }
  0xe4   :  { %5357 = vmatpush1.bf16.msra.mxu1 %v5346_v6  ;;  %5349 = vmatprep.subr.bf16.mxu0 %v5348_v8 }
  0xe5   :  { %5354 = vmatprep.subr.bf16.mxu1 %v5348_v8  ;;  %3211 = vmatprep.mubr.f32.mxu0 %v5425_v0 }
  0xe6   :  { %3217 = vmatprep.mubr.f32.mxu1 %v5425_v0 }
  0xe7   :  { %5351 = vmatpush1.bf16.msra.mxu0 %v5350_v11 }
  0xe8   :  { %5358 = vmatpush1.bf16.msra.mxu1 %v5350_v11  ;;  %4836 = vmatprep.subr.msk.mxu0 %vm79_vm0, %v3140_v12 }
  0xe9   :  { %5355 = vmatprep.subr.msk.mxu1 %vm79_vm0, %v3140_v12 }
  0xeb   :  { %4837 = vmatpush1.msk.msra.mxu0 %vm79_vm0, %v3139_v13 }
  0xec   :  { %5359 = vmatpush1.msk.msra.mxu1 %vm79_vm0, %v3139_v13  ;;  %4838 = vmatmul.mubr.msk.f32.vlgmr.msra.gmra.mrb[48].mxu0 %vm72_vm1, %v5620_v15  ;;  %v5698_v15 = vpop.permute.xlu0 %55 }
  0xed   :  { %4839 = vmatmul.mubr.msk.f32.vlgmr.msra.gmra.mrb[48].mxu1 %vm72_vm1, %v5628_v28 }
 0x10b   :  { %v152_v16 = vpop.f32.mrb[0].mxu0 }
 0x10c   :  { %v153_v17 = vadd.f32 %v152_v16, %v5692_v14  ;;  %v269_v18 = vpop.f32.mrb[0].mxu1  ;;  %v154_v19 = vpop.f32.mrb[1].mxu0 }
 0x10d   :  { %v270_v20 = vadd.f32 %v269_v18, %v5692_v14  ;;  %v155_v21 = vadd.f32 %v154_v19, %v5692_v14  ;;  %v271_v22 = vpop.f32.mrb[1].mxu1 }
 0x10e   :  { %vm284_vm2 = vcmp.gt.f32.partialorder %v153_v17, 1.0  ;;  %v3454_v23 = vadd.f32 %v153_v17, %v153_v17  ;;  %v272_v24 = vadd.f32 %v271_v22, %v5692_v14 }
 0x10f   :  { %v4472_v28 = vsel %vm284_vm2, 1.0, %v5425_v0  ;;  %v280_v25 = vadd.f32 %v270_v20, %v153_v17  ;;  %vm285_vm3 = vcmp.gt.f32.partialorder %v155_v21, 1.0  ;;  %v3455_v26 = vadd.f32 %v155_v21, %v155_v21 }
 0x110   :  { %v3854_v27 = vsub.f32 %v3454_v23, %v4472_v28  ;;  %v4473_v29 = vsel %vm285_vm3, 1.0, %v5425_v0  ;;  %v281_v30 = vadd.f32 %v272_v24, %v155_v21  ;;  %v158_v31 = vpop.f32.mrb[2].mxu0 }
 0x111   :  { %v5702_v32 = vsub.f32 %v280_v25, %v4472_v28  ;;  %v3855_v33 = vsub.f32 %v3455_v26, %v4473_v29  ;;  %v275_v34 = vpop.f32.mrb[2].mxu1  ;;  %v159_v35 = vadd.f32 %v158_v31, %v5698_v15  ;;  %v160_v36 = vpop.f32.mrb[3].mxu0 }
 0x112   :  { %3954 = vst [vmem:[%s7795_s4] sm:$0xff] %v3854_v27  ;;  %vm4054_vm4 = vcmp.gt.f32.partialorder %v3854_v27, 1.0  ;;  %v5708_v37 = vsub.f32 %v281_v30, %v4473_v29  ;;  %v161_v38 = vadd.f32 %v160_v36, %v5698_v15  ;;  %v277_v39 = vpop.f32.mrb[3].mxu1  ;;  %v276_v40 = vadd.f32 %v275_v34, %v5698_v15 }
 0x113   :  { %v4952_v41 = vsel %vm4054_vm4, 1.0, %v5425_v0  ;;  %vm412_vm5 = vcmp.gt.f32.partialorder %v5702_v32, 1.0  ;;  %v3458_v42 = vadd.f32 %v5702_v32, %v270_v20  ;;  %3955 = vst [vmem:[%s7795_s4 + $0x8] sm:$0xff] %v3855_v33  ;;  %vm4055_vm6 = vcmp.gt.f32.partialorder %v3855_v33, 1.0  ;;  %176 = vst [vmem:[%s7794_s3 + $0x10] sm:$0xf] %v159_v35 }
 0x114   :  { %180 = vst [vmem:[%s7795_s4 + $0x10] sm:$0xf] %v159_v35  ;;  %4354 = vst [vmem:[%s7794_s3] sm:$0xff] %v4952_v41  ;;  %v4488_v43 = vsel %vm412_vm5, 1.0, %v5425_v0  ;;  %v4953_v44 = vsel %vm4055_vm6, 1.0, %v5425_v0  ;;  %vm413_vm7 = vcmp.gt.f32.partialorder %v5708_v37, 1.0  ;;  %v3459_v45 = vadd.f32 %v5708_v37, %v272_v24 }
 0x115   :  { %177 = vst [vmem:[%s7794_s3 + $0x18] sm:$0xf] %v161_v38  ;;  %181 = vst [vmem:[%s7795_s4 + $0x18] sm:$0xf] %v161_v38  ;;  %v3858_v46 = vsub.f32 %v3458_v42, %v4488_v43  ;;  %v5744_v47 = vsel %vm413_vm7, 1.0, %v5425_v0  ;;  %vm287_vm8 = vcmp.gt.f32.partialorder %v161_v38, 1.0  ;;  %v278_v48 = vadd.f32 %v277_v39, %v5698_v15 }
 0x116   :  { %4478 = vst [vmem:[%s7794_s3 + $0x30] sm:$0xf] %v276_v40  ;;  %4355 = vst [vmem:[%s7794_s3 + $0x8] sm:$0xff] %v4953_v44  ;;  %v3859_v49 = vsub.f32 %v3459_v45, %v5744_v47  ;;  %v4475_v52 = vsel %vm287_vm8, 1.0, %v5425_v0  ;;  %v282_v50 = vadd.f32 %v276_v40, %v159_v35  ;;  %vm286_vm9 = vcmp.gt.f32.partialorder %v159_v35, 1.0 }
 0x117   :  { %3958 = vst [vmem:[%s7795_s4 + $0x20] sm:$0xff] %v3858_v46  ;;  %vm4058_vm10 = vcmp.gt.f32.partialorder %v3858_v46, 1.0  ;;  %v283_v51 = vadd.f32 %v278_v48, %v161_v38  ;;  %4479 = vst [vmem:[%s7794_s3 + $0x38] sm:$0xf] %v278_v48  ;;  %v4474_v53 = vsel %vm286_vm9, 1.0, %v5425_v0 }
 0x118   :  { %v4956_v54 = vsel %vm4058_vm10, 1.0, %v5425_v0  ;;  %3959 = vst [vmem:[%s7795_s4 + $0x28] sm:$0xff] %v3859_v49  ;;  %vm4059_vm11 = vcmp.gt.f32.partialorder %v3859_v49, 1.0  ;;  %v298_v55 = vsub.f32 %v282_v50, %v4474_v53 }
 0x119   :  { %4358 = vst [vmem:[%s7794_s3 + $0x20] sm:$0xff] %v4956_v54  ;;  %v4957_v56 = vsel %vm4059_vm11, 1.0, %v5425_v0  ;;  %v299_v57 = vsub.f32 %v283_v51, %v4475_v52 }
 0x11a   :  { %4359 = vst [vmem:[%s7794_s3 + $0x28] sm:$0xff] %v4957_v56  ;;  %v3256_v58 = vld [vmem:[%s7794_s3 + $0x10] sm:$0xf]  ;;  %v397_v60 = vpop.f32.mrb[4].mxu0  ;;  %4482 = vst [vmem:[%s7795_s4 + $0x30] sm:$0xf] %v298_v55 }
 0x11b   :  { %v3356_v59 = vld [vmem:[%s7795_s4 + $0x10] sm:$0xf]  ;;  %4483 = vst [vmem:[%s7795_s4 + $0x38] sm:$0xf] %v299_v57  ;;  %vm415_vm13 = vcmp.gt.f32.partialorder %v299_v57, 1.0  ;;  %v398_v63 = vadd.f32 %v397_v60, %v5692_v14  ;;  %v525_v3 = vpop.f32.mrb[4].mxu1 }
 0x11c   :  { %v3456_v7 = vadd.f32 %v3356_v59, %v3256_v58  ;;  %vm3556_vm12 = vcmp.gt.f32.partialorder %v3356_v59, 1.0  ;;  %v3257_v61 = vld [vmem:[%s7794_s3 + $0x18] sm:$0xf]  ;;  %v399_v4 = vpop.f32.mrb[5].mxu0  ;;  %vm414_vm15 = vcmp.gt.f32.partialorder %v298_v55, 1.0  ;;  %v4491_v8 = vsel %vm415_vm13, 1.0, %v5425_v0 }
 0x11d   :  { %v3357_v62 = vld [vmem:[%s7795_s4 + $0x18] sm:$0xf]  ;;  %v4854_v1 = vsel %vm3556_vm12, 1.0, %v5425_v0  ;;  %v408_v9 = vadd.f32 %v398_v63, %v5702_v32  ;;  %v527_v10 = vpop.f32.mrb[5].mxu1  ;;  %v526_v12 = vadd.f32 %v525_v3, %v5692_v14  ;;  %v400_v13 = vadd.f32 %v399_v4, %v5692_v14 }
 0x11e   :  { %v3457_v2 = vadd.f32 %v3357_v62, %v3257_v61  ;;  %vm3557_vm14 = vcmp.gt.f32.partialorder %v3357_v62, 1.0  ;;  %v3856_v5 = vsub.f32 %v3456_v7, %v4854_v1  ;;  %v5793_v16 = vadd.f32 %v527_v10, %v5692_v14  ;;  %v403_v17 = vpop.f32.mrb[6].mxu0  ;;  %v3261_v23 = vld [vmem:[%s7794_s3 + $0x38] sm:$0xf] }
 0x11f   :  { %v4855_v6 = vsel %vm3557_vm14, 1.0, %v5425_v0  ;;  %v424_v18 = vsub.f32 %v408_v9, %v4488_v43  ;;  %v404_v19 = vadd.f32 %v403_v17, %v5698_v15  ;;  %v4490_v20 = vsel %vm414_vm15, 1.0, %v5425_v0  ;;  %v405_v21 = vpop.f32.mrb[7].mxu0 }
 0x120   :  { %v3857_v11 = vsub.f32 %v3457_v2, %v4855_v6  ;;  %3956 = vst [vmem:[%s7795_s4 + $0x10] sm:$0xf] %v3856_v5  ;;  %vm4056_vm0 = vcmp.gt.f32.partialorder %v3856_v5, 1.0  ;;  %v409_v24 = vadd.f32 %v400_v13, %v5708_v37  ;;  %v406_v28 = vadd.f32 %v405_v21, %v5698_v15  ;;  %v531_v25 = vpop.f32.mrb[6].mxu1  ;;  %v3260_v6 = vld [vmem:[%s7794_s3 + $0x30] sm:$0xf] }
 0x121   :  { %v4954_v22 = vsel %vm4056_vm0, 1.0, %v5425_v0  ;;  %vm540_vm2 = vcmp.gt.f32.partialorder %v424_v18, 1.0  ;;  %v3462_v27 = vadd.f32 %v424_v18, %v398_v63  ;;  %v536_v29 = vadd.f32 %v526_v12, %v424_v18  ;;  %4494 = vst [vmem:[%s7794_s3 + $0x50] sm:$0xf] %v404_v19  ;;  %v533_v30 = vpop.f32.mrb[7].mxu1 }
 0x122   :  { %3957 = vst [vmem:[%s7795_s4 + $0x18] sm:$0xf] %v3857_v11  ;;  %vm4057_vm1 = vcmp.gt.f32.partialorder %v3857_v11, 1.0  ;;  %4356 = vst [vmem:[%s7794_s3 + $0x10] sm:$0xf] %v4954_v22  ;;  %v4504_v32 = vsel %vm540_vm2, 1.0, %v5425_v0  ;;  %v425_v33 = vsub.f32 %v409_v24, %v5744_v47  ;;  %v410_v34 = vadd.f32 %v404_v19, %v298_v55 }
 0x123   :  { %v4955_v26 = vsel %vm4057_vm1, 1.0, %v5425_v0  ;;  %v3361_v31 = vld [vmem:[%s7795_s4 + $0x38] sm:$0xf]  ;;  %v411_v35 = vadd.f32 %v406_v28, %v299_v57  ;;  %4495 = vst [vmem:[%s7794_s3 + $0x58] sm:$0xf] %v406_v28  ;;  %v3862_v37 = vsub.f32 %v3462_v27, %v4504_v32  ;;  %v5827_v38 = vsub.f32 %v536_v29, %v4504_v32 }
 0x124   :  { %4357 = vst [vmem:[%s7794_s3 + $0x18] sm:$0xf] %v4955_v26  ;;  %v3461_v36 = vadd.f32 %v3361_v31, %v3261_v23  ;;  %vm3561_vm3 = vcmp.gt.f32.partialorder %v3361_v31, 1.0  ;;  %vm541_vm4 = vcmp.gt.f32.partialorder %v425_v33, 1.0  ;;  %v3463_v40 = vadd.f32 %v425_v33, %v400_v13 }
 0x125   :  { %v4859_v39 = vsel %vm3561_vm3, 1.0, %v5425_v0  ;;  %v537_v41 = vadd.f32 %v5793_v16, %v425_v33  ;;  %3962 = vst [vmem:[%s7795_s4 + $0x40] sm:$0xff] %v3862_v37  ;;  %vm4062_vm5 = vcmp.gt.f32.partialorder %v3862_v37, 1.0  ;;  %vm668_vm6 = vcmp.gt.f32.partialorder %v5827_v38, 1.0 }
 0x126   :  { %v3861_v42 = vsub.f32 %v3461_v36, %v4859_v39  ;;  %v3466_v43 = vadd.f32 %v5827_v38, %v526_v12  ;;  %v4960_v44 = vsel %vm4062_vm5, 1.0, %v5425_v0  ;;  %v5838_v45 = vsel %vm668_vm6, 1.0, %v5425_v0 }
 0x127   :  { %v4505_v46 = vsel %vm541_vm4, 1.0, %v5425_v0  ;;  %v426_v47 = vsub.f32 %v410_v34, %v4490_v20  ;;  %4362 = vst [vmem:[%s7794_s3 + $0x40] sm:$0xff] %v4960_v44  ;;  %v427_v51 = vsub.f32 %v411_v35, %v4491_v8  ;;  %v532_v53 = vadd.f32 %v531_v25, %v5698_v15  ;;  %v5892_v8 = vld [vmem:[%s7795_s4 + $0x30] sm:$0xf] }
 0x128   :  { %3961 = vst [vmem:[%s7795_s4 + $0x38] sm:$0xf] %v3861_v42  ;;  %vm4061_vm7 = vcmp.gt.f32.partialorder %v3861_v42, 1.0  ;;  %v3866_v48 = vsub.f32 %v3466_v43, %v5838_v45  ;;  %v3863_v49 = vsub.f32 %v3463_v40, %v4505_v46  ;;  %v553_v52 = vsub.f32 %v537_v41, %v4505_v46  ;;  %v3264_v9 = vld [vmem:[%s7794_s3 + $0x50] sm:$0xf] }
 0x129   :  { %v4959_v50 = vsel %vm4061_vm7, 1.0, %v5425_v0  ;;  %4498 = vst [vmem:[%s7795_s4 + $0x50] sm:$0xf] %v426_v47  ;;  %vm542_vm8 = vcmp.gt.f32.partialorder %v426_v47, 1.0  ;;  %v653_v55 = vpop.f32.mrb[8].mxu0  ;;  %vm543_vm12 = vcmp.gt.f32.partialorder %v427_v51, 1.0  ;;  %v538_v62 = vadd.f32 %v532_v53, %v426_v47 }
 0x12a   :  { %4361 = vst [vmem:[%s7794_s3 + $0x38] sm:$0xf] %v4959_v50  ;;  %3966 = vst [vmem:[%s7795_s4 + $0x60] sm:$0xff] %v3866_v48  ;;  %vm4066_vm9 = vcmp.gt.f32.partialorder %v3866_v48, 1.0  ;;  %vm4063_vm10 = vcmp.gt.f32.partialorder %v3863_v49, 1.0  ;;  %vm669_vm11 = vcmp.gt.f32.partialorder %v553_v52, 1.0  ;;  %v3467_v54 = vadd.f32 %v553_v52, %v5793_v16 }
 0x12b   :  { %3963 = vst [vmem:[%s7795_s4 + $0x48] sm:$0xff] %v3863_v49  ;;  %v4964_v56 = vsel %vm4066_vm9, 1.0, %v5425_v0  ;;  %v4961_v57 = vsel %vm4063_vm10, 1.0, %v5425_v0  ;;  %v4521_v58 = vsel %vm669_vm11, 1.0, %v5425_v0  ;;  %v4506_v59 = vsel %vm542_vm8, 1.0, %v5425_v0  ;;  %v781_v60 = vpop.f32.mrb[8].mxu1 }
 0x12c   :  { %4499 = vst [vmem:[%s7795_s4 + $0x58] sm:$0xf] %v427_v51  ;;  %4510 = vst [vmem:[%s7794_s3 + $0x70] sm:$0xf] %v532_v53  ;;  %v655_v7 = vpop.f32.mrb[9].mxu0  ;;  %v3867_v61 = vsub.f32 %v3467_v54, %v4521_v58  ;;  %v534_v63 = vadd.f32 %v533_v30, %v5698_v15  ;;  %v783_v1 = vpop.f32.mrb[9].mxu1  ;;  %v654_v3 = vadd.f32 %v653_v55, %v5692_v14 }
 0x12d   :  { %4366 = vst [vmem:[%s7794_s3 + $0x60] sm:$0xff] %v4964_v56  ;;  %4363 = vst [vmem:[%s7794_s3 + $0x48] sm:$0xff] %v4961_v57  ;;  %v4507_v2 = vsel %vm543_vm12, 1.0, %v5425_v0  ;;  %v5883_v4 = vadd.f32 %v781_v60, %v5692_v14  ;;  %v656_v5 = vadd.f32 %v655_v7, %v5692_v14  ;;  %v554_v10 = vsub.f32 %v538_v62, %v4506_v59  ;;  %v659_v13 = vpop.f32.mrb[10].mxu0  ;;  %v3265_v22 = vld [vmem:[%s7794_s3 + $0x58] sm:$0xf] }
 0x12e   :  { %3967 = vst [vmem:[%s7795_s4 + $0x68] sm:$0xff] %v3867_v61  ;;  %vm4067_vm13 = vcmp.gt.f32.partialorder %v3867_v61, 1.0  ;;  %v539_v11 = vadd.f32 %v534_v63, %v427_v51  ;;  %4511 = vst [vmem:[%s7794_s3 + $0x78] sm:$0xf] %v534_v63  ;;  %v5904_v12 = vadd.f32 %v783_v1, %v5692_v14  ;;  %v664_v17 = vadd.f32 %v654_v3, %v5827_v38  ;;  %v661_v20 = vpop.f32.mrb[11].mxu0 }
 0x12f   :  { %v4965_v16 = vsel %vm4067_vm13, 1.0, %v5425_v0  ;;  %v665_v18 = vadd.f32 %v656_v5, %v553_v52  ;;  %v660_v19 = vadd.f32 %v659_v13, %v5698_v15  ;;  %4514 = vst [vmem:[%s7795_s4 + $0x70] sm:$0xf] %v554_v10  ;;  %vm670_vm14 = vcmp.gt.f32.partialorder %v554_v10, 1.0  ;;  %v5926_v28 = vpop.f32.mrb[10].mxu1 }
 0x130   :  { %4367 = vst [vmem:[%s7794_s3 + $0x68] sm:$0xff] %v4965_v16  ;;  %v3364_v21 = vld [vmem:[%s7795_s4 + $0x50] sm:$0xf]  ;;  %v5921_v23 = vsub.f32 %v539_v11, %v4507_v2  ;;  %v5924_v24 = vadd.f32 %v661_v20, %v5698_v15  ;;  %v5929_v25 = vadd.f32 %v5892_v8, %v3260_v6  ;;  %v4522_v27 = vsel %vm670_vm14, 1.0, %v5425_v0  ;;  %v5936_v30 = vpop.f32.mrb[11].mxu1 }
 0x131   :  { %v3464_v26 = vadd.f32 %v3364_v21, %v3264_v9  ;;  %vm3564_vm15 = vcmp.gt.f32.partialorder %v3364_v21, 1.0  ;;  %v680_v29 = vsub.f32 %v664_v17, %v5838_v45  ;;  %4526 = vst [vmem:[%s7794_s3 + $0x90] sm:$0xf] %v660_v19  ;;  %v681_v33 = vsub.f32 %v665_v18, %v4521_v58 }
 0x132   :  { %v4862_v31 = vsel %vm3564_vm15, 1.0, %v5425_v0  ;;  %4515 = vst [vmem:[%s7795_s4 + $0x78] sm:$0xf] %v5921_v23  ;;  %vm671_vm0 = vcmp.gt.f32.partialorder %v5921_v23, 1.0  ;;  %v666_v34 = vadd.f32 %v660_v19, %v554_v10  ;;  %4527 = vst [vmem:[%s7794_s3 + $0x98] sm:$0xf] %v5924_v24  ;;  %v667_v10 = vadd.f32 %v5924_v24, %v5921_v23 }
 0x133   :  { %v3365_v32 = vld [vmem:[%s7795_s4 + $0x58] sm:$0xf]  ;;  %v3864_v35 = vsub.f32 %v3464_v26, %v4862_v31  ;;  %v5952_v37 = vsel %vm671_vm0, 1.0, %v5425_v0  ;;  %vm796_vm2 = vcmp.gt.f32.partialorder %v680_v29, 1.0  ;;  %v3470_v39 = vadd.f32 %v680_v29, %v654_v3  ;;  %v3268_v42 = vld [vmem:[%s7794_s3 + $0x70] sm:$0xf] }
 0x134   :  { %v3465_v36 = vadd.f32 %v3365_v32, %v3265_v22  ;;  %vm3565_vm1 = vcmp.gt.f32.partialorder %v3365_v32, 1.0  ;;  %v792_v40 = vadd.f32 %v5883_v4, %v680_v29  ;;  %v4536_v43 = vsel %vm796_vm2, 1.0, %v5425_v0 }
 0x135   :  { %v4863_v38 = vsel %vm3565_vm1, 1.0, %v5425_v0  ;;  %3964 = vst [vmem:[%s7795_s4 + $0x50] sm:$0xf] %v3864_v35  ;;  %vm4064_vm3 = vcmp.gt.f32.partialorder %v3864_v35, 1.0  ;;  %vm797_vm4 = vcmp.gt.f32.partialorder %v681_v33, 1.0  ;;  %v3870_v45 = vsub.f32 %v3470_v39, %v4536_v43 }
 0x136   :  { %v3865_v41 = vsub.f32 %v3465_v36, %v4863_v38  ;;  %v4962_v44 = vsel %vm4064_vm3, 1.0, %v5425_v0  ;;  %v5964_v46 = vsub.f32 %v792_v40, %v4536_v43  ;;  %v4537_v47 = vsel %vm797_vm4, 1.0, %v5425_v0  ;;  %v3368_v48 = vld [vmem:[%s7795_s4 + $0x70] sm:$0xf]  ;;  %v3269_v54 = vld [vmem:[%s7794_s3 + $0x78] sm:$0xf] }
 0x137   :  { %4364 = vst [vmem:[%s7794_s3 + $0x50] sm:$0xf] %v4962_v44  ;;  %v3471_v49 = vadd.f32 %v681_v33, %v656_v5  ;;  %v793_v52 = vadd.f32 %v5904_v12, %v681_v33  ;;  %v5977_v50 = vsub.f32 %v666_v34, %v4522_v27  ;;  %v3468_v53 = vadd.f32 %v3368_v48, %v3268_v42 }
 0x138   :  { %3965 = vst [vmem:[%s7795_s4 + $0x58] sm:$0xf] %v3865_v41  ;;  %vm4065_vm5 = vcmp.gt.f32.partialorder %v3865_v41, 1.0  ;;  %vm3568_vm6 = vcmp.gt.f32.partialorder %v3368_v48, 1.0  ;;  %3970 = vst [vmem:[%s7795_s4 + $0x80] sm:$0xff] %v3870_v45  ;;  %vm4070_vm7 = vcmp.gt.f32.partialorder %v3870_v45, 1.0  ;;  %v3474_v58 = vadd.f32 %v5964_v46, %v5883_v4 }
 0x139   :  { %v4963_v51 = vsel %vm4065_vm5, 1.0, %v5425_v0  ;;  %v4866_v55 = vsel %vm3568_vm6, 1.0, %v5425_v0  ;;  %v3369_v56 = vld [vmem:[%s7795_s4 + $0x78] sm:$0xf]  ;;  %v4968_v57 = vsel %vm4070_vm7, 1.0, %v5425_v0  ;;  %vm924_vm8 = vcmp.gt.f32.partialorder %v5964_v46, 1.0 }
 0x13a   :  { %4365 = vst [vmem:[%s7794_s3 + $0x58] sm:$0xf] %v4963_v51  ;;  %4530 = vst [vmem:[%s7795_s4 + $0x90] sm:$0xf] %v5977_v50  ;;  %v909_v59 = vpop.f32.mrb[12].mxu0  ;;  %v3868_v60 = vsub.f32 %v3468_v53, %v4866_v55  ;;  %v3469_v7 = vadd.f32 %v3369_v56, %v3269_v54  ;;  %vm3569_vm9 = vcmp.gt.f32.partialorder %v3369_v56, 1.0  ;;  %v3871_v3 = vsub.f32 %v3471_v49, %v4537_v47 }
 0x13b   :  { %4370 = vst [vmem:[%s7794_s3 + $0x80] sm:$0xff] %v4968_v57  ;;  %v6005_v61 = vsel %vm924_vm8, 1.0, %v5425_v0  ;;  %v1037_v62 = vpop.f32.mrb[12].mxu1  ;;  %v911_v63 = vpop.f32.mrb[13].mxu0  ;;  %v4867_v1 = vsel %vm3569_vm9, 1.0, %v5425_v0  ;;  %v809_v4 = vsub.f32 %v793_v52, %v4537_v47  ;;  %vm798_vm11 = vcmp.gt.f32.partialorder %v5977_v50, 1.0 }
 0x13c   :  { %v3874_v2 = vsub.f32 %v3474_v58, %v6005_v61  ;;  %v1039_v5 = vpop.f32.mrb[13].mxu1  ;;  %3968 = vst [vmem:[%s7795_s4 + $0x70] sm:$0xf] %v3868_v60  ;;  %vm4068_vm10 = vcmp.gt.f32.partialorder %v3868_v60, 1.0  ;;  %v3869_v6 = vsub.f32 %v3469_v7, %v4867_v1  ;;  %v3272_v9 = vld [vmem:[%s7794_s3 + $0x90] sm:$0xf]  ;;  %v683_v23 = vsub.f32 %v667_v10, %v5952_v37 }
 0x13d   :  { %v4966_v11 = vsel %vm4068_vm10, 1.0, %v5425_v0  ;;  %3971 = vst [vmem:[%s7795_s4 + $0x88] sm:$0xff] %v3871_v3  ;;  %vm4071_vm13 = vcmp.gt.f32.partialorder %v3871_v3, 1.0  ;;  %vm925_vm14 = vcmp.gt.f32.partialorder %v809_v4, 1.0  ;;  %v915_v13 = vpop.f32.mrb[14].mxu0  ;;  %v3475_v21 = vadd.f32 %v809_v4, %v5904_v12 }
 0x13e   :  { %3974 = vst [vmem:[%s7795_s4 + $0xa0] sm:$0xff] %v3874_v2  ;;  %vm4074_vm12 = vcmp.gt.f32.partialorder %v3874_v2, 1.0  ;;  %4368 = vst [vmem:[%s7794_s3 + $0x70] sm:$0xf] %v4966_v11  ;;  %vm4069_vm15 = vcmp.gt.f32.partialorder %v3869_v6, 1.0  ;;  %v4969_v17 = vsel %vm4071_vm13, 1.0, %v5425_v0  ;;  %v788_v27 = vadd.f32 %v5926_v28, %v5698_v15 }
 0x13f   :  { %3969 = vst [vmem:[%s7795_s4 + $0x78] sm:$0xf] %v3869_v6  ;;  %v4972_v16 = vsel %vm4074_vm12, 1.0, %v5425_v0  ;;  %v4553_v18 = vsel %vm925_vm14, 1.0, %v5425_v0  ;;  %v917_v19 = vpop.f32.mrb[15].mxu0  ;;  %v4967_v20 = vsel %vm4069_vm15, 1.0, %v5425_v0  ;;  %v790_v12 = vadd.f32 %v5936_v30, %v5698_v15 }
 0x140   :  { %4374 = vst [vmem:[%s7794_s3 + $0xa0] sm:$0xff] %v4972_v16  ;;  %4371 = vst [vmem:[%s7794_s3 + $0x88] sm:$0xff] %v4969_v17  ;;  %v4538_v22 = vsel %vm798_vm11, 1.0, %v5425_v0  ;;  %v6046_v24 = vpop.f32.mrb[14].mxu1  ;;  %v910_v29 = vadd.f32 %v909_v59, %v5692_v14  ;;  %v6060_v31 = vadd.f32 %v1037_v62, %v5692_v14  ;;  %v3875_v33 = vsub.f32 %v3475_v21, %v4553_v18  ;;  %v3273_v48 = vld [vmem:[%s7794_s3 + $0x98] sm:$0xf] }
 0x141   :  { %4369 = vst [vmem:[%s7794_s3 + $0x78] sm:$0xf] %v4967_v20  ;;  %v3372_v26 = vld [vmem:[%s7795_s4 + $0x90] sm:$0xf]  ;;  %v6062_v32 = vpop.f32.mrb[15].mxu1  ;;  %vm799_vm1 = vcmp.gt.f32.partialorder %v683_v23, 1.0  ;;  %v794_v30 = vadd.f32 %v788_v27, %v5977_v50  ;;  %v795_v36 = vadd.f32 %v790_v12, %v683_v23  ;;  %v912_v39 = vadd.f32 %v911_v63, %v5692_v14 }
 0x142   :  { %v3472_v34 = vadd.f32 %v3372_v26, %v3272_v9  ;;  %vm3572_vm0 = vcmp.gt.f32.partialorder %v3372_v26, 1.0  ;;  %4531 = vst [vmem:[%s7795_s4 + $0x98] sm:$0xf] %v683_v23  ;;  %v4539_v35 = vsel %vm799_vm1, 1.0, %v5425_v0  ;;  %4542 = vst [vmem:[%s7794_s3 + $0xb0] sm:$0xf] %v788_v27  ;;  %v920_v38 = vadd.f32 %v910_v29, %v5964_v46 }
 0x143   :  { %v4870_v28 = vsel %vm3572_vm0, 1.0, %v5425_v0  ;;  %4543 = vst [vmem:[%s7794_s3 + $0xb8] sm:$0xf] %v790_v12  ;;  %3975 = vst [vmem:[%s7795_s4 + $0xa8] sm:$0xff] %v3875_v33  ;;  %vm4075_vm2 = vcmp.gt.f32.partialorder %v3875_v33, 1.0  ;;  %v810_v41 = vsub.f32 %v794_v30, %v4538_v22  ;;  %v811_v42 = vsub.f32 %v795_v36, %v4539_v35 }
 0x144   :  { %v3872_v37 = vsub.f32 %v3472_v34, %v4870_v28  ;;  %v4973_v40 = vsel %vm4075_vm2, 1.0, %v5425_v0  ;;  %v6083_v43 = vadd.f32 %v1039_v5, %v5692_v14  ;;  %v936_v44 = vsub.f32 %v920_v38, %v6005_v61 }
 0x145   :  { %4375 = vst [vmem:[%s7794_s3 + $0xa8] sm:$0xff] %v4973_v40  ;;  %v921_v45 = vadd.f32 %v912_v39, %v809_v4  ;;  %v916_v46 = vadd.f32 %v915_v13, %v5698_v15  ;;  %4546 = vst [vmem:[%s7795_s4 + $0xb0] sm:$0xf] %v810_v41  ;;  %vm926_vm4 = vcmp.gt.f32.partialorder %v810_v41, 1.0  ;;  %vm927_vm5 = vcmp.gt.f32.partialorder %v811_v42, 1.0 }
 0x146   :  { %3972 = vst [vmem:[%s7795_s4 + $0x90] sm:$0xf] %v3872_v37  ;;  %vm4072_vm3 = vcmp.gt.f32.partialorder %v3872_v37, 1.0  ;;  %4547 = vst [vmem:[%s7795_s4 + $0xb8] sm:$0xf] %v811_v42  ;;  %v918_v49 = vadd.f32 %v917_v19, %v5698_v15  ;;  %v4554_v52 = vsel %vm926_vm4, 1.0, %v5425_v0  ;;  %v3478_v51 = vadd.f32 %v936_v44, %v910_v29 }
 0x147   :  { %v4970_v47 = vsel %vm4072_vm3, 1.0, %v5425_v0  ;;  %v6109_v50 = vsel %vm927_vm5, 1.0, %v5425_v0  ;;  %vm1052_vm6 = vcmp.gt.f32.partialorder %v936_v44, 1.0  ;;  %4558 = vst [vmem:[%s7794_s3 + $0xd0] sm:$0xf] %v916_v46  ;;  %v1048_v55 = vadd.f32 %v6060_v31, %v936_v44  ;;  %v6122_v58 = vpop.f32.mrb[16].mxu0 }
 0x148   :  { %4372 = vst [vmem:[%s7794_s3 + $0x90] sm:$0xf] %v4970_v47  ;;  %v4568_v54 = vsel %vm1052_vm6, 1.0, %v5425_v0  ;;  %v937_v56 = vsub.f32 %v921_v45, %v4553_v18  ;;  %v922_v57 = vadd.f32 %v916_v46, %v810_v41  ;;  %4559 = vst [vmem:[%s7794_s3 + $0xd8] sm:$0xf] %v918_v49  ;;  %v923_v7 = vadd.f32 %v918_v49, %v811_v42  ;;  %v6124_v61 = vpop.f32.mrb[16].mxu1 }
 0x149   :  { %v3373_v53 = vld [vmem:[%s7795_s4 + $0x98] sm:$0xf]  ;;  %v3878_v60 = vsub.f32 %v3478_v51, %v4568_v54  ;;  %v6127_v63 = vsub.f32 %v1048_v55, %v4568_v54  ;;  %v6129_v2 = vpop.f32.mrb[17].mxu0  ;;  %v6131_v3 = vpop.f32.mrb[17].mxu1  ;;  %v3276_v5 = vld [vmem:[%s7794_s3 + $0xb0] sm:$0xf]  ;;  %v1044_v46 = vadd.f32 %v6046_v24, %v5698_v15  ;;  %v1046_v47 = vadd.f32 %v6062_v32, %v5698_v15 }
 0x14a   :  { %v3473_v59 = vadd.f32 %v3373_v53, %v3273_v48  ;;  %vm3573_vm7 = vcmp.gt.f32.partialorder %v3373_v53, 1.0  ;;  %vm1053_vm8 = vcmp.gt.f32.partialorder %v937_v56, 1.0  ;;  %v3479_v1 = vadd.f32 %v937_v56, %v912_v39  ;;  %v3277_v10 = vld [vmem:[%s7794_s3 + $0xb8] sm:$0xf] }
 0x14b   :  { %v4871_v62 = vsel %vm3573_vm7, 1.0, %v5425_v0  ;;  %3978 = vst [vmem:[%s7795_s4 + $0xc0] sm:$0xff] %v3878_v60  ;;  %vm4078_vm9 = vcmp.gt.f32.partialorder %v3878_v60, 1.0  ;;  %v4569_v6 = vsel %vm1053_vm8, 1.0, %v5425_v0  ;;  %v1049_v9 = vadd.f32 %v6083_v43, %v937_v56  ;;  %v6148_v17 = vpop.f32.mrb[18].mxu0 }
 0x14c   :  { %v3873_v4 = vsub.f32 %v3473_v59, %v4871_v62  ;;  %v4976_v11 = vsel %vm4078_vm9, 1.0, %v5425_v0  ;;  %vm1180_vm10 = vcmp.gt.f32.partialorder %v6127_v63, 1.0  ;;  %v3482_v13 = vadd.f32 %v6127_v63, %v6060_v31  ;;  %v3376_v18 = vld [vmem:[%s7795_s4 + $0xb0] sm:$0xf]  ;;  %v6171_v12 = vpop.f32.mrb[19].mxu0 }
 0x14d   :  { %v3879_v16 = vsub.f32 %v3479_v1, %v4569_v6  ;;  %v3377_v19 = vld [vmem:[%s7795_s4 + $0xb8] sm:$0xf]  ;;  %4378 = vst [vmem:[%s7794_s3 + $0xc0] sm:$0xff] %v4976_v11  ;;  %v6163_v20 = vsel %vm1180_vm10, 1.0, %v5425_v0  ;;  %v6165_v21 = vsub.f32 %v1049_v9, %v4569_v6  ;;  %v938_v22 = vsub.f32 %v922_v57, %v4554_v52  ;;  %v6173_v29 = vpop.f32.mrb[18].mxu1 }
 0x14e   :  { %3973 = vst [vmem:[%s7795_s4 + $0x98] sm:$0xf] %v3873_v4  ;;  %vm4073_vm11 = vcmp.gt.f32.partialorder %v3873_v4, 1.0  ;;  %v3476_v26 = vadd.f32 %v3376_v18, %v3276_v5  ;;  %vm3576_vm12 = vcmp.gt.f32.partialorder %v3376_v18, 1.0  ;;  %v3477_v27 = vadd.f32 %v3377_v19, %v3277_v10  ;;  %v6183_v34 = vpop.f32.mrb[19].mxu1 }
 0x14f   :  { %v4971_v23 = vsel %vm4073_vm11, 1.0, %v5425_v0  ;;  %3979 = vst [vmem:[%s7795_s4 + $0xc8] sm:$0xff] %v3879_v16  ;;  %v4874_v31 = vsel %vm3576_vm12, 1.0, %v5425_v0  ;;  %vm3577_vm13 = vcmp.gt.f32.partialorder %v3377_v19, 1.0  ;;  %v3882_v33 = vsub.f32 %v3482_v13, %v6163_v20  ;;  %4562 = vst [vmem:[%s7795_s4 + $0xd0] sm:$0xf] %v938_v22 }
 0x150   :  { %4373 = vst [vmem:[%s7794_s3 + $0x98] sm:$0xf] %v4971_v23  ;;  %vm4079_vm14 = vcmp.gt.f32.partialorder %v3879_v16, 1.0  ;;  %v3876_v28 = vsub.f32 %v3476_v26, %v4874_v31  ;;  %v4875_v35 = vsel %vm3577_vm13, 1.0, %v5425_v0  ;;  %vm1181_vm15 = vcmp.gt.f32.partialorder %v6165_v21, 1.0 }
 0x151   :  { %v4977_v30 = vsel %vm4079_vm14, 1.0, %v5425_v0  ;;  %v3877_v36 = vsub.f32 %v3477_v27, %v4875_v35  ;;  %3982 = vst [vmem:[%s7795_s4 + $0xe0] sm:$0xff] %v3882_v33  ;;  %vm4082_vm0 = vcmp.gt.f32.partialorder %v3882_v33, 1.0  ;;  %v4585_v37 = vsel %vm1181_vm15, 1.0, %v5425_v0  ;;  %v3280_v45 = vld [vmem:[%s7794_s3 + $0xd0] sm:$0xf] }
 0x152   :  { %4379 = vst [vmem:[%s7794_s3 + $0xc8] sm:$0xff] %v4977_v30  ;;  %v3483_v38 = vadd.f32 %v6165_v21, %v6083_v43  ;;  %3976 = vst [vmem:[%s7795_s4 + $0xb0] sm:$0xf] %v3876_v28  ;;  %vm4076_vm1 = vcmp.gt.f32.partialorder %v3876_v28, 1.0  ;;  %v4980_v39 = vsel %vm4082_vm0, 1.0, %v5425_v0  ;;  %vm1054_vm2 = vcmp.gt.f32.partialorder %v938_v22, 1.0 }
 0x153   :  { %v939_v40 = vsub.f32 %v923_v7, %v6109_v50  ;;  %v4974_v41 = vsel %vm4076_vm1, 1.0, %v5425_v0  ;;  %3977 = vst [vmem:[%s7795_s4 + $0xb8] sm:$0xf] %v3877_v36  ;;  %vm4077_vm3 = vcmp.gt.f32.partialorder %v3877_v36, 1.0  ;;  %4382 = vst [vmem:[%s7794_s3 + $0xe0] sm:$0xff] %v4980_v39  ;;  %v4570_v43 = vsel %vm1054_vm2, 1.0, %v5425_v0 }
 0x154   :  { %v3883_v42 = vsub.f32 %v3483_v38, %v4585_v37  ;;  %4376 = vst [vmem:[%s7794_s3 + $0xb0] sm:$0xf] %v4974_v41  ;;  %v4975_v44 = vsel %vm4077_vm3, 1.0, %v5425_v0  ;;  %v1166_v49 = vadd.f32 %v6122_v58, %v5692_v14  ;;  %v6235_v24 = vadd.f32 %v6124_v61, %v5692_v14  ;;  %4574 = vst [vmem:[%s7794_s3 + $0xf0] sm:$0xf] %v1044_v46 }
 0x155   :  { %4563 = vst [vmem:[%s7795_s4 + $0xd8] sm:$0xf] %v939_v40  ;;  %vm1055_vm4 = vcmp.gt.f32.partialorder %v939_v40, 1.0  ;;  %4377 = vst [vmem:[%s7794_s3 + $0xb8] sm:$0xf] %v4975_v44  ;;  %v1050_v50 = vadd.f32 %v1044_v46, %v938_v22  ;;  %v1051_v51 = vadd.f32 %v1046_v47, %v939_v40  ;;  %v1168_v53 = vadd.f32 %v6129_v2, %v5692_v14 }
 0x156   :  { %3983 = vst [vmem:[%s7795_s4 + $0xe8] sm:$0xff] %v3883_v42  ;;  %vm4083_vm5 = vcmp.gt.f32.partialorder %v3883_v42, 1.0  ;;  %v4571_v48 = vsel %vm1055_vm4, 1.0, %v5425_v0  ;;  %v3380_v52 = vld [vmem:[%s7795_s4 + $0xd0] sm:$0xf]  ;;  %v1176_v55 = vadd.f32 %v1166_v49, %v6127_v63  ;;  %v6255_v56 = vadd.f32 %v6131_v3, %v5692_v14  ;;  %v6257_v57 = vpop.f32.mrb[20].mxu0 }
 0x157   :  { %v4981_v32 = vsel %vm4083_vm5, 1.0, %v5425_v0  ;;  %4575 = vst [vmem:[%s7794_s3 + $0xf8] sm:$0xf] %v1046_v47  ;;  %v3480_v54 = vadd.f32 %v3380_v52, %v3280_v45  ;;  %vm3580_vm6 = vcmp.gt.f32.partialorder %v3380_v52, 1.0  ;;  %v1066_v59 = vsub.f32 %v1050_v50, %v4570_v43  ;;  %v6261_v61 = vpop.f32.mrb[20].mxu1  ;;  %v6263_v62 = vpop.f32.mrb[21].mxu0 }
 0x158   :  { %4383 = vst [vmem:[%s7794_s3 + $0xe8] sm:$0xff] %v4981_v32  ;;  %v4878_v58 = vsel %vm3580_vm6, 1.0, %v5425_v0  ;;  %v1067_v60 = vsub.f32 %v1051_v51, %v4571_v48  ;;  %v1177_v7 = vadd.f32 %v1168_v53, %v6165_v21  ;;  %v3281_v63 = vld [vmem:[%s7794_s3 + $0xd8] sm:$0xf]  ;;  %v1192_v2 = vsub.f32 %v1176_v55, %v6163_v20  ;;  %v6273_v5 = vpop.f32.mrb[21].mxu1 }
 0x159   :  { %v3880_v1 = vsub.f32 %v3480_v54, %v4878_v58  ;;  %v1172_v3 = vadd.f32 %v6148_v17, %v5698_v15  ;;  %v1174_v4 = vadd.f32 %v6171_v12, %v5698_v15  ;;  %4578 = vst [vmem:[%s7795_s4 + $0xf0] sm:$0xf] %v1066_v59  ;;  %vm1182_vm7 = vcmp.gt.f32.partialorder %v1066_v59, 1.0 }
 0x15a   :  { %4579 = vst [vmem:[%s7795_s4 + $0xf8] sm:$0xf] %v1067_v60  ;;  %vm1183_vm8 = vcmp.gt.f32.partialorder %v1067_v60, 1.0  ;;  %v1193_v6 = vsub.f32 %v1177_v7, %v4585_v37  ;;  %v6283_v9 = vadd.f32 %v6173_v29, %v5698_v15  ;;  %v4586_v11 = vsel %vm1182_vm7, 1.0, %v5425_v0  ;;  %v6299_v17 = vpop.f32.mrb[22].mxu0 }
 0x15b   :  { %3980 = vst [vmem:[%s7795_s4 + $0xd0] sm:$0xf] %v3880_v1  ;;  %vm4080_vm9 = vcmp.gt.f32.partialorder %v3880_v1, 1.0  ;;  %v4587_v13 = vsel %vm1183_vm8, 1.0, %v5425_v0  ;;  %v3486_v16 = vadd.f32 %v1192_v2, %v1166_v49  ;;  %4590 = vst [vmem:[%s7794_s3 + $0x110] sm:$0xf] %v1172_v3  ;;  %v1304_v26 = vadd.f32 %v6235_v24, %v1192_v2 }
 0x15c   :  { %v3381_v10 = vld [vmem:[%s7795_s4 + $0xd8] sm:$0xf]  ;;  %4591 = vst [vmem:[%s7794_s3 + $0x118] sm:$0xf] %v1174_v4  ;;  %v4978_v18 = vsel %vm4080_vm9, 1.0, %v5425_v0  ;;  %vm3586_vm11 = vcmp.gt.f32.partialorder %v1192_v2, 1.0  ;;  %v3487_v27 = vadd.f32 %v1193_v6, %v1168_v53  ;;  %v1305_v31 = vadd.f32 %v6255_v56, %v1193_v6 }
 0x15d   :  { %v3481_v19 = vadd.f32 %v3381_v10, %v3281_v63  ;;  %vm3581_vm10 = vcmp.gt.f32.partialorder %v3381_v10, 1.0  ;;  %4606 = vst [vmem:[%s7794_s3 + $0x130] sm:$0xf] %v6283_v9  ;;  %v6306_v20 = vpop.f32.mrb[22].mxu1  ;;  %v6308_v21 = vpop.f32.mrb[23].mxu0  ;;  %v4884_v23 = vsel %vm3586_vm11, 1.0, %v5425_v0  ;;  %v1178_v36 = vadd.f32 %v1172_v3, %v1066_v59 }
 0x15e   :  { %4380 = vst [vmem:[%s7794_s3 + $0xd0] sm:$0xf] %v4978_v18  ;;  %v4879_v22 = vsel %vm3581_vm10, 1.0, %v5425_v0  ;;  %v3886_v29 = vsub.f32 %v3486_v16, %v4884_v23  ;;  %vm3587_vm12 = vcmp.gt.f32.partialorder %v1193_v6, 1.0  ;;  %v6317_v33 = vpop.f32.mrb[23].mxu1  ;;  %v6322_v35 = vsub.f32 %v1304_v26, %v4884_v23 }
 0x15f   :  { %v3881_v12 = vsub.f32 %v3481_v19, %v4879_v22  ;;  %v3284_v28 = vld [vmem:[%s7794_s3 + $0xf0] sm:$0xf]  ;;  %v4885_v30 = vsel %vm3587_vm12, 1.0, %v5425_v0  ;;  %v1179_v37 = vadd.f32 %v1174_v4, %v1067_v60  ;;  %v3285_v38 = vld [vmem:[%s7794_s3 + $0xf8] sm:$0xf]  ;;  %v1194_v46 = vsub.f32 %v1178_v36, %v4586_v11 }
 0x160   :  { %3986 = vst [vmem:[%s7795_s4 + $0x100] sm:$0xff] %v3886_v29  ;;  %vm4086_vm14 = vcmp.gt.f32.partialorder %v3886_v29, 1.0  ;;  %v3887_v39 = vsub.f32 %v3487_v27, %v4885_v30  ;;  %v6334_v40 = vsub.f32 %v1305_v31, %v4885_v30  ;;  %v3384_v42 = vld [vmem:[%s7795_s4 + $0xf0] sm:$0xf]  ;;  %v3490_v45 = vadd.f32 %v6322_v35, %v6235_v24 }
 0x161   :  { %3981 = vst [vmem:[%s7795_s4 + $0xd8] sm:$0xf] %v3881_v12  ;;  %vm4081_vm13 = vcmp.gt.f32.partialorder %v3881_v12, 1.0  ;;  %v3385_v43 = vld [vmem:[%s7795_s4 + $0xf8] sm:$0xf]  ;;  %v4984_v44 = vsel %vm4086_vm14, 1.0, %v5425_v0  ;;  %v3484_v47 = vadd.f32 %v3384_v42, %v3284_v28  ;;  %v1195_v55 = vsub.f32 %v1179_v37, %v4587_v13 }
 0x162   :  { %v4979_v41 = vsel %vm4081_vm13, 1.0, %v5425_v0  ;;  %vm3584_vm15 = vcmp.gt.f32.partialorder %v3384_v42, 1.0  ;;  %v3485_v48 = vadd.f32 %v3385_v43, %v3285_v38  ;;  %vm3585_vm0 = vcmp.gt.f32.partialorder %v3385_v43, 1.0  ;;  %4386 = vst [vmem:[%s7794_s3 + $0x100] sm:$0xff] %v4984_v44  ;;  %3987 = vst [vmem:[%s7795_s4 + $0x108] sm:$0xff] %v3887_v39 }
 0x163   :  { %4381 = vst [vmem:[%s7794_s3 + $0xd8] sm:$0xf] %v4979_v41  ;;  %v4882_v49 = vsel %vm3584_vm15, 1.0, %v5425_v0  ;;  %v4883_v24 = vsel %vm3585_vm0, 1.0, %v5425_v0  ;;  %vm3590_vm1 = vcmp.gt.f32.partialorder %v6322_v35, 1.0  ;;  %vm4087_vm2 = vcmp.gt.f32.partialorder %v3887_v39, 1.0 }
 0x164   :  { %4594 = vst [vmem:[%s7795_s4 + $0x110] sm:$0xf] %v1194_v46  ;;  %v3884_v32 = vsub.f32 %v3484_v47, %v4882_v49  ;;  %v3885_v52 = vsub.f32 %v3485_v48, %v4883_v24  ;;  %v4888_v50 = vsel %vm3590_vm1, 1.0, %v5425_v0  ;;  %v4985_v51 = vsel %vm4087_vm2, 1.0, %v5425_v0  ;;  %4595 = vst [vmem:[%s7795_s4 + $0x118] sm:$0xf] %v1195_v55 }
 0x165   :  { %v3890_v53 = vsub.f32 %v3490_v45, %v4888_v50  ;;  %4387 = vst [vmem:[%s7794_s3 + $0x108] sm:$0xff] %v4985_v51  ;;  %v3491_v54 = vadd.f32 %v6334_v40, %v6255_v56  ;;  %vm3591_vm3 = vcmp.gt.f32.partialorder %v6334_v40, 1.0  ;;  %v1306_v59 = vadd.f32 %v6283_v9, %v1194_v46  ;;  %v6379_v60 = vpop.f32.mrb[24].mxu0  ;;  %v3288_v4 = vld [vmem:[%s7794_s3 + $0x110] sm:$0xf] }
 0x166   :  { %3984 = vst [vmem:[%s7795_s4 + $0xf0] sm:$0xf] %v3884_v32  ;;  %vm4084_vm4 = vcmp.gt.f32.partialorder %v3884_v32, 1.0  ;;  %3985 = vst [vmem:[%s7795_s4 + $0xf8] sm:$0xf] %v3885_v52  ;;  %vm4085_vm5 = vcmp.gt.f32.partialorder %v3885_v52, 1.0  ;;  %v1302_v6 = vadd.f32 %v6183_v34, %v5698_v15  ;;  %v1422_v13 = vadd.f32 %v6257_v57, %v5692_v14 }
 0x167   :  { %v6376_v58 = vsel %vm3591_vm3, 1.0, %v5425_v0  ;;  %v4982_v56 = vsel %vm4084_vm4, 1.0, %v5425_v0  ;;  %v4983_v7 = vsel %vm4085_vm5, 1.0, %v5425_v0  ;;  %3990 = vst [vmem:[%s7795_s4 + $0x120] sm:$0xff] %v3890_v53  ;;  %vm4090_vm6 = vcmp.gt.f32.partialorder %v3890_v53, 1.0  ;;  %v6390_v63 = vpop.f32.mrb[24].mxu1 }
 0x168   :  { %v3891_v1 = vsub.f32 %v3491_v54, %v6376_v58  ;;  %v6392_v2 = vpop.f32.mrb[25].mxu0  ;;  %4384 = vst [vmem:[%s7794_s3 + $0xf0] sm:$0xf] %v4982_v56  ;;  %4385 = vst [vmem:[%s7794_s3 + $0xf8] sm:$0xf] %v4983_v7  ;;  %v4988_v3 = vsel %vm4090_vm6, 1.0, %v5425_v0  ;;  %v1307_v19 = vadd.f32 %v1302_v6, %v1195_v55  ;;  %v6427_v22 = vadd.f32 %v6261_v61, %v5692_v14 }
 0x169   :  { %vm1310_vm7 = vcmp.gt.f32.partialorder %v1194_v46, 1.0  ;;  %vm1311_vm8 = vcmp.gt.f32.partialorder %v1195_v55, 1.0  ;;  %v6406_v9 = vpop.f32.mrb[25].mxu1  ;;  %4390 = vst [vmem:[%s7794_s3 + $0x120] sm:$0xff] %v4988_v3  ;;  %4607 = vst [vmem:[%s7794_s3 + $0x138] sm:$0xf] %v1302_v6  ;;  %v1432_v26 = vadd.f32 %v1422_v13, %v6322_v35  ;;  %v1424_v27 = vadd.f32 %v6263_v62, %v5692_v14 }
 0x16a   :  { %3991 = vst [vmem:[%s7795_s4 + $0x128] sm:$0xff] %v3891_v1  ;;  %vm4091_vm9 = vcmp.gt.f32.partialorder %v3891_v1, 1.0  ;;  %v4602_v10 = vsel %vm1310_vm7, 1.0, %v5425_v0  ;;  %v4603_v11 = vsel %vm1311_vm8, 1.0, %v5425_v0  ;;  %v6429_v23 = vpop.f32.mrb[26].mxu0  ;;  %v6437_v12 = vpop.f32.mrb[26].mxu1  ;;  %v6452_v35 = vadd.f32 %v6273_v5, %v5692_v14 }
 0x16b   :  { %v4989_v34 = vsel %vm4091_vm9, 1.0, %v5425_v0  ;;  %v3388_v16 = vld [vmem:[%s7795_s4 + $0x110] sm:$0xf]  ;;  %v1322_v18 = vsub.f32 %v1306_v59, %v4602_v10  ;;  %v6439_v29 = vpop.f32.mrb[27].mxu0  ;;  %v3289_v31 = vld [vmem:[%s7794_s3 + $0x118] sm:$0xf]  ;;  %v6448_v28 = vsub.f32 %v1307_v19, %v4603_v11  ;;  %v1428_v62 = vadd.f32 %v6299_v17, %v5698_v15 }
 0x16c   :  { %4391 = vst [vmem:[%s7794_s3 + $0x128] sm:$0xff] %v4989_v34  ;;  %v3488_v57 = vadd.f32 %v3388_v16, %v3288_v4  ;;  %vm3588_vm10 = vcmp.gt.f32.partialorder %v3388_v16, 1.0  ;;  %v6456_v30 = vpop.f32.mrb[27].mxu1  ;;  %v1448_v37 = vsub.f32 %v1432_v26, %v4888_v50  ;;  %v1433_v38 = vadd.f32 %v1424_v27, %v6334_v40  ;;  %v3389_v39 = vld [vmem:[%s7795_s4 + $0x118] sm:$0xf] }
 0x16d   :  { %v4886_v61 = vsel %vm3588_vm10, 1.0, %v5425_v0  ;;  %4610 = vst [vmem:[%s7795_s4 + $0x130] sm:$0xf] %v1322_v18  ;;  %vm1438_vm11 = vcmp.gt.f32.partialorder %v1322_v18, 1.0  ;;  %4611 = vst [vmem:[%s7795_s4 + $0x138] sm:$0xf] %v6448_v28  ;;  %v1434_v5 = vadd.f32 %v1428_v62, %v1322_v18  ;;  %v6473_v17 = vadd.f32 %v6306_v20, %v5698_v15 }
 0x16e   :  { %v3888_v36 = vsub.f32 %v3488_v57, %v4886_v61  ;;  %v4618_v41 = vsel %vm1438_vm11, 1.0, %v5425_v0  ;;  %4622 = vst [vmem:[%s7794_s3 + $0x150] sm:$0xf] %v1428_v62  ;;  %vm3560_vm12 = vcmp.gt.f32.partialorder %v5892_v8, 1.0  ;;  %v3489_v40 = vadd.f32 %v3389_v39, %v3289_v31  ;;  %v3292_v46 = vld [vmem:[%s7794_s3 + $0x130] sm:$0xf] }
 0x16f   :  { %vm3589_vm14 = vcmp.gt.f32.partialorder %v3389_v39, 1.0  ;;  %v3494_v42 = vadd.f32 %v1448_v37, %v1422_v13  ;;  %vm3594_vm15 = vcmp.gt.f32.partialorder %v1448_v37, 1.0  ;;  %v1560_v45 = vadd.f32 %v6427_v22, %v1448_v37  ;;  %4638 = vst [vmem:[%s7794_s3 + $0x170] sm:$0xf] %v6473_v17 }
 0x170   :  { %3988 = vst [vmem:[%s7795_s4 + $0x110] sm:$0xf] %v3888_v36  ;;  %vm4088_vm13 = vcmp.gt.f32.partialorder %v3888_v36, 1.0  ;;  %v4887_v44 = vsel %vm3589_vm14, 1.0, %v5425_v0  ;;  %v4892_v47 = vsel %vm3594_vm15, 1.0, %v5425_v0  ;;  %v1449_v48 = vsub.f32 %v1433_v38, %v6376_v58 }
 0x171   :  { %v4986_v43 = vsel %vm4088_vm13, 1.0, %v5425_v0  ;;  %v3889_v20 = vsub.f32 %v3489_v40, %v4887_v44  ;;  %v6493_v49 = vsub.f32 %v1434_v5, %v4618_v41  ;;  %v3894_v24 = vsub.f32 %v3494_v42, %v4892_v47  ;;  %v3293_v55 = vld [vmem:[%s7794_s3 + $0x138] sm:$0xf] }
 0x172   :  { %4388 = vst [vmem:[%s7794_s3 + $0x110] sm:$0xf] %v4986_v43  ;;  %v6495_v32 = vsub.f32 %v1560_v45, %v4892_v47  ;;  %v4858_v52 = vsel %vm3560_vm12, 1.0, %v5425_v0  ;;  %v6502_v50 = vadd.f32 %v6308_v21, %v5698_v15  ;;  %v3495_v53 = vadd.f32 %v1449_v48, %v1424_v27 }
 0x173   :  { %3989 = vst [vmem:[%s7795_s4 + $0x118] sm:$0xf] %v3889_v20  ;;  %vm4089_vm0 = vcmp.gt.f32.partialorder %v3889_v20, 1.0  ;;  %vm3595_vm1 = vcmp.gt.f32.partialorder %v1449_v48, 1.0  ;;  %v1561_v54 = vadd.f32 %v6452_v35, %v1449_v48  ;;  %4626 = vst [vmem:[%s7795_s4 + $0x150] sm:$0xf] %v6493_v49  ;;  %v3860_v18 = vsub.f32 %v5929_v25, %v4858_v52 }
 0x174   :  { %v3392_v51 = vld [vmem:[%s7795_s4 + $0x130] sm:$0xf]  ;;  %v4987_v8 = vsel %vm4089_vm0, 1.0, %v5425_v0  ;;  %3994 = vst [vmem:[%s7795_s4 + $0x140] sm:$0xff] %v3894_v24  ;;  %vm4094_vm3 = vcmp.gt.f32.partialorder %v3894_v24, 1.0  ;;  %v3498_v7 = vadd.f32 %v6495_v32, %v6427_v22  ;;  %vm3598_vm4 = vcmp.gt.f32.partialorder %v6495_v32, 1.0 }
 0x175   :  { %v3492_v21 = vadd.f32 %v3392_v51, %v3292_v46  ;;  %vm3592_vm2 = vcmp.gt.f32.partialorder %v3392_v51, 1.0  ;;  %4623 = vst [vmem:[%s7794_s3 + $0x158] sm:$0xf] %v6502_v50  ;;  %4389 = vst [vmem:[%s7794_s3 + $0x118] sm:$0xf] %v4987_v8  ;;  %v4992_v56 = vsel %vm4094_vm3, 1.0, %v5425_v0  ;;  %v1562_v61 = vadd.f32 %v6473_v17, %v6493_v49 }
 0x176   :  { %v4890_v58 = vsel %vm3592_vm2, 1.0, %v5425_v0  ;;  %v3393_v59 = vld [vmem:[%s7795_s4 + $0x138] sm:$0xf]  ;;  %v6537_v1 = vpop.f32.mrb[28].mxu0  ;;  %4394 = vst [vmem:[%s7794_s3 + $0x140] sm:$0xff] %v4992_v56  ;;  %v6543_v6 = vsel %vm3598_vm4, 1.0, %v5425_v0  ;;  %v1435_v20 = vadd.f32 %v6502_v50, %v6448_v28  ;;  %v1558_v48 = vadd.f32 %v6317_v33, %v5698_v15 }
 0x177   :  { %v3892_v3 = vsub.f32 %v3492_v21, %v4890_v58  ;;  %v3493_v4 = vadd.f32 %v3393_v59, %v3293_v55  ;;  %vm3593_vm5 = vcmp.gt.f32.partialorder %v3393_v59, 1.0  ;;  %v6545_v10 = vpop.f32.mrb[28].mxu1  ;;  %v6547_v11 = vpop.f32.mrb[29].mxu0  ;;  %v3898_v34 = vsub.f32 %v3498_v7, %v6543_v6  ;;  %v3296_v25 = vld [vmem:[%s7794_s3 + $0x150] sm:$0xf] }
 0x178   :  { %v4891_v13 = vsel %vm3593_vm5, 1.0, %v5425_v0  ;;  %v4893_v16 = vsel %vm3595_vm1, 1.0, %v5425_v0  ;;  %v6554_v19 = vpop.f32.mrb[29].mxu1  ;;  %3960 = vst [vmem:[%s7795_s4 + $0x30] sm:$0xf] %v3860_v18  ;;  %vm4060_vm8 = vcmp.gt.f32.partialorder %v3860_v18, 1.0  ;;  %v1678_v24 = vadd.f32 %v6379_v60, %v5692_v14 }
 0x179   :  { %3992 = vst [vmem:[%s7795_s4 + $0x130] sm:$0xf] %v3892_v3  ;;  %vm4092_vm6 = vcmp.gt.f32.partialorder %v3892_v3, 1.0  ;;  %v3893_v22 = vsub.f32 %v3493_v4, %v4891_v13  ;;  %v3895_v57 = vsub.f32 %v3495_v53, %v4893_v16  ;;  %v1577_v26 = vsub.f32 %v1561_v54, %v4893_v16  ;;  %3998 = vst [vmem:[%s7795_s4 + $0x160] sm:$0xff] %v3898_v34  ;;  %v6571_v31 = vpop.f32.mrb[30].mxu0  ;;  %v6587_v38 = vpop.f32.mrb[30].mxu1 }
 0x17a   :  { %v4990_v27 = vsel %vm4092_vm6, 1.0, %v5425_v0  ;;  %vm4098_vm7 = vcmp.gt.f32.partialorder %v3898_v34, 1.0  ;;  %v3396_v37 = vld [vmem:[%s7795_s4 + $0x150] sm:$0xf]  ;;  %v6594_v17 = vpop.f32.mrb[31].mxu0  ;;  %v4958_v40 = vsel %vm4060_vm8, 1.0, %v5425_v0  ;;  %v1806_v52 = vadd.f32 %v6390_v63, %v5692_v14 }
 0x17b   :  { %4392 = vst [vmem:[%s7794_s3 + $0x130] sm:$0xf] %v4990_v27  ;;  %3993 = vst [vmem:[%s7795_s4 + $0x138] sm:$0xf] %v3893_v22  ;;  %vm4093_vm9 = vcmp.gt.f32.partialorder %v3893_v22, 1.0  ;;  %v4996_v62 = vsel %vm4098_vm7, 1.0, %v5425_v0  ;;  %v3499_v36 = vadd.f32 %v1577_v26, %v6452_v35  ;;  %v3496_v41 = vadd.f32 %v3396_v37, %v3296_v25 }
 0x17c   :  { %3995 = vst [vmem:[%s7795_s4 + $0x148] sm:$0xff] %v3895_v57  ;;  %vm4095_vm10 = vcmp.gt.f32.partialorder %v3895_v57, 1.0  ;;  %v4991_v39 = vsel %vm4093_vm9, 1.0, %v5425_v0  ;;  %4398 = vst [vmem:[%s7794_s3 + $0x160] sm:$0xff] %v4996_v62  ;;  %vm3599_vm11 = vcmp.gt.f32.partialorder %v1577_v26, 1.0  ;;  %vm3596_vm12 = vcmp.gt.f32.partialorder %v3396_v37, 1.0 }
 0x17d   :  { %v4993_v5 = vsel %vm4095_vm10, 1.0, %v5425_v0  ;;  %4393 = vst [vmem:[%s7794_s3 + $0x138] sm:$0xf] %v4991_v39  ;;  %v4897_v35 = vsel %vm3599_vm11, 1.0, %v5425_v0  ;;  %vm1566_vm13 = vcmp.gt.f32.partialorder %v6493_v49, 1.0  ;;  %v6606_v42 = vpop.f32.mrb[31].mxu1  ;;  %v1680_v60 = vadd.f32 %v6392_v2, %v5692_v14 }
 0x17e   :  { %4395 = vst [vmem:[%s7794_s3 + $0x148] sm:$0xff] %v4993_v5  ;;  %v3899_v43 = vsub.f32 %v3499_v36, %v4897_v35  ;;  %v4894_v44 = vsel %vm3596_vm12, 1.0, %v5425_v0  ;;  %4360 = vst [vmem:[%s7794_s3 + $0x30] sm:$0xf] %v4958_v40  ;;  %v4634_v45 = vsel %vm1566_vm13, 1.0, %v5425_v0  ;;  %vm1439_vm14 = vcmp.gt.f32.partialorder %v6448_v28, 1.0 }
 0x17f   :  { %v3896_v46 = vsub.f32 %v3496_v41, %v4894_v44  ;;  %v1578_v47 = vsub.f32 %v1562_v61, %v4634_v45  ;;  %v4619_v49 = vsel %vm1439_vm14, 1.0, %v5425_v0  ;;  %4639 = vst [vmem:[%s7794_s3 + $0x178] sm:$0xf] %v1558_v48  ;;  %v1688_v28 = vadd.f32 %v1678_v24, %v6495_v32  ;;  %v3300_v18 = vld [vmem:[%s7794_s3 + $0x170] sm:$0xf] }
 0x180   :  { %3999 = vst [vmem:[%s7795_s4 + $0x168] sm:$0xff] %v3899_v43  ;;  %vm4099_vm15 = vcmp.gt.f32.partialorder %v3899_v43, 1.0  ;;  %v1451_v33 = vsub.f32 %v1435_v20, %v4619_v49  ;;  %v6645_v51 = vadd.f32 %v6406_v9, %v5692_v14  ;;  %v1684_v53 = vadd.f32 %v6429_v23, %v5698_v15  ;;  %v3297_v62 = vld [vmem:[%s7794_s3 + $0x158] sm:$0xf] }
 0x181   :  { %v4997_v50 = vsel %vm4099_vm15, 1.0, %v5425_v0  ;;  %3996 = vst [vmem:[%s7795_s4 + $0x150] sm:$0xf] %v3896_v46  ;;  %vm4096_vm0 = vcmp.gt.f32.partialorder %v3896_v46, 1.0  ;;  %4642 = vst [vmem:[%s7795_s4 + $0x170] sm:$0xf] %v1578_v47  ;;  %v1689_v54 = vadd.f32 %v1680_v60, %v1577_v26  ;;  %v1704_v9 = vsub.f32 %v1688_v28, %v6543_v6 }
 0x182   :  { %4399 = vst [vmem:[%s7794_s3 + $0x168] sm:$0xff] %v4997_v50  ;;  %v4994_v63 = vsel %vm4096_vm0, 1.0, %v5425_v0  ;;  %4627 = vst [vmem:[%s7795_s4 + $0x158] sm:$0xf] %v1451_v33  ;;  %v1563_v2 = vadd.f32 %v1558_v48, %v1451_v33  ;;  %vm1567_vm1 = vcmp.gt.f32.partialorder %v1451_v33, 1.0  ;;  %vm1694_vm2 = vcmp.gt.f32.partialorder %v1578_v47, 1.0 }
 0x183   :  { %4396 = vst [vmem:[%s7794_s3 + $0x150] sm:$0xf] %v4994_v63  ;;  %v4635_v32 = vsel %vm1567_vm1, 1.0, %v5425_v0  ;;  %v1690_v8 = vadd.f32 %v1684_v53, %v1578_v47  ;;  %v4650_v21 = vsel %vm1694_vm2, 1.0, %v5425_v0  ;;  %4654 = vst [vmem:[%s7794_s3 + $0x190] sm:$0xf] %v1684_v53  ;;  %v1705_v55 = vsub.f32 %v1689_v54, %v4897_v35 }
 0x184   :  { %v6661_v23 = vsub.f32 %v1563_v2, %v4635_v32  ;;  %v1812_v58 = vadd.f32 %v6437_v12, %v5698_v15  ;;  %v1686_v59 = vadd.f32 %v6439_v29, %v5698_v15  ;;  %v6667_v56 = vpop.f32.mrb[32].mxu0  ;;  %v3502_v7 = vadd.f32 %v1704_v9, %v1678_v24  ;;  %v6671_v6 = vpop.f32.mrb[32].mxu1 }
 0x185   :  { %vm3602_vm3 = vcmp.gt.f32.partialorder %v1704_v9, 1.0  ;;  %v1816_v3 = vadd.f32 %v1806_v52, %v1704_v9  ;;  %v6669_v4 = vsub.f32 %v1690_v8, %v4650_v21  ;;  %v6673_v13 = vpop.f32.mrb[33].mxu0  ;;  %v3503_v34 = vadd.f32 %v1705_v55, %v1680_v60  ;;  %v6687_v16 = vpop.f32.mrb[33].mxu1 }
 0x186   :  { %4643 = vst [vmem:[%s7795_s4 + $0x178] sm:$0xf] %v6661_v23  ;;  %v4900_v12 = vsel %vm3602_vm3, 1.0, %v5425_v0  ;;  %vm3603_vm4 = vcmp.gt.f32.partialorder %v1705_v55, 1.0  ;;  %v1817_v29 = vadd.f32 %v6645_v51, %v1705_v55  ;;  %4670 = vst [vmem:[%s7794_s3 + $0x1b0] sm:$0xf] %v1812_v58  ;;  %v1691_v28 = vadd.f32 %v1686_v59, %v6661_v23 }
 0x187   :  { %4655 = vst [vmem:[%s7794_s3 + $0x198] sm:$0xf] %v1686_v59  ;;  %v3902_v57 = vsub.f32 %v3502_v7, %v4900_v12  ;;  %v6695_v26 = vsub.f32 %v1816_v3, %v4900_v12  ;;  %v4901_v27 = vsel %vm3603_vm4, 1.0, %v5425_v0  ;;  %4658 = vst [vmem:[%s7795_s4 + $0x190] sm:$0xf] %v6669_v4  ;;  %v6703_v25 = vadd.f32 %v1812_v58, %v6669_v4  ;;  %v6710_v39 = vpop.f32.mrb[34].mxu0 }
 0x188   :  { %v3400_v22 = vld [vmem:[%s7795_s4 + $0x170] sm:$0xf]  ;;  %v3903_v36 = vsub.f32 %v3503_v34, %v4901_v27  ;;  %v6708_v37 = vsub.f32 %v1817_v29, %v4901_v27  ;;  %v6721_v40 = vpop.f32.mrb[34].mxu1  ;;  %v6727_v20 = vpop.f32.mrb[35].mxu0  ;;  %vm1822_vm12 = vcmp.gt.f32.partialorder %v6669_v4, 1.0  ;;  %vm1695_vm1 = vcmp.gt.f32.partialorder %v6661_v23, 1.0 }
 0x189   :  { %v3500_v61 = vadd.f32 %v3400_v22, %v3300_v18  ;;  %vm3600_vm5 = vcmp.gt.f32.partialorder %v3400_v22, 1.0  ;;  %v3397_v41 = vld [vmem:[%s7795_s4 + $0x158] sm:$0xf]  ;;  %4002 = vst [vmem:[%s7795_s4 + $0x180] sm:$0xff] %v3902_v57  ;;  %vm4102_vm6 = vcmp.gt.f32.partialorder %v3902_v57, 1.0  ;;  %v3506_v35 = vadd.f32 %v6695_v26, %v1806_v52  ;;  %v6729_v46 = vpop.f32.mrb[35].mxu1 }
 0x18a   :  { %v4898_v5 = vsel %vm3600_vm5, 1.0, %v5425_v0  ;;  %vm3606_vm7 = vcmp.gt.f32.partialorder %v6695_v26, 1.0  ;;  %v3497_v44 = vadd.f32 %v3397_v41, %v3297_v62  ;;  %vm3597_vm8 = vcmp.gt.f32.partialorder %v3397_v41, 1.0  ;;  %4003 = vst [vmem:[%s7795_s4 + $0x188] sm:$0xff] %v3903_v36  ;;  %v3301_v52 = vld [vmem:[%s7794_s3 + $0x178] sm:$0xf] }
 0x18b   :  { %v3900_v43 = vsub.f32 %v3500_v61, %v4898_v5  ;;  %v5000_v45 = vsel %vm4102_vm6, 1.0, %v5425_v0  ;;  %v4895_v47 = vsel %vm3597_vm8, 1.0, %v5425_v0  ;;  %v6736_v48 = vsel %vm3606_vm7, 1.0, %v5425_v0  ;;  %v3304_v8 = vld [vmem:[%s7794_s3 + $0x190] sm:$0xf] }
 0x18c   :  { %4402 = vst [vmem:[%s7794_s3 + $0x180] sm:$0xff] %v5000_v45  ;;  %vm4103_vm9 = vcmp.gt.f32.partialorder %v3903_v36, 1.0  ;;  %v3507_v49 = vadd.f32 %v6708_v37, %v6645_v51  ;;  %v3897_v24 = vsub.f32 %v3497_v44, %v4895_v47  ;;  %v3906_v50 = vsub.f32 %v3506_v35, %v6736_v48 }
 0x18d   :  { %4000 = vst [vmem:[%s7795_s4 + $0x170] sm:$0xf] %v3900_v43  ;;  %vm4100_vm10 = vcmp.gt.f32.partialorder %v3900_v43, 1.0  ;;  %v5001_v33 = vsel %vm4103_vm9, 1.0, %v5425_v0  ;;  %v3401_v63 = vld [vmem:[%s7795_s4 + $0x178] sm:$0xf]  ;;  %v1814_v3 = vadd.f32 %v6456_v30, %v5698_v15  ;;  %v1934_v30 = vadd.f32 %v6537_v1, %v5692_v14 }
 0x18e   :  { %v4998_v60 = vsel %vm4100_vm10, 1.0, %v5425_v0  ;;  %4403 = vst [vmem:[%s7794_s3 + $0x188] sm:$0xff] %v5001_v33  ;;  %vm3607_vm11 = vcmp.gt.f32.partialorder %v6708_v37, 1.0  ;;  %3997 = vst [vmem:[%s7795_s4 + $0x158] sm:$0xf] %v3897_v24  ;;  %vm4097_vm13 = vcmp.gt.f32.partialorder %v3897_v24, 1.0  ;;  %v3501_v51 = vadd.f32 %v3401_v63, %v3301_v52 }
 0x18f   :  { %4400 = vst [vmem:[%s7794_s3 + $0x170] sm:$0xf] %v4998_v60  ;;  %vm3601_vm14 = vcmp.gt.f32.partialorder %v3401_v63, 1.0  ;;  %4006 = vst [vmem:[%s7795_s4 + $0x1a0] sm:$0xff] %v3906_v50  ;;  %vm4106_vm15 = vcmp.gt.f32.partialorder %v3906_v50, 1.0  ;;  %v4995_v2 = vsel %vm4097_vm13, 1.0, %v5425_v0  ;;  %v2062_v22 = vadd.f32 %v6545_v10, %v5692_v14 }
 0x190   :  { %v3404_v53 = vld [vmem:[%s7795_s4 + $0x190] sm:$0xf]  ;;  %v4899_v54 = vsel %vm3601_vm14, 1.0, %v5425_v0  ;;  %v5004_v32 = vsel %vm4106_vm15, 1.0, %v5425_v0  ;;  %v4905_v9 = vsel %vm3607_vm11, 1.0, %v5425_v0  ;;  %v4666_v7 = vsel %vm1822_vm12, 1.0, %v5425_v0 }
 0x191   :  { %4397 = vst [vmem:[%s7794_s3 + $0x158] sm:$0xf] %v4995_v2  ;;  %v3901_v21 = vsub.f32 %v3501_v51, %v4899_v54  ;;  %4406 = vst [vmem:[%s7794_s3 + $0x1a0] sm:$0xff] %v5004_v32  ;;  %v3907_v55 = vsub.f32 %v3507_v49, %v4905_v9  ;;  %v3504_v58 = vadd.f32 %v3404_v53, %v3304_v8  ;;  %vm3604_vm0 = vcmp.gt.f32.partialorder %v3404_v53, 1.0  ;;  %v3308_v63 = vld [vmem:[%s7794_s3 + $0x1b0] sm:$0xf] }
 0x192   :  { %v4902_v59 = vsel %vm3604_vm0, 1.0, %v5425_v0  ;;  %v1834_v34 = vsub.f32 %v6703_v25, %v4666_v7  ;;  %v4651_v29 = vsel %vm1695_vm1, 1.0, %v5425_v0  ;;  %4671 = vst [vmem:[%s7794_s3 + $0x1b8] sm:$0xf] %v1814_v3  ;;  %v6805_v18 = vpop.f32.mrb[36].mxu0  ;;  %v1936_v57 = vadd.f32 %v6547_v11, %v5692_v14 }
 0x193   :  { %4001 = vst [vmem:[%s7795_s4 + $0x178] sm:$0xf] %v3901_v21  ;;  %vm4101_vm2 = vcmp.gt.f32.partialorder %v3901_v21, 1.0  ;;  %4007 = vst [vmem:[%s7795_s4 + $0x1a8] sm:$0xff] %v3907_v55  ;;  %vm4107_vm3 = vcmp.gt.f32.partialorder %v3907_v55, 1.0  ;;  %v3904_v12 = vsub.f32 %v3504_v58, %v4902_v59  ;;  %v1707_v1 = vsub.f32 %v1691_v28, %v4651_v29  ;;  %v6823_v27 = vpop.f32.mrb[36].mxu1 }
 0x194   :  { %v4999_v4 = vsel %vm4101_vm2, 1.0, %v5425_v0  ;;  %v5005_v23 = vsel %vm4107_vm3, 1.0, %v5425_v0  ;;  %4674 = vst [vmem:[%s7795_s4 + $0x1b0] sm:$0xf] %v1834_v34  ;;  %v6825_v25 = vpop.f32.mrb[37].mxu0  ;;  %v1944_v62 = vadd.f32 %v1934_v30, %v6695_v26  ;;  %v2064_v36 = vadd.f32 %v6554_v19, %v5692_v14  ;;  %v6833_v41 = vpop.f32.mrb[37].mxu1 }
 0x195   :  { %4401 = vst [vmem:[%s7794_s3 + $0x178] sm:$0xf] %v4999_v4  ;;  %4407 = vst [vmem:[%s7794_s3 + $0x1a8] sm:$0xff] %v5005_v23  ;;  %vm4104_vm4 = vcmp.gt.f32.partialorder %v3904_v12, 1.0  ;;  %v1940_v5 = vadd.f32 %v6571_v31, %v5698_v15  ;;  %v1819_v10 = vadd.f32 %v1814_v3, %v1707_v1  ;;  %vm1823_vm5 = vcmp.gt.f32.partialorder %v1707_v1, 1.0 }
 0x196   :  { %4004 = vst [vmem:[%s7795_s4 + $0x190] sm:$0xf] %v3904_v12  ;;  %v5002_v61 = vsel %vm4104_vm4, 1.0, %v5425_v0  ;;  %4659 = vst [vmem:[%s7795_s4 + $0x198] sm:$0xf] %v1707_v1  ;;  %v1945_v11 = vadd.f32 %v1936_v57, %v6708_v37  ;;  %vm1950_vm6 = vcmp.gt.f32.partialorder %v1834_v34, 1.0  ;;  %v1960_v26 = vsub.f32 %v1944_v62, %v6736_v48 }
 0x197   :  { %4404 = vst [vmem:[%s7794_s3 + $0x190] sm:$0xf] %v5002_v61  ;;  %v4667_v19 = vsel %vm1823_vm5, 1.0, %v5425_v0  ;;  %v1946_v31 = vadd.f32 %v1940_v5, %v1834_v34  ;;  %v4682_v35 = vsel %vm1950_vm6, 1.0, %v5425_v0  ;;  %4686 = vst [vmem:[%s7794_s3 + $0x1d0] sm:$0xf] %v1940_v5  ;;  %v2068_v37 = vadd.f32 %v6587_v38, %v5698_v15 }
 0x198   :  { %v6848_v43 = vpop.f32.mrb[38].mxu0  ;;  %v6850_v44 = vsub.f32 %v1819_v10, %v4667_v19  ;;  %v1961_v45 = vsub.f32 %v1945_v11, %v4905_v9  ;;  %v1942_v47 = vadd.f32 %v6594_v17, %v5698_v15  ;;  %v6856_v49 = vpop.f32.mrb[38].mxu1  ;;  %v3510_v24 = vadd.f32 %v1960_v26, %v1934_v30  ;;  %v3305_v9 = vld [vmem:[%s7794_s3 + $0x198] sm:$0xf] }
 0x199   :  { %v6858_v48 = vpop.f32.mrb[39].mxu0  ;;  %vm3610_vm7 = vcmp.gt.f32.partialorder %v1960_v26, 1.0  ;;  %v2072_v52 = vadd.f32 %v2062_v22, %v1960_v26  ;;  %v6860_v50 = vsub.f32 %v1946_v31, %v4682_v35  ;;  %v6862_v33 = vpop.f32.mrb[39].mxu1  ;;  %4702 = vst [vmem:[%s7794_s3 + $0x1f0] sm:$0xf] %v2068_v37 }
 0x19a   :  { %4675 = vst [vmem:[%s7795_s4 + $0x1b8] sm:$0xf] %v6850_v44  ;;  %v4908_v38 = vsel %vm3610_vm7, 1.0, %v5425_v0  ;;  %v3511_v60 = vadd.f32 %v1961_v45, %v1936_v57  ;;  %vm3611_vm8 = vcmp.gt.f32.partialorder %v1961_v45, 1.0  ;;  %v2073_v17 = vadd.f32 %v2064_v36, %v1961_v45  ;;  %4687 = vst [vmem:[%s7794_s3 + $0x1d8] sm:$0xf] %v1942_v47 }
 0x19b   :  { %v3408_v28 = vld [vmem:[%s7795_s4 + $0x1b0] sm:$0xf]  ;;  %v3910_v51 = vsub.f32 %v3510_v24, %v4908_v38  ;;  %v6881_v53 = vsub.f32 %v2072_v52, %v4908_v38  ;;  %v4909_v2 = vsel %vm3611_vm8, 1.0, %v5425_v0  ;;  %4690 = vst [vmem:[%s7795_s4 + $0x1d0] sm:$0xf] %v6860_v50  ;;  %v6889_v54 = vadd.f32 %v2068_v37, %v6860_v50 }
 0x19c   :  { %v3508_v32 = vadd.f32 %v3408_v28, %v3308_v63  ;;  %vm3608_vm9 = vcmp.gt.f32.partialorder %v3408_v28, 1.0  ;;  %v3911_v8 = vsub.f32 %v3511_v60, %v4909_v2  ;;  %v6894_v21 = vsub.f32 %v2073_v17, %v4909_v2  ;;  %v3309_v30 = vld [vmem:[%s7794_s3 + $0x1b8] sm:$0xf] }
 0x19d   :  { %v4906_v55 = vsel %vm3608_vm9, 1.0, %v5425_v0  ;;  %v3405_v58 = vld [vmem:[%s7795_s4 + $0x198] sm:$0xf]  ;;  %4010 = vst [vmem:[%s7795_s4 + $0x1c0] sm:$0xff] %v3910_v51  ;;  %vm4110_vm10 = vcmp.gt.f32.partialorder %v3910_v51, 1.0  ;;  %v3514_v59 = vadd.f32 %v6881_v53, %v2062_v22  ;;  %vm3614_vm11 = vcmp.gt.f32.partialorder %v6881_v53, 1.0 }
 0x19e   :  { %v3908_v7 = vsub.f32 %v3508_v32, %v4906_v55  ;;  %v3505_v3 = vadd.f32 %v3405_v58, %v3305_v9  ;;  %vm3605_vm12 = vcmp.gt.f32.partialorder %v3405_v58, 1.0  ;;  %v5008_v12 = vsel %vm4110_vm10, 1.0, %v5425_v0  ;;  %4011 = vst [vmem:[%s7795_s4 + $0x1c8] sm:$0xff] %v3911_v8  ;;  %v3312_v35 = vld [vmem:[%s7794_s3 + $0x1d0] sm:$0xf] }
 0x19f   :  { %v4903_v34 = vsel %vm3605_vm12, 1.0, %v5425_v0  ;;  %4410 = vst [vmem:[%s7794_s3 + $0x1c0] sm:$0xff] %v5008_v12  ;;  %v6914_v4 = vsel %vm3614_vm11, 1.0, %v5425_v0  ;;  %vm4111_vm13 = vcmp.gt.f32.partialorder %v3911_v8, 1.0  ;;  %v3515_v23 = vadd.f32 %v6894_v21, %v2064_v36 }
 0x1a0   :  { %4008 = vst [vmem:[%s7795_s4 + $0x1b0] sm:$0xf] %v3908_v7  ;;  %vm4108_vm14 = vcmp.gt.f32.partialorder %v3908_v7, 1.0  ;;  %v3905_v29 = vsub.f32 %v3505_v3, %v4903_v34  ;;  %v3914_v1 = vsub.f32 %v3514_v59, %v6914_v4  ;;  %v5009_v22 = vsel %vm4111_vm13, 1.0, %v5425_v0 }
 0x1a1   :  { %v5006_v57 = vsel %vm4108_vm14, 1.0, %v5425_v0  ;;  %v3409_v61 = vld [vmem:[%s7795_s4 + $0x1b8] sm:$0xf]  ;;  %4411 = vst [vmem:[%s7794_s3 + $0x1c8] sm:$0xff] %v5009_v22  ;;  %vm3615_vm15 = vcmp.gt.f32.partialorder %v6894_v21, 1.0  ;;  %vm2078_vm0 = vcmp.gt.f32.partialorder %v6860_v50, 1.0  ;;  %v1947_v62 = vadd.f32 %v1942_v47, %v6850_v44 }
 0x1a2   :  { %4408 = vst [vmem:[%s7794_s3 + $0x1b0] sm:$0xf] %v5006_v57  ;;  %4005 = vst [vmem:[%s7795_s4 + $0x198] sm:$0xf] %v3905_v29  ;;  %vm4105_vm1 = vcmp.gt.f32.partialorder %v3905_v29, 1.0  ;;  %v3509_v36 = vadd.f32 %v3409_v61, %v3309_v30  ;;  %vm3609_vm2 = vcmp.gt.f32.partialorder %v3409_v61, 1.0  ;;  %v2070_v17 = vadd.f32 %v6606_v42, %v5698_v15 }
 0x1a3   :  { %4014 = vst [vmem:[%s7795_s4 + $0x1e0] sm:$0xff] %v3914_v1  ;;  %vm4114_vm3 = vcmp.gt.f32.partialorder %v3914_v1, 1.0  ;;  %v3412_v5 = vld [vmem:[%s7795_s4 + $0x1d0] sm:$0xf]  ;;  %v6947_v10 = vpop.f32.mrb[40].mxu0  ;;  %v5003_v11 = vsel %vm4105_vm1, 1.0, %v5425_v0  ;;  %v2190_v32 = vadd.f32 %v6667_v56, %v5692_v14  ;;  %v2192_v55 = vadd.f32 %v6673_v13, %v5692_v14 }
 0x1a4   :  { %v4907_v19 = vsel %vm3609_vm2, 1.0, %v5425_v0  ;;  %v5012_v26 = vsel %vm4114_vm3, 1.0, %v5425_v0  ;;  %v4913_v31 = vsel %vm3615_vm15, 1.0, %v5425_v0  ;;  %4405 = vst [vmem:[%s7794_s3 + $0x198] sm:$0xf] %v5003_v11  ;;  %v3512_v47 = vadd.f32 %v3412_v5, %v3312_v35  ;;  %v6962_v24 = vpop.f32.mrb[40].mxu1 }
 0x1a5   :  { %v3909_v45 = vsub.f32 %v3509_v36, %v4907_v19  ;;  %4414 = vst [vmem:[%s7794_s3 + $0x1e0] sm:$0xff] %v5012_v26  ;;  %v3915_v37 = vsub.f32 %v3515_v23, %v4913_v31  ;;  %vm3612_vm4 = vcmp.gt.f32.partialorder %v3412_v5, 1.0  ;;  %v6964_v52 = vpop.f32.mrb[41].mxu0  ;;  %v4698_v60 = vsel %vm2078_vm0, 1.0, %v5425_v0  ;;  %v6973_v63 = vpop.f32.mrb[41].mxu1 }
 0x1a6   :  { %v4910_v38 = vsel %vm3612_vm4, 1.0, %v5425_v0  ;;  %vm1951_vm5 = vcmp.gt.f32.partialorder %v6850_v44, 1.0  ;;  %v2090_v50 = vsub.f32 %v6889_v54, %v4698_v60  ;;  %v6982_v51 = vpop.f32.mrb[42].mxu0  ;;  %4703 = vst [vmem:[%s7794_s3 + $0x1f8] sm:$0xf] %v2070_v17  ;;  %v6992_v9 = vpop.f32.mrb[42].mxu1  ;;  %v2318_v54 = vadd.f32 %v6671_v6, %v5692_v14 }
 0x1a7   :  { %4009 = vst [vmem:[%s7795_s4 + $0x1b8] sm:$0xf] %v3909_v45  ;;  %vm4109_vm6 = vcmp.gt.f32.partialorder %v3909_v45, 1.0  ;;  %4015 = vst [vmem:[%s7795_s4 + $0x1e8] sm:$0xff] %v3915_v37  ;;  %vm4115_vm7 = vcmp.gt.f32.partialorder %v3915_v37, 1.0  ;;  %v3912_v28 = vsub.f32 %v3512_v47, %v4910_v38  ;;  %v4683_v2 = vsel %vm1951_vm5, 1.0, %v5425_v0 }
 0x1a8   :  { %v5007_v44 = vsel %vm4109_vm6, 1.0, %v5425_v0  ;;  %v5013_v42 = vsel %vm4115_vm7, 1.0, %v5425_v0  ;;  %v6994_v8 = vpop.f32.mrb[43].mxu0  ;;  %4706 = vst [vmem:[%s7795_s4 + $0x1f0] sm:$0xf] %v2090_v50  ;;  %v1963_v56 = vsub.f32 %v1947_v62, %v4683_v2  ;;  %v7012_v58 = vpop.f32.mrb[43].mxu1  ;;  %v2200_v7 = vadd.f32 %v2190_v32, %v6881_v53 }
 0x1a9   :  { %4409 = vst [vmem:[%s7794_s3 + $0x1b8] sm:$0xf] %v5007_v44  ;;  %4415 = vst [vmem:[%s7794_s3 + $0x1e8] sm:$0xff] %v5013_v42  ;;  %vm4112_vm8 = vcmp.gt.f32.partialorder %v3912_v28, 1.0  ;;  %v2320_v3 = vadd.f32 %v6687_v16, %v5692_v14  ;;  %v2196_v12 = vadd.f32 %v6710_v39, %v5698_v15  ;;  %v2201_v13 = vadd.f32 %v2192_v55, %v6894_v21 }
 0x1aa   :  { %4012 = vst [vmem:[%s7795_s4 + $0x1d0] sm:$0xf] %v3912_v28  ;;  %v5010_v59 = vsel %vm4112_vm8, 1.0, %v5425_v0  ;;  %4691 = vst [vmem:[%s7795_s4 + $0x1d8] sm:$0xf] %v1963_v56  ;;  %v2075_v6 = vadd.f32 %v2070_v17, %v1963_v56  ;;  %vm2079_vm9 = vcmp.gt.f32.partialorder %v1963_v56, 1.0  ;;  %v2216_v16 = vsub.f32 %v2200_v7, %v6914_v4 }
 0x1ab   :  { %4412 = vst [vmem:[%s7794_s3 + $0x1d0] sm:$0xf] %v5010_v59  ;;  %vm2206_vm10 = vcmp.gt.f32.partialorder %v2090_v50, 1.0  ;;  %v4699_v53 = vsel %vm2079_vm9, 1.0, %v5425_v0  ;;  %v2202_v34 = vadd.f32 %v2196_v12, %v2090_v50  ;;  %4718 = vst [vmem:[%s7794_s3 + $0x210] sm:$0xf] %v2196_v12  ;;  %v2217_v29 = vsub.f32 %v2201_v13, %v4913_v31 }
 0x1ac   :  { %v4714_v39 = vsel %vm2206_vm10, 1.0, %v5425_v0  ;;  %v7033_v23 = vsub.f32 %v2075_v6, %v4699_v53  ;;  %v2324_v30 = vadd.f32 %v6721_v40, %v5698_v15  ;;  %v2198_v21 = vadd.f32 %v6727_v20, %v5698_v15  ;;  %v3316_v40 = vld [vmem:[%s7794_s3 + $0x1f0] sm:$0xf]  ;;  %v3313_v31 = vld [vmem:[%s7794_s3 + $0x1d8] sm:$0xf] }
 0x1ad   :  { %v3518_v1 = vadd.f32 %v2216_v16, %v2190_v32  ;;  %vm3618_vm11 = vcmp.gt.f32.partialorder %v2216_v16, 1.0  ;;  %v2328_v22 = vadd.f32 %v2318_v54, %v2216_v16  ;;  %v7039_v4 = vsub.f32 %v2202_v34, %v4714_v39  ;;  %v3317_v59 = vld [vmem:[%s7794_s3 + $0x1f8] sm:$0xf] }
 0x1ae   :  { %4707 = vst [vmem:[%s7795_s4 + $0x1f8] sm:$0xf] %v7033_v23  ;;  %v4916_v57 = vsel %vm3618_vm11, 1.0, %v5425_v0  ;;  %v3519_v61 = vadd.f32 %v2217_v29, %v2192_v55  ;;  %vm3619_vm12 = vcmp.gt.f32.partialorder %v2217_v29, 1.0  ;;  %v2329_v62 = vadd.f32 %v2320_v3, %v2217_v29  ;;  %4734 = vst [vmem:[%s7794_s3 + $0x230] sm:$0xf] %v2324_v30 }
 0x1af   :  { %4719 = vst [vmem:[%s7794_s3 + $0x218] sm:$0xf] %v2198_v21  ;;  %v3416_v20 = vld [vmem:[%s7795_s4 + $0x1f0] sm:$0xf]  ;;  %v3918_v36 = vsub.f32 %v3518_v1, %v4916_v57  ;;  %v7058_v5 = vsub.f32 %v2328_v22, %v4916_v57  ;;  %v4917_v11 = vsel %vm3619_vm12, 1.0, %v5425_v0  ;;  %v7066_v19 = vadd.f32 %v2324_v30, %v7039_v4 }
 0x1b0   :  { %4722 = vst [vmem:[%s7795_s4 + $0x210] sm:$0xf] %v7039_v4  ;;  %v3516_v26 = vadd.f32 %v3416_v20, %v3316_v40  ;;  %vm3616_vm13 = vcmp.gt.f32.partialorder %v3416_v20, 1.0  ;;  %v3919_v35 = vsub.f32 %v3519_v61, %v4917_v11  ;;  %v7071_v45 = vsub.f32 %v2329_v62, %v4917_v11  ;;  %v7082_v60 = vpop.f32.mrb[44].mxu0 }
 0x1b1   :  { %v4914_v37 = vsel %vm3616_vm13, 1.0, %v5425_v0  ;;  %v3413_v47 = vld [vmem:[%s7795_s4 + $0x1d8] sm:$0xf]  ;;  %4018 = vst [vmem:[%s7795_s4 + $0x200] sm:$0xff] %v3918_v36  ;;  %vm4118_vm14 = vcmp.gt.f32.partialorder %v3918_v36, 1.0  ;;  %v3522_v38 = vadd.f32 %v7058_v5, %v2318_v54  ;;  %vm3622_vm15 = vcmp.gt.f32.partialorder %v7058_v5, 1.0 }
 0x1b2   :  { %v3916_v17 = vsub.f32 %v3516_v26, %v4914_v37  ;;  %v3513_v28 = vadd.f32 %v3413_v47, %v3313_v31  ;;  %vm3613_vm0 = vcmp.gt.f32.partialorder %v3413_v47, 1.0  ;;  %v5016_v50 = vsel %vm4118_vm14, 1.0, %v5425_v0  ;;  %4019 = vst [vmem:[%s7795_s4 + $0x208] sm:$0xff] %v3919_v35  ;;  %v7088_v44 = vpop.f32.mrb[44].mxu1  ;;  %v7090_v42 = vpop.f32.mrb[45].mxu0 }
 0x1b3   :  { %v4911_v2 = vsel %vm3613_vm0, 1.0, %v5425_v0  ;;  %4418 = vst [vmem:[%s7794_s3 + $0x200] sm:$0xff] %v5016_v50  ;;  %v7097_v32 = vsel %vm3622_vm15, 1.0, %v5425_v0  ;;  %vm4119_vm1 = vcmp.gt.f32.partialorder %v3919_v35, 1.0  ;;  %v3523_v56 = vadd.f32 %v7071_v45, %v2320_v3  ;;  %v7100_v54 = vpop.f32.mrb[45].mxu1 }
 0x1b4   :  { %4016 = vst [vmem:[%s7795_s4 + $0x1f0] sm:$0xf] %v3916_v17  ;;  %vm4116_vm2 = vcmp.gt.f32.partialorder %v3916_v17, 1.0  ;;  %v3913_v55 = vsub.f32 %v3513_v28, %v4911_v2  ;;  %v3922_v7 = vsub.f32 %v3522_v38, %v7097_v32  ;;  %v5017_v12 = vsel %vm4119_vm1, 1.0, %v5425_v0  ;;  %v7120_v53 = vpop.f32.mrb[46].mxu0 }
 0x1b5   :  { %v5014_v6 = vsel %vm4116_vm2, 1.0, %v5425_v0  ;;  %v3417_v3 = vld [vmem:[%s7795_s4 + $0x1f8] sm:$0xf]  ;;  %4419 = vst [vmem:[%s7794_s3 + $0x208] sm:$0xff] %v5017_v12  ;;  %vm3623_vm3 = vcmp.gt.f32.partialorder %v7071_v45, 1.0  ;;  %vm2334_vm4 = vcmp.gt.f32.partialorder %v7039_v4, 1.0  ;;  %v2203_v13 = vadd.f32 %v2198_v21, %v7033_v23 }
 0x1b6   :  { %4416 = vst [vmem:[%s7794_s3 + $0x1f0] sm:$0xf] %v5014_v6  ;;  %4013 = vst [vmem:[%s7795_s4 + $0x1d8] sm:$0xf] %v3913_v55  ;;  %vm4113_vm5 = vcmp.gt.f32.partialorder %v3913_v55, 1.0  ;;  %v3517_v16 = vadd.f32 %v3417_v3, %v3317_v59  ;;  %vm3617_vm6 = vcmp.gt.f32.partialorder %v3417_v3, 1.0  ;;  %v2326_v26 = vadd.f32 %v6729_v46, %v5698_v15 }
 0x1b7   :  { %4022 = vst [vmem:[%s7795_s4 + $0x220] sm:$0xff] %v3922_v7  ;;  %vm4122_vm7 = vcmp.gt.f32.partialorder %v3922_v7, 1.0  ;;  %v3420_v34 = vld [vmem:[%s7795_s4 + $0x210] sm:$0xf]  ;;  %v7134_v39 = vpop.f32.mrb[46].mxu1  ;;  %v5011_v29 = vsel %vm4113_vm5, 1.0, %v5425_v0  ;;  %v2446_v46 = vadd.f32 %v6805_v18, %v5692_v14  ;;  %v2574_v18 = vadd.f32 %v6823_v27, %v5692_v14 }
 0x1b8   :  { %v4915_v30 = vsel %vm3617_vm6, 1.0, %v5425_v0  ;;  %v5020_v21 = vsel %vm4122_vm7, 1.0, %v5425_v0  ;;  %v4921_v1 = vsel %vm3623_vm3, 1.0, %v5425_v0  ;;  %v3320_v22 = vld [vmem:[%s7794_s3 + $0x210] sm:$0xf]  ;;  %vm3620_vm8 = vcmp.gt.f32.partialorder %v3420_v34, 1.0 }
 0x1b9   :  { %4413 = vst [vmem:[%s7794_s3 + $0x1d8] sm:$0xf] %v5011_v29  ;;  %v3917_v57 = vsub.f32 %v3517_v16, %v4915_v30  ;;  %4422 = vst [vmem:[%s7794_s3 + $0x220] sm:$0xff] %v5020_v21  ;;  %v3923_v61 = vsub.f32 %v3523_v56, %v4921_v1  ;;  %v3520_v62 = vadd.f32 %v3420_v34, %v3320_v22  ;;  %v7151_v40 = vpop.f32.mrb[47].mxu0  ;;  %v7153_v20 = vpop.f32.mrb[47].mxu1  ;;  %v4918_v36 = vsel %vm3620_vm8, 1.0, %v5425_v0 }
 0x1ba   :  { %v4730_v11 = vsel %vm2334_vm4, 1.0, %v5425_v0  ;;  %vm2207_vm9 = vcmp.gt.f32.partialorder %v7033_v23, 1.0  ;;  %4735 = vst [vmem:[%s7794_s3 + $0x238] sm:$0xf] %v2326_v26  ;;  %v2448_v47 = vadd.f32 %v6825_v25, %v5692_v14  ;;  %v2456_v17 = vadd.f32 %v2446_v46, %v7058_v5  ;;  %v3324_v29 = vld [vmem:[%s7794_s3 + $0x230] sm:$0xf] }
 0x1bb   :  { %4017 = vst [vmem:[%s7795_s4 + $0x1f8] sm:$0xf] %v3917_v57  ;;  %vm4117_vm10 = vcmp.gt.f32.partialorder %v3917_v57, 1.0  ;;  %4023 = vst [vmem:[%s7795_s4 + $0x228] sm:$0xff] %v3923_v61  ;;  %vm4123_vm11 = vcmp.gt.f32.partialorder %v3923_v61, 1.0  ;;  %v3920_v31 = vsub.f32 %v3520_v62, %v4918_v36  ;;  %v2346_v35 = vsub.f32 %v7066_v19, %v4730_v11 }
 0x1bc   :  { %v5015_v4 = vsel %vm4117_vm10, 1.0, %v5425_v0  ;;  %v5021_v23 = vsel %vm4123_vm11, 1.0, %v5425_v0  ;;  %v4715_v37 = vsel %vm2207_vm9, 1.0, %v5425_v0  ;;  %v2576_v28 = vadd.f32 %v6833_v41, %v5692_v14  ;;  %v3321_v62 = vld [vmem:[%s7794_s3 + $0x218] sm:$0xf] }
 0x1bd   :  { %4417 = vst [vmem:[%s7794_s3 + $0x1f8] sm:$0xf] %v5015_v4  ;;  %4423 = vst [vmem:[%s7794_s3 + $0x228] sm:$0xff] %v5021_v23  ;;  %vm4120_vm12 = vcmp.gt.f32.partialorder %v3920_v31, 1.0  ;;  %v2219_v19 = vsub.f32 %v2203_v13, %v4715_v37  ;;  %v2452_v50 = vadd.f32 %v6848_v43, %v5698_v15  ;;  %v2457_v25 = vadd.f32 %v2448_v47, %v7071_v45 }
 0x1be   :  { %4020 = vst [vmem:[%s7795_s4 + $0x210] sm:$0xf] %v3920_v31  ;;  %4738 = vst [vmem:[%s7795_s4 + $0x230] sm:$0xf] %v2346_v35  ;;  %v5018_v38 = vsel %vm4120_vm12, 1.0, %v5425_v0  ;;  %vm2462_vm14 = vcmp.gt.f32.partialorder %v2346_v35, 1.0  ;;  %v2472_v41 = vsub.f32 %v2456_v17, %v7097_v32  ;;  %v2580_v59 = vadd.f32 %v6856_v49, %v5698_v15 }
 0x1bf   :  { %4420 = vst [vmem:[%s7794_s3 + $0x210] sm:$0xf] %v5018_v38  ;;  %4723 = vst [vmem:[%s7795_s4 + $0x218] sm:$0xf] %v2219_v19  ;;  %v2331_v27 = vadd.f32 %v2326_v26, %v2219_v19  ;;  %vm2335_vm13 = vcmp.gt.f32.partialorder %v2219_v19, 1.0  ;;  %v2458_v2 = vadd.f32 %v2452_v50, %v2346_v35  ;;  %v4746_v43 = vsel %vm2462_vm14, 1.0, %v5425_v0 }
 0x1c0   :  { %v4731_v5 = vsel %vm2335_vm13, 1.0, %v5425_v0  ;;  %4750 = vst [vmem:[%s7794_s3 + $0x250] sm:$0xf] %v2452_v50  ;;  %v2473_v55 = vsub.f32 %v2457_v25, %v4921_v1  ;;  %v2454_v45 = vadd.f32 %v6858_v48, %v5698_v15  ;;  %v7218_v7 = vpop.f32.mrb[48].mxu0  ;;  %v3526_v12 = vadd.f32 %v2472_v41, %v2446_v46  ;;  %v7222_v3 = vpop.f32.mrb[48].mxu1 }
 0x1c1   :  { %v7212_v56 = vsub.f32 %v2331_v27, %v4731_v5  ;;  %vm3626_vm15 = vcmp.gt.f32.partialorder %v2472_v41, 1.0  ;;  %v2584_v32 = vadd.f32 %v2574_v18, %v2472_v41  ;;  %v7220_v6 = vsub.f32 %v2458_v2, %v4746_v43  ;;  %v7224_v13 = vpop.f32.mrb[49].mxu0  ;;  %4766 = vst [vmem:[%s7794_s3 + $0x270] sm:$0xf] %v2580_v59  ;;  %v7237_v34 = vpop.f32.mrb[49].mxu1 }
 0x1c2   :  { %v4924_v49 = vsel %vm3626_vm15, 1.0, %v5425_v0  ;;  %v3527_v16 = vadd.f32 %v2473_v55, %v2448_v47  ;;  %vm3627_vm0 = vcmp.gt.f32.partialorder %v2473_v55, 1.0  ;;  %v2585_v48 = vadd.f32 %v2576_v28, %v2473_v55  ;;  %4751 = vst [vmem:[%s7794_s3 + $0x258] sm:$0xf] %v2454_v45  ;;  %v3325_v38 = vld [vmem:[%s7794_s3 + $0x238] sm:$0xf] }
 0x1c3   :  { %4739 = vst [vmem:[%s7795_s4 + $0x238] sm:$0xf] %v7212_v56  ;;  %v3926_v21 = vsub.f32 %v3526_v12, %v4924_v49  ;;  %v7245_v1 = vsub.f32 %v2584_v32, %v4924_v49  ;;  %v4925_v22 = vsel %vm3627_vm0, 1.0, %v5425_v0  ;;  %4754 = vst [vmem:[%s7795_s4 + $0x250] sm:$0xf] %v7220_v6  ;;  %v2586_v57 = vadd.f32 %v2580_v59, %v7220_v6 }
 0x1c4   :  { %v3927_v36 = vsub.f32 %v3527_v16, %v4925_v22  ;;  %v7256_v11 = vsub.f32 %v2585_v48, %v4925_v22  ;;  %vm2590_vm8 = vcmp.gt.f32.partialorder %v7220_v6, 1.0  ;;  %v2459_v25 = vadd.f32 %v2454_v45, %v7212_v56 }
 0x1c5   :  { %v3424_v30 = vld [vmem:[%s7795_s4 + $0x230] sm:$0xf]  ;;  %4026 = vst [vmem:[%s7795_s4 + $0x240] sm:$0xff] %v3926_v21  ;;  %vm4126_vm2 = vcmp.gt.f32.partialorder %v3926_v21, 1.0  ;;  %v3530_v35 = vadd.f32 %v7245_v1, %v2574_v18  ;;  %vm3630_vm3 = vcmp.gt.f32.partialorder %v7245_v1, 1.0  ;;  %v4762_v48 = vsel %vm2590_vm8, 1.0, %v5425_v0 }
 0x1c6   :  { %v3524_v61 = vadd.f32 %v3424_v30, %v3324_v29  ;;  %vm3624_vm1 = vcmp.gt.f32.partialorder %v3424_v30, 1.0  ;;  %v3421_v31 = vld [vmem:[%s7795_s4 + $0x218] sm:$0xf]  ;;  %v5024_v37 = vsel %vm4126_vm2, 1.0, %v5425_v0  ;;  %4027 = vst [vmem:[%s7795_s4 + $0x248] sm:$0xff] %v3927_v36  ;;  %v7276_v19 = vsel %vm3630_vm3, 1.0, %v5425_v0 }
 0x1c7   :  { %v4922_v26 = vsel %vm3624_vm1, 1.0, %v5425_v0  ;;  %v3521_v23 = vadd.f32 %v3421_v31, %v3321_v62  ;;  %vm3621_vm4 = vcmp.gt.f32.partialorder %v3421_v31, 1.0  ;;  %4426 = vst [vmem:[%s7794_s3 + $0x240] sm:$0xff] %v5024_v37  ;;  %vm4127_vm5 = vcmp.gt.f32.partialorder %v3927_v36, 1.0  ;;  %v3328_v45 = vld [vmem:[%s7794_s3 + $0x250] sm:$0xf] }
 0x1c8   :  { %v3924_v4 = vsub.f32 %v3524_v61, %v4922_v26  ;;  %v4919_v46 = vsel %vm3621_vm4, 1.0, %v5425_v0  ;;  %v3531_v18 = vadd.f32 %v7256_v11, %v2576_v28  ;;  %v3930_v17 = vsub.f32 %v3530_v35, %v7276_v19 }
 0x1c9   :  { %v3921_v47 = vsub.f32 %v3521_v23, %v4919_v46  ;;  %v5025_v50 = vsel %vm4127_vm5, 1.0, %v5425_v0  ;;  %vm3631_vm7 = vcmp.gt.f32.partialorder %v7256_v11, 1.0  ;;  %vm2463_vm13 = vcmp.gt.f32.partialorder %v7212_v56, 1.0 }
 0x1ca   :  { %4024 = vst [vmem:[%s7795_s4 + $0x230] sm:$0xf] %v3924_v4  ;;  %vm4124_vm6 = vcmp.gt.f32.partialorder %v3924_v4, 1.0  ;;  %v3425_v28 = vld [vmem:[%s7795_s4 + $0x238] sm:$0xf]  ;;  %4427 = vst [vmem:[%s7794_s3 + $0x248] sm:$0xff] %v5025_v50  ;;  %v2582_v29 = vadd.f32 %v6862_v33, %v5698_v15  ;;  %v2602_v21 = vsub.f32 %v2586_v57, %v4762_v48  ;;  %v2702_v33 = vadd.f32 %v6947_v10, %v5692_v14 }
 0x1cb   :  { %v5022_v27 = vsel %vm4124_vm6, 1.0, %v5425_v0  ;;  %4021 = vst [vmem:[%s7795_s4 + $0x218] sm:$0xf] %v3921_v47  ;;  %vm4121_vm9 = vcmp.gt.f32.partialorder %v3921_v47, 1.0  ;;  %v3525_v5 = vadd.f32 %v3425_v28, %v3325_v38  ;;  %vm3625_vm10 = vcmp.gt.f32.partialorder %v3425_v28, 1.0  ;;  %4030 = vst [vmem:[%s7795_s4 + $0x260] sm:$0xff] %v3930_v17 }
 0x1cc   :  { %4424 = vst [vmem:[%s7794_s3 + $0x230] sm:$0xf] %v5022_v27  ;;  %vm4130_vm11 = vcmp.gt.f32.partialorder %v3930_v17, 1.0  ;;  %v3428_v41 = vld [vmem:[%s7795_s4 + $0x250] sm:$0xf]  ;;  %v5019_v2 = vsel %vm4121_vm9, 1.0, %v5425_v0  ;;  %v2830_v10 = vadd.f32 %v6962_v24, %v5692_v14  ;;  %v2704_v61 = vadd.f32 %v6964_v52, %v5692_v14 }
 0x1cd   :  { %v4923_v43 = vsel %vm3625_vm10, 1.0, %v5425_v0  ;;  %v5028_v55 = vsel %vm4130_vm11, 1.0, %v5425_v0  ;;  %v4929_v59 = vsel %vm3631_vm7, 1.0, %v5425_v0  ;;  %4421 = vst [vmem:[%s7794_s3 + $0x218] sm:$0xf] %v5019_v2  ;;  %v3528_v49 = vadd.f32 %v3428_v41, %v3328_v45 }
 0x1ce   :  { %v3925_v12 = vsub.f32 %v3525_v5, %v4923_v43  ;;  %4430 = vst [vmem:[%s7794_s3 + $0x260] sm:$0xff] %v5028_v55  ;;  %v3931_v32 = vsub.f32 %v3531_v18, %v4929_v59  ;;  %vm3628_vm12 = vcmp.gt.f32.partialorder %v3428_v41, 1.0  ;;  %v4747_v56 = vsel %vm2463_vm13, 1.0, %v5425_v0  ;;  %4767 = vst [vmem:[%s7794_s3 + $0x278] sm:$0xf] %v2582_v29 }
 0x1cf   :  { %v4926_v16 = vsel %vm3628_vm12, 1.0, %v5425_v0  ;;  %4770 = vst [vmem:[%s7795_s4 + $0x270] sm:$0xf] %v2602_v21  ;;  %v2475_v57 = vsub.f32 %v2459_v25, %v4747_v56  ;;  %v2712_v36 = vadd.f32 %v2702_v33, %v7245_v1  ;;  %v2832_v26 = vadd.f32 %v6973_v63, %v5692_v14  ;;  %v3329_v41 = vld [vmem:[%s7794_s3 + $0x258] sm:$0xf] }
 0x1d0   :  { %4025 = vst [vmem:[%s7795_s4 + $0x238] sm:$0xf] %v3925_v12  ;;  %vm4125_vm14 = vcmp.gt.f32.partialorder %v3925_v12, 1.0  ;;  %4031 = vst [vmem:[%s7795_s4 + $0x268] sm:$0xff] %v3931_v32  ;;  %vm4131_vm15 = vcmp.gt.f32.partialorder %v3931_v32, 1.0  ;;  %v3928_v30 = vsub.f32 %v3528_v49, %v4926_v16  ;;  %v2708_v31 = vadd.f32 %v6982_v51, %v5698_v15 }
 0x1d1   :  { %v5023_v6 = vsel %vm4125_vm14, 1.0, %v5425_v0  ;;  %v5029_v22 = vsel %vm4131_vm15, 1.0, %v5425_v0  ;;  %4755 = vst [vmem:[%s7795_s4 + $0x258] sm:$0xf] %v2475_v57  ;;  %v2587_v24 = vadd.f32 %v2582_v29, %v2475_v57  ;;  %vm2591_vm1 = vcmp.gt.f32.partialorder %v2475_v57, 1.0 }
 0x1d2   :  { %4425 = vst [vmem:[%s7794_s3 + $0x238] sm:$0xf] %v5023_v6  ;;  %4431 = vst [vmem:[%s7794_s3 + $0x268] sm:$0xff] %v5029_v22  ;;  %vm4128_vm0 = vcmp.gt.f32.partialorder %v3928_v30, 1.0  ;;  %v2713_v52 = vadd.f32 %v2704_v61, %v7256_v11  ;;  %vm2718_vm2 = vcmp.gt.f32.partialorder %v2602_v21, 1.0  ;;  %v4763_v1 = vsel %vm2591_vm1, 1.0, %v5425_v0 }
 0x1d3   :  { %4028 = vst [vmem:[%s7795_s4 + $0x250] sm:$0xf] %v3928_v30  ;;  %v5026_v62 = vsel %vm4128_vm0, 1.0, %v5425_v0  ;;  %v2728_v63 = vsub.f32 %v2712_v36, %v7276_v19  ;;  %v2714_v35 = vadd.f32 %v2708_v31, %v2602_v21  ;;  %v4778_v51 = vsel %vm2718_vm2, 1.0, %v5425_v0  ;;  %4782 = vst [vmem:[%s7794_s3 + $0x290] sm:$0xf] %v2708_v31 }
 0x1d4   :  { %4428 = vst [vmem:[%s7794_s3 + $0x250] sm:$0xf] %v5026_v62  ;;  %v7378_v4 = vsub.f32 %v2587_v24, %v4763_v1  ;;  %v2729_v23 = vsub.f32 %v2713_v52, %v4929_v59  ;;  %v2836_v37 = vadd.f32 %v6992_v9, %v5698_v15  ;;  %v2710_v11 = vadd.f32 %v6994_v8, %v5698_v15  ;;  %v3332_v9 = vld [vmem:[%s7794_s3 + $0x270] sm:$0xf] }
 0x1d5   :  { %v3534_v46 = vadd.f32 %v2728_v63, %v2702_v33  ;;  %vm3634_vm3 = vcmp.gt.f32.partialorder %v2728_v63, 1.0  ;;  %v2840_v18 = vadd.f32 %v2830_v10, %v2728_v63  ;;  %v7384_v19 = vsub.f32 %v2714_v35, %v4778_v51  ;;  %v3333_v21 = vld [vmem:[%s7794_s3 + $0x278] sm:$0xf] }
 0x1d6   :  { %4771 = vst [vmem:[%s7795_s4 + $0x278] sm:$0xf] %v7378_v4  ;;  %v4932_v47 = vsel %vm3634_vm3, 1.0, %v5425_v0  ;;  %v3535_v38 = vadd.f32 %v2729_v23, %v2704_v61  ;;  %vm3635_vm4 = vcmp.gt.f32.partialorder %v2729_v23, 1.0  ;;  %v2841_v17 = vadd.f32 %v2832_v26, %v2729_v23  ;;  %4798 = vst [vmem:[%s7794_s3 + $0x2b0] sm:$0xf] %v2836_v37 }
 0x1d7   :  { %4783 = vst [vmem:[%s7794_s3 + $0x298] sm:$0xf] %v2710_v11  ;;  %v3432_v8 = vld [vmem:[%s7795_s4 + $0x270] sm:$0xf]  ;;  %v3934_v50 = vsub.f32 %v3534_v46, %v4932_v47  ;;  %v7403_v27 = vsub.f32 %v2840_v18, %v4932_v47  ;;  %v4933_v28 = vsel %vm3635_vm4, 1.0, %v5425_v0  ;;  %v2842_v25 = vadd.f32 %v2836_v37, %v7384_v19 }
 0x1d8   :  { %4786 = vst [vmem:[%s7795_s4 + $0x290] sm:$0xf] %v7384_v19  ;;  %v3532_v5 = vadd.f32 %v3432_v8, %v3332_v9  ;;  %vm3632_vm5 = vcmp.gt.f32.partialorder %v3432_v8, 1.0  ;;  %v3935_v2 = vsub.f32 %v3535_v38, %v4933_v28  ;;  %v7414_v43 = vsub.f32 %v2841_v17, %v4933_v28  ;;  %v3429_v59 = vld [vmem:[%s7795_s4 + $0x258] sm:$0xf] }
 0x1d9   :  { %v4930_v55 = vsel %vm3632_vm5, 1.0, %v5425_v0  ;;  %4034 = vst [vmem:[%s7795_s4 + $0x280] sm:$0xff] %v3934_v50  ;;  %vm4134_vm6 = vcmp.gt.f32.partialorder %v3934_v50, 1.0  ;;  %v3538_v45 = vadd.f32 %v7403_v27, %v2830_v10  ;;  %vm3638_vm7 = vcmp.gt.f32.partialorder %v7403_v27, 1.0 }
 0x1da   :  { %v3932_v12 = vsub.f32 %v3532_v5, %v4930_v55  ;;  %v3529_v32 = vadd.f32 %v3429_v59, %v3329_v41  ;;  %vm3629_vm8 = vcmp.gt.f32.partialorder %v3429_v59, 1.0  ;;  %v5032_v49 = vsel %vm4134_vm6, 1.0, %v5425_v0  ;;  %4035 = vst [vmem:[%s7795_s4 + $0x288] sm:$0xff] %v3935_v2  ;;  %v3336_v24 = vld [vmem:[%s7794_s3 + $0x290] sm:$0xf] }
 0x1db   :  { %v4927_v16 = vsel %vm3629_vm8, 1.0, %v5425_v0  ;;  %4434 = vst [vmem:[%s7794_s3 + $0x280] sm:$0xff] %v5032_v49  ;;  %v7434_v48 = vsel %vm3638_vm7, 1.0, %v5425_v0  ;;  %vm4135_vm9 = vcmp.gt.f32.partialorder %v3935_v2, 1.0  ;;  %v3539_v29 = vadd.f32 %v7414_v43, %v2832_v26 }
 0x1dc   :  { %4032 = vst [vmem:[%s7795_s4 + $0x270] sm:$0xf] %v3932_v12  ;;  %vm4132_vm10 = vcmp.gt.f32.partialorder %v3932_v12, 1.0  ;;  %v3929_v30 = vsub.f32 %v3529_v32, %v4927_v16  ;;  %v3938_v6 = vsub.f32 %v3538_v45, %v7434_v48  ;;  %v5033_v22 = vsel %vm4135_vm9, 1.0, %v5425_v0 }
 0x1dd   :  { %v5030_v56 = vsel %vm4132_vm10, 1.0, %v5425_v0  ;;  %v3433_v33 = vld [vmem:[%s7795_s4 + $0x278] sm:$0xf]  ;;  %4435 = vst [vmem:[%s7794_s3 + $0x288] sm:$0xff] %v5033_v22  ;;  %vm3639_vm11 = vcmp.gt.f32.partialorder %v7414_v43, 1.0  ;;  %vm2846_vm12 = vcmp.gt.f32.partialorder %v7384_v19, 1.0  ;;  %v2715_v57 = vadd.f32 %v2710_v11, %v7378_v4 }
 0x1de   :  { %4432 = vst [vmem:[%s7794_s3 + $0x270] sm:$0xf] %v5030_v56  ;;  %4029 = vst [vmem:[%s7795_s4 + $0x258] sm:$0xf] %v3929_v30  ;;  %vm4129_vm13 = vcmp.gt.f32.partialorder %v3929_v30, 1.0  ;;  %v3533_v10 = vadd.f32 %v3433_v33, %v3333_v21  ;;  %vm3633_vm14 = vcmp.gt.f32.partialorder %v3433_v33, 1.0  ;;  %v2838_v23 = vadd.f32 %v7012_v58, %v5698_v15 }
 0x1df   :  { %4038 = vst [vmem:[%s7795_s4 + $0x2a0] sm:$0xff] %v3938_v6  ;;  %vm4138_vm15 = vcmp.gt.f32.partialorder %v3938_v6, 1.0  ;;  %v3436_v61 = vld [vmem:[%s7795_s4 + $0x290] sm:$0xf]  ;;  %v5027_v62 = vsel %vm4129_vm13, 1.0, %v5425_v0  ;;  %v4931_v36 = vsel %vm3633_vm14, 1.0, %v5425_v0  ;;  %v2958_v58 = vadd.f32 %v7082_v60, %v5692_v14 }
 0x1e0   :  { %v5036_v26 = vsel %vm4138_vm15, 1.0, %v5425_v0  ;;  %v4937_v31 = vsel %vm3639_vm11, 1.0, %v5425_v0  ;;  %4429 = vst [vmem:[%s7794_s3 + $0x258] sm:$0xf] %v5027_v62  ;;  %v3933_v52 = vsub.f32 %v3533_v10, %v4931_v36  ;;  %v3536_v63 = vadd.f32 %v3436_v61, %v3336_v24  ;;  %4799 = vst [vmem:[%s7794_s3 + $0x2b8] sm:$0xf] %v2838_v23 }
 0x1e1   :  { %4438 = vst [vmem:[%s7794_s3 + $0x2a0] sm:$0xff] %v5036_v26  ;;  %v3939_v1 = vsub.f32 %v3539_v29, %v4937_v31  ;;  %vm3636_vm0 = vcmp.gt.f32.partialorder %v3436_v61, 1.0  ;;  %v4794_v51 = vsel %vm2846_vm12, 1.0, %v5425_v0  ;;  %vm2719_vm1 = vcmp.gt.f32.partialorder %v7378_v4, 1.0  ;;  %v3337_v30 = vld [vmem:[%s7794_s3 + $0x298] sm:$0xf] }
 0x1e2   :  { %v4934_v35 = vsel %vm3636_vm0, 1.0, %v5425_v0  ;;  %4033 = vst [vmem:[%s7795_s4 + $0x278] sm:$0xf] %v3933_v52  ;;  %vm4133_vm2 = vcmp.gt.f32.partialorder %v3933_v52, 1.0  ;;  %v2858_v11 = vsub.f32 %v2842_v25, %v4794_v51  ;;  %v4779_v4 = vsel %vm2719_vm1, 1.0, %v5425_v0 }
 0x1e3   :  { %4039 = vst [vmem:[%s7795_s4 + $0x2a8] sm:$0xff] %v3939_v1  ;;  %vm4139_vm3 = vcmp.gt.f32.partialorder %v3939_v1, 1.0  ;;  %v3936_v37 = vsub.f32 %v3536_v63, %v4934_v35  ;;  %v5031_v46 = vsel %vm4133_vm2, 1.0, %v5425_v0  ;;  %v2731_v19 = vsub.f32 %v2715_v57, %v4779_v4 }
 0x1e4   :  { %v5037_v18 = vsel %vm4139_vm3, 1.0, %v5425_v0  ;;  %4433 = vst [vmem:[%s7794_s3 + $0x278] sm:$0xf] %v5031_v46  ;;  %4802 = vst [vmem:[%s7795_s4 + $0x2b0] sm:$0xf] %v2858_v11  ;;  %v3086_v60 = vadd.f32 %v7088_v44, %v5692_v14  ;;  %v2960_v47 = vadd.f32 %v7090_v42, %v5692_v14  ;;  %v2968_v17 = vadd.f32 %v2958_v58, %v7403_v27 }
 0x1e5   :  { %4439 = vst [vmem:[%s7794_s3 + $0x2a8] sm:$0xff] %v5037_v18  ;;  %4036 = vst [vmem:[%s7795_s4 + $0x290] sm:$0xf] %v3936_v37  ;;  %vm4136_vm4 = vcmp.gt.f32.partialorder %v3936_v37, 1.0  ;;  %v3088_v9 = vadd.f32 %v7100_v54, %v5692_v14  ;;  %v2964_v8 = vadd.f32 %v7120_v53, %v5698_v15  ;;  %v2843_v44 = vadd.f32 %v2838_v23, %v2731_v19 }
 0x1e6   :  { %v5034_v38 = vsel %vm4136_vm4, 1.0, %v5425_v0  ;;  %4787 = vst [vmem:[%s7795_s4 + $0x298] sm:$0xf] %v2731_v19  ;;  %vm2847_vm5 = vcmp.gt.f32.partialorder %v2731_v19, 1.0  ;;  %v2969_v42 = vadd.f32 %v2960_v47, %v7414_v43  ;;  %vm2974_vm6 = vcmp.gt.f32.partialorder %v2858_v11, 1.0 }
 0x1e7   :  { %4436 = vst [vmem:[%s7794_s3 + $0x290] sm:$0xf] %v5034_v38  ;;  %v4795_v50 = vsel %vm2847_vm5, 1.0, %v5425_v0  ;;  %v2984_v54 = vsub.f32 %v2968_v17, %v7434_v48  ;;  %v2970_v27 = vadd.f32 %v2964_v8, %v2858_v11  ;;  %v4810_v53 = vsel %vm2974_vm6, 1.0, %v5425_v0  ;;  %4814 = vst [vmem:[%s7794_s3 + $0x2d0] sm:$0xf] %v2964_v8 }
 0x1e8   :  { %v7536_v28 = vsub.f32 %v2843_v44, %v4795_v50  ;;  %v2985_v25 = vsub.f32 %v2969_v42, %v4937_v31  ;;  %v3092_v5 = vadd.f32 %v7134_v39, %v5698_v15  ;;  %v2966_v41 = vadd.f32 %v7151_v40, %v5698_v15  ;;  %v3340_v39 = vld [vmem:[%s7794_s3 + $0x2b0] sm:$0xf]  ;;  %v3341_v24 = vld [vmem:[%s7794_s3 + $0x2b8] sm:$0xf] }
 0x1e9   :  { %v3542_v2 = vadd.f32 %v2984_v54, %v2958_v58  ;;  %vm3642_vm7 = vcmp.gt.f32.partialorder %v2984_v54, 1.0  ;;  %v3096_v43 = vadd.f32 %v3086_v60, %v2984_v54  ;;  %v7542_v55 = vsub.f32 %v2970_v27, %v4810_v53 }
 0x1ea   :  { %4803 = vst [vmem:[%s7795_s4 + $0x2b8] sm:$0xf] %v7536_v28  ;;  %v4940_v59 = vsel %vm3642_vm7, 1.0, %v5425_v0  ;;  %v3543_v45 = vadd.f32 %v2985_v25, %v2960_v47  ;;  %vm3643_vm8 = vcmp.gt.f32.partialorder %v2985_v25, 1.0  ;;  %v3097_v12 = vadd.f32 %v3088_v9, %v2985_v25  ;;  %4830 = vst [vmem:[%s7794_s3 + $0x2f0] sm:$0xf] %v3092_v5 }
 0x1eb   :  { %4815 = vst [vmem:[%s7794_s3 + $0x2d8] sm:$0xf] %v2966_v41  ;;  %v3440_v40 = vld [vmem:[%s7795_s4 + $0x2b0] sm:$0xf]  ;;  %v3942_v32 = vsub.f32 %v3542_v2, %v4940_v59  ;;  %v7561_v49 = vsub.f32 %v3096_v43, %v4940_v59  ;;  %v4941_v16 = vsel %vm3643_vm8, 1.0, %v5425_v0  ;;  %v3098_v48 = vadd.f32 %v3092_v5, %v7542_v55 }
 0x1ec   :  { %4818 = vst [vmem:[%s7795_s4 + $0x2d0] sm:$0xf] %v7542_v55  ;;  %v3540_v29 = vadd.f32 %v3440_v40, %v3340_v39  ;;  %vm3640_vm9 = vcmp.gt.f32.partialorder %v3440_v40, 1.0  ;;  %v3943_v21 = vsub.f32 %v3543_v45, %v4941_v16  ;;  %v7572_v6 = vsub.f32 %v3097_v12, %v4941_v16 }
 0x1ed   :  { %v4938_v22 = vsel %vm3640_vm9, 1.0, %v5425_v0  ;;  %v3437_v56 = vld [vmem:[%s7795_s4 + $0x298] sm:$0xf]  ;;  %4042 = vst [vmem:[%s7795_s4 + $0x2c0] sm:$0xff] %v3942_v32  ;;  %vm4142_vm10 = vcmp.gt.f32.partialorder %v3942_v32, 1.0  ;;  %v3546_v33 = vadd.f32 %v7561_v49, %v3086_v60  ;;  %vm3646_vm11 = vcmp.gt.f32.partialorder %v7561_v49, 1.0 }
 0x1ee   :  { %v3940_v57 = vsub.f32 %v3540_v29, %v4938_v22  ;;  %v3537_v10 = vadd.f32 %v3437_v56, %v3337_v30  ;;  %vm3637_vm12 = vcmp.gt.f32.partialorder %v3437_v56, 1.0  ;;  %v5040_v61 = vsel %vm4142_vm10, 1.0, %v5425_v0  ;;  %4043 = vst [vmem:[%s7795_s4 + $0x2c8] sm:$0xff] %v3943_v21  ;;  %v3344_v58 = vld [vmem:[%s7794_s3 + $0x2d0] sm:$0xf] }
 0x1ef   :  { %v4935_v62 = vsel %vm3637_vm12, 1.0, %v5425_v0  ;;  %4442 = vst [vmem:[%s7794_s3 + $0x2c0] sm:$0xff] %v5040_v61  ;;  %v7592_v36 = vsel %vm3646_vm11, 1.0, %v5425_v0  ;;  %vm4143_vm13 = vcmp.gt.f32.partialorder %v3943_v21, 1.0  ;;  %v3547_v26 = vadd.f32 %v7572_v6, %v3088_v9 }
 0x1f0   :  { %4040 = vst [vmem:[%s7795_s4 + $0x2b0] sm:$0xf] %v3940_v57  ;;  %vm4140_vm14 = vcmp.gt.f32.partialorder %v3940_v57, 1.0  ;;  %v3937_v31 = vsub.f32 %v3537_v10, %v4935_v62  ;;  %v3946_v52 = vsub.f32 %v3546_v33, %v7592_v36  ;;  %v5041_v1 = vsel %vm4143_vm13, 1.0, %v5425_v0 }
 0x1f1   :  { %v5038_v63 = vsel %vm4140_vm14, 1.0, %v5425_v0  ;;  %v3441_v35 = vld [vmem:[%s7795_s4 + $0x2b8] sm:$0xf]  ;;  %4443 = vst [vmem:[%s7794_s3 + $0x2c8] sm:$0xff] %v5041_v1  ;;  %vm3647_vm15 = vcmp.gt.f32.partialorder %v7572_v6, 1.0  ;;  %vm3102_vm0 = vcmp.gt.f32.partialorder %v7542_v55, 1.0  ;;  %v2971_v51 = vadd.f32 %v2966_v41, %v7536_v28 }
 0x1f2   :  { %4440 = vst [vmem:[%s7794_s3 + $0x2b0] sm:$0xf] %v5038_v63  ;;  %4037 = vst [vmem:[%s7795_s4 + $0x298] sm:$0xf] %v3937_v31  ;;  %vm4137_vm1 = vcmp.gt.f32.partialorder %v3937_v31, 1.0  ;;  %v3541_v23 = vadd.f32 %v3441_v35, %v3341_v24  ;;  %vm3641_vm2 = vcmp.gt.f32.partialorder %v3441_v35, 1.0  ;;  %v3094_v9 = vadd.f32 %v7153_v20, %v5698_v15 }
 0x1f3   :  { %4046 = vst [vmem:[%s7795_s4 + $0x2e0] sm:$0xff] %v3946_v52  ;;  %vm4146_vm3 = vcmp.gt.f32.partialorder %v3946_v52, 1.0  ;;  %v3444_v37 = vld [vmem:[%s7795_s4 + $0x2d0] sm:$0xf]  ;;  %v5035_v11 = vsel %vm4137_vm1, 1.0, %v5425_v0  ;;  %v4939_v46 = vsel %vm3641_vm2, 1.0, %v5425_v0  ;;  %v3214_v20 = vadd.f32 %v7218_v7, %v5692_v14 }
 0x1f4   :  { %v5044_v18 = vsel %vm4146_vm3, 1.0, %v5425_v0  ;;  %v4945_v4 = vsel %vm3647_vm15, 1.0, %v5425_v0  ;;  %4437 = vst [vmem:[%s7794_s3 + $0x298] sm:$0xf] %v5035_v11  ;;  %v3941_v19 = vsub.f32 %v3541_v23, %v4939_v46  ;;  %v3544_v47 = vadd.f32 %v3444_v37, %v3344_v58  ;;  %4831 = vst [vmem:[%s7794_s3 + $0x2f8] sm:$0xf] %v3094_v9 }
 0x1f5   :  { %4446 = vst [vmem:[%s7794_s3 + $0x2e0] sm:$0xff] %v5044_v18  ;;  %v3947_v60 = vsub.f32 %v3547_v26, %v4945_v4  ;;  %vm3644_vm4 = vcmp.gt.f32.partialorder %v3444_v37, 1.0  ;;  %v4826_v17 = vsel %vm3102_vm0, 1.0, %v5425_v0  ;;  %vm2975_vm5 = vcmp.gt.f32.partialorder %v7536_v28, 1.0  ;;  %v3348_v39 = vld [vmem:[%s7794_s3 + $0x2f0] sm:$0xf] }
 0x1f6   :  { %v4942_v38 = vsel %vm3644_vm4, 1.0, %v5425_v0  ;;  %4041 = vst [vmem:[%s7795_s4 + $0x2b8] sm:$0xf] %v3941_v19  ;;  %vm4141_vm6 = vcmp.gt.f32.partialorder %v3941_v19, 1.0  ;;  %v3114_v44 = vsub.f32 %v3098_v48, %v4826_v17  ;;  %v4811_v54 = vsel %vm2975_vm5, 1.0, %v5425_v0 }
 0x1f7   :  { %4047 = vst [vmem:[%s7795_s4 + $0x2e8] sm:$0xff] %v3947_v60  ;;  %vm4147_vm7 = vcmp.gt.f32.partialorder %v3947_v60, 1.0  ;;  %v3944_v8 = vsub.f32 %v3544_v47, %v4942_v38  ;;  %v5039_v42 = vsel %vm4141_vm6, 1.0, %v5425_v0  ;;  %v2987_v27 = vsub.f32 %v2971_v51, %v4811_v54 }
 0x1f8   :  { %v5045_v50 = vsel %vm4147_vm7, 1.0, %v5425_v0  ;;  %4441 = vst [vmem:[%s7794_s3 + $0x2b8] sm:$0xf] %v5039_v42  ;;  %4834 = vst [vmem:[%s7795_s4 + $0x2f0] sm:$0xf] %v3114_v44  ;;  %v3220_v7 = vadd.f32 %v7222_v3, %v5698_v15  ;;  %vm3230_vm9 = vcmp.gt.f32.partialorder %v3114_v44, 1.0  ;;  %v3224_v28 = vadd.f32 %v3214_v20, %v7561_v49 }
 0x1f9   :  { %4447 = vst [vmem:[%s7794_s3 + $0x2e8] sm:$0xff] %v5045_v50  ;;  %4044 = vst [vmem:[%s7795_s4 + $0x2d0] sm:$0xf] %v3944_v8  ;;  %vm4144_vm8 = vcmp.gt.f32.partialorder %v3944_v8, 1.0  ;;  %v3216_v25 = vadd.f32 %v7224_v13, %v5692_v14  ;;  %v3099_v5 = vadd.f32 %v3094_v9, %v2987_v27  ;;  %vm3103_vm10 = vcmp.gt.f32.partialorder %v2987_v27, 1.0 }
 0x1fa   :  { %v5042_v53 = vsel %vm4144_vm8, 1.0, %v5425_v0  ;;  %4819 = vst [vmem:[%s7795_s4 + $0x2d8] sm:$0xf] %v2987_v27  ;;  %v3226_v41 = vadd.f32 %v3220_v7, %v3114_v44  ;;  %4846 = vst [vmem:[%s7794_s3 + $0x310] sm:$0xf] %v3220_v7  ;;  %v3222_v3 = vadd.f32 %v7237_v34, %v5698_v15  ;;  %v4827_v14 = vsel %vm3103_vm10, 1.0, %v5425_v0 }
 0x1fb   :  { %4444 = vst [vmem:[%s7794_s3 + $0x2d0] sm:$0xf] %v5042_v53  ;;  %v3240_v13 = vsub.f32 %v3224_v28, %v7592_v36  ;;  %v4842_v2 = vsel %vm3230_vm9, 1.0, %v5425_v0  ;;  %v3225_v43 = vadd.f32 %v3216_v25, %v7572_v6  ;;  %v3115_v55 = vsub.f32 %v3099_v5, %v4827_v14  ;;  %v3345_v6 = vld [vmem:[%s7794_s3 + $0x2d8] sm:$0xf] }
 0x1fc   :  { %v3242_v59 = vsub.f32 %v3226_v41, %v4842_v2  ;;  %4847 = vst [vmem:[%s7794_s3 + $0x318] sm:$0xf] %v3222_v3  ;;  %v3349_v36 = vld [vmem:[%s7794_s3 + $0x2f8] sm:$0xf] }
 0x1fd   :  { %v3550_v45 = vadd.f32 %v3240_v13, %v3214_v20  ;;  %vm3650_vm11 = vcmp.gt.f32.partialorder %v3240_v13, 1.0  ;;  %v3241_v12 = vsub.f32 %v3225_v43, %v4945_v4  ;;  %4835 = vst [vmem:[%s7795_s4 + $0x2f8] sm:$0xf] %v3115_v55  ;;  %v3227_v34 = vadd.f32 %v3222_v3, %v3115_v55 }
 0x1fe   :  { %v4948_v15 = vsel %vm3650_vm11, 1.0, %v5425_v0  ;;  %4850 = vst [vmem:[%s7795_s4 + $0x310] sm:$0xf] %v3242_v59  ;;  %vm3231_vm12 = vcmp.gt.f32.partialorder %v3115_v55, 1.0 }
 0x1ff   :  { %v3448_v40 = vld [vmem:[%s7795_s4 + $0x2f0] sm:$0xf]  ;;  %v3950_v32 = vsub.f32 %v3550_v45, %v4948_v15  ;;  %v3551_v49 = vadd.f32 %v3241_v12, %v3216_v25  ;;  %vm3651_vm13 = vcmp.gt.f32.partialorder %v3241_v12, 1.0  ;;  %v4843_v16 = vsel %vm3231_vm12, 1.0, %v5425_v0 }
 0x200   :  { %v3548_v48 = vadd.f32 %v3448_v40, %v3348_v39  ;;  %vm3648_vm14 = vcmp.gt.f32.partialorder %v3448_v40, 1.0  ;;  %v4949_v29 = vsel %vm3651_vm13, 1.0, %v5425_v0  ;;  %v3243_v30 = vsub.f32 %v3227_v34, %v4843_v16 }
 0x201   :  { %v4946_v21 = vsel %vm3648_vm14, 1.0, %v5425_v0  ;;  %v3445_v22 = vld [vmem:[%s7795_s4 + $0x2d8] sm:$0xf]  ;;  %4050 = vst [vmem:[%s7795_s4 + $0x300] sm:$0xff] %v3950_v32  ;;  %vm4150_vm15 = vcmp.gt.f32.partialorder %v3950_v32, 1.0  ;;  %v3951_v56 = vsub.f32 %v3551_v49, %v4949_v29 }
 0x202   :  { %v3948_v33 = vsub.f32 %v3548_v48, %v4946_v21  ;;  %v3545_v57 = vadd.f32 %v3445_v22, %v3345_v6  ;;  %vm3645_vm0 = vcmp.gt.f32.partialorder %v3445_v22, 1.0  ;;  %v5048_v10 = vsel %vm4150_vm15, 1.0, %v5425_v0  ;;  %4851 = vst [vmem:[%s7795_s4 + $0x318] sm:$0xf] %v3243_v30  ;;  %v3352_v26 = vld [vmem:[%s7794_s3 + $0x310] sm:$0xf] }
 0x203   :  { %v4943_v61 = vsel %vm3645_vm0, 1.0, %v5425_v0  ;;  %4450 = vst [vmem:[%s7794_s3 + $0x300] sm:$0xff] %v5048_v10  ;;  %4051 = vst [vmem:[%s7795_s4 + $0x308] sm:$0xff] %v3951_v56  ;;  %vm4151_vm1 = vcmp.gt.f32.partialorder %v3951_v56, 1.0  ;;  %v3353_v18 = vld [vmem:[%s7794_s3 + $0x318] sm:$0xf] }
 0x204   :  { %4048 = vst [vmem:[%s7795_s4 + $0x2f0] sm:$0xf] %v3948_v33  ;;  %vm4148_vm2 = vcmp.gt.f32.partialorder %v3948_v33, 1.0  ;;  %v3945_v62 = vsub.f32 %v3545_v57, %v4943_v61  ;;  %v5049_v31 = vsel %vm4151_vm1, 1.0, %v5425_v0  ;;  %v3449_v52 = vld [vmem:[%s7795_s4 + $0x2f8] sm:$0xf] }
 0x205   :  { %v5046_v24 = vsel %vm4148_vm2, 1.0, %v5425_v0  ;;  %v3452_v1 = vld [vmem:[%s7795_s4 + $0x310] sm:$0xf]  ;;  %4451 = vst [vmem:[%s7794_s3 + $0x308] sm:$0xff] %v5049_v31  ;;  %v3549_v63 = vadd.f32 %v3449_v52, %v3349_v36  ;;  %vm3649_vm4 = vcmp.gt.f32.partialorder %v3449_v52, 1.0 }
 0x206   :  { %4448 = vst [vmem:[%s7794_s3 + $0x2f0] sm:$0xf] %v5046_v24  ;;  %4045 = vst [vmem:[%s7795_s4 + $0x2d8] sm:$0xf] %v3945_v62  ;;  %vm4145_vm3 = vcmp.gt.f32.partialorder %v3945_v62, 1.0  ;;  %v3552_v35 = vadd.f32 %v3452_v1, %v3352_v26  ;;  %v4947_v23 = vsel %vm3649_vm4, 1.0, %v5425_v0 }
 0x207   :  { %v5043_v51 = vsel %vm4145_vm3, 1.0, %v5425_v0  ;;  %vm3652_vm5 = vcmp.gt.f32.partialorder %v3452_v1, 1.0  ;;  %v3949_v37 = vsub.f32 %v3549_v63, %v4947_v23 }
 0x208   :  { %4445 = vst [vmem:[%s7794_s3 + $0x2d8] sm:$0xf] %v5043_v51  ;;  %v4950_v11 = vsel %vm3652_vm5, 1.0, %v5425_v0 }
 0x209   :  { %v3952_v46 = vsub.f32 %v3552_v35, %v4950_v11  ;;  %v3453_v4 = vld [vmem:[%s7795_s4 + $0x318] sm:$0xf]  ;;  %4049 = vst [vmem:[%s7795_s4 + $0x2f8] sm:$0xf] %v3949_v37  ;;  %vm4149_vm6 = vcmp.gt.f32.partialorder %v3949_v37, 1.0 }
 0x20a   :  { %v3553_v58 = vadd.f32 %v3453_v4, %v3353_v18  ;;  %vm3653_vm7 = vcmp.gt.f32.partialorder %v3453_v4, 1.0  ;;  %v5047_v19 = vsel %vm4149_vm6, 1.0, %v5425_v0 }
 0x20b   :  { %4052 = vst [vmem:[%s7795_s4 + $0x310] sm:$0xf] %v3952_v46  ;;  %vm4152_vm8 = vcmp.gt.f32.partialorder %v3952_v46, 1.0  ;;  %v4951_v60 = vsel %vm3653_vm7, 1.0, %v5425_v0  ;;  %4449 = vst [vmem:[%s7794_s3 + $0x2f8] sm:$0xf] %v5047_v19 }
 0x20c   :  { %v5050_v47 = vsel %vm4152_vm8, 1.0, %v5425_v0  ;;  %v3953_v38 = vsub.f32 %v3553_v58, %v4951_v60 }
 0x20d   :  { %4452 = vst [vmem:[%s7794_s3 + $0x310] sm:$0xf] %v5050_v47 }
 0x20e   :  { %4053 = vst [vmem:[%s7795_s4 + $0x318] sm:$0xf] %v3953_v38  ;;  %vm4153_vm9 = vcmp.gt.f32.partialorder %v3953_v38, 1.0 }
 0x20f   :  { %v5051_v17 = vsel %vm4153_vm9, 1.0, %v5425_v0 }
 0x210   :  { %4453 = vst [vmem:[%s7794_s3 + $0x318] sm:$0xf] %v5051_v17 }
 0x211   :  { %4462 = vsyncpa [#allocation3], 1 }
 0x212   :  { %4463 = vsyncpa [#allocation5], 1 }

</bundles_post_ra>
